<compile_context>
chip_gen: v6e
topology: v6e:2x2x1
jax: 0.10.0
libtpu: 0.0.40
codegen_flags: <defaults>
</compile_context>

<pallas_src>
import functools

import jax
import jax.numpy as jnp
from jax import lax
from jax.experimental import pallas as pl
from jax.experimental.pallas import tpu as pltpu


def _projector_kernel(x_ref, w1_ref, b1_ref, w2_ref, b2_ref, o_ref, *, precision):
    # Layer 1: x @ w1 + b1, ReLU.  MXU matmul with f32 accumulation.
    h = jnp.dot(x_ref[...], w1_ref[...],
                precision=precision, preferred_element_type=jnp.float32)
    h = jnp.maximum(h + b1_ref[...], 0.0)          # (tm, D) + (1, D) broadcast
    # Layer 2.  h is rounded to the weight dtype (bf16 mixed-precision when the
    # weights are bf16 -- deliberate precision choice); accumulation stays f32.
    y = jnp.dot(h.astype(w2_ref.dtype), w2_ref[...],
                precision=precision, preferred_element_type=jnp.float32)
    y = jnp.maximum(y + b2_ref[...], 0.0)
    # Minimal epilogue (bias+ReLU+cast), lane-dense store (D is a multiple of
    # 128 for the default fpn_dim=256).
    o_ref[...] = y.astype(o_ref.dtype)


def _round_up(x, m):
    return ((x + m - 1) // m) * m


def _sublane_granularity(dtype):
    # Packed-sublane granularity: 8 rows for 4-byte, 16 for 2-byte, 32 for 1-byte.
    return max(8, 32 // jnp.dtype(dtype).itemsize)


def _vmem_capacity_bytes():
    # Generation-aware VMEM capacity; conservative 64 MiB (v7x) fallback.
    try:
        info = pltpu.get_tpu_info()
        cap = getattr(info, "vmem_capacity_bytes", None)
        if cap:
            return int(cap)
    except Exception:
        pass
    return 64 << 20


def projector_forward(x, w1, b1, w2, b2, *, tm=None, vmem_limit_bytes=None):
    """x: (..., D). Returns relu(relu(x @ w1 + b1) @ w2 + b2)."""
    orig_shape = x.shape
    D = orig_shape[-1]
    x2 = x.reshape(-1, D)
    M = x2.shape[0]

    isz = jnp.dtype(x.dtype).itemsize
    gran = _sublane_granularity(x.dtype)

    if vmem_limit_bytes is None:
        # ~3/4 of physical VMEM: 96 MiB on v5e/v6e (128 MiB), 48 MiB on v7x (64 MiB).
        vmem_limit_bytes = (_vmem_capacity_bytes() * 3) // 4
    # Headroom below the scoped limit for compiler-internal scratch.
    tm_budget = max(8 << 20, int(vmem_limit_bytes) - (8 << 20))

    if tm is None:
        # w1/w2 are single-buffered (constant index_map -> pl.Buffered(1)), so
        # only one copy of each DxD weight is resident; biases are negligible.
        weight_bytes = 2 * D * D * isz + 2 * D * isz
        # Per token row: double-buffered x tile + out tile, plus ~3 f32 rows of
        # in-kernel intermediates (h, y, accumulators).
        row_bytes = 4 * D * isz + 3 * D * 4
        tm_cap = max(gran, (tm_budget - weight_bytes) // row_bytes)
        # 1024 amortizes the ~0.35us per-grid-step pipeline overhead (kernel is
        # HBM/step-overhead bound at D=256) while staying well inside budget.
        tm = min(1024, _round_up(M, gran), tm_cap)
        tm = max(gran, (tm // gran) * gran)
    # TODO(synk): if 2*D*D resident weights no longer fit the VMEM budget
    # (f32 fpn_dim >~ 2300 on v5e/v6e, ~1600 on v7x), add a K/N reduction grid
    # axis with an f32 VMEM accumulator and pl.when init/finalize instead of
    # keeping both weights fully resident.

    # No pre-padding of the token axis: the last block may be partial; Pallas
    # masks the out-of-bounds rows on writeback (rows are independent, so the
    # garbage OOB rows read into the matmul never reach HBM).
    grid = (pl.cdiv(M, tm),)

    b1_2d = b1.reshape(1, D)
    b2_2d = b2.reshape(1, D)

    # Explicit MXU input precision: HIGHEST for f32 (PyTorch-parity numerics),
    # DEFAULT for bf16 operands (f32 accumulation either way).
    precision = (lax.Precision.HIGHEST
                 if jnp.dtype(x.dtype) == jnp.dtype(jnp.float32)
                 else lax.Precision.DEFAULT)

    # Advisory scheduling hint for XLA around the custom call (no extra HBM
    # passes any more, so this is now accurate).
    flops = 2 * 2 * M * D * D                       # two matmuls
    bytes_accessed = (2 * M * D + 2 * D * D + 2 * D) * isz
    cost = pl.CostEstimate(flops=flops, transcendentals=0,
                           bytes_accessed=bytes_accessed)

    # Constant-index blocks: single buffer (no refetch ever happens).
    if hasattr(pl, "Buffered"):
        resident = dict(pipeline_mode=pl.Buffered(1))
    else:  # older API: fall back to default double-buffering
        resident = {}

    out = pl.pallas_call(
        functools.partial(_projector_kernel, precision=precision),
        out_shape=jax.ShapeDtypeStruct((M, D), x.dtype),
        grid_spec=pltpu.PrefetchScalarGridSpec(
            num_scalar_prefetch=0,
            grid=grid,
            in_specs=[
                pl.BlockSpec((tm, D), lambda i: (i, 0)),              # x tile (pipelined)
                pl.BlockSpec((D, D), lambda i: (0, 0), **resident),   # w1 (resident, 1-buf)
                pl.BlockSpec((1, D), lambda i: (0, 0), **resident),   # b1
                pl.BlockSpec((D, D), lambda i: (0, 0), **resident),   # w2 (resident, 1-buf)
                pl.BlockSpec((1, D), lambda i: (0, 0), **resident),   # b2
            ],
            out_specs=pl.BlockSpec((tm, D), lambda i: (i, 0)),
        ),
        compiler_params=pltpu.CompilerParams(
            # Token tiles are independent.
            # TODO(synk): on v7x, verify this shards grid steps across the two
            # TensorCores; if not, switch this axis to pltpu.CORE_PARALLEL
            # (and re-check the per-core VMEM budget: each core then holds its
            # own copy of the resident weights).
            dimension_semantics=("parallel",),
            vmem_limit_bytes=int(vmem_limit_bytes),
        ),
        cost_estimate=cost,
    )(x2, w1, b1_2d, w2, b2_2d)

    return out.reshape(orig_shape)


def init_projector_params(key, fpn_dim, dtype=jnp.float32):
    """Deterministic init mimicking nn.Linear default (uniform +/- 1/sqrt(fan_in))."""
    k1, k2, k3, k4 = jax.random.split(key, 4)
    bound = 1.0 / jnp.sqrt(fpn_dim)
    # Stored as (in, out) so the kernel does x @ W.
    w1 = jax.random.uniform(k1, (fpn_dim, fpn_dim), dtype, -bound, bound)
    b1 = jax.random.uniform(k2, (fpn_dim,), dtype, -bound, bound)
    w2 = jax.random.uniform(k3, (fpn_dim, fpn_dim), dtype, -bound, bound)
    b2 = jax.random.uniform(k4, (fpn_dim,), dtype, -bound, bound)
    return w1, b1, w2, b2


def _ref_forward(x, w1, b1, w2, b2):
    return jnp.maximum(jnp.maximum(x @ w1 + b1, 0.0) @ w2 + b2, 0.0)


if __name__ == "__main__":
    fpn_dim = 256          # matches Projector default
    batch, seq = 2, 8      # small leading dims; Linear acts on last dim

    key = jax.random.PRNGKey(0)
    kx, kp, kr = jax.random.split(key, 3)
    x = jax.random.normal(kx, (batch, seq, fpn_dim), jnp.float32)
    w1, b1, w2, b2 = init_projector_params(kp, fpn_dim)

    # f32 path (HIGHEST MXU precision -> matches PyTorch Projector numerics).
    out = jax.block_until_ready(projector_forward(x, w1, b1, w2, b2))
    ref = _ref_forward(x, w1, b1, w2, b2)
    assert out.shape == (batch, seq, fpn_dim)
    assert jnp.allclose(out, ref, atol=1e-5, rtol=1e-5)

    # Ragged token count (M=15, not a multiple of 8): exercises the partial
    # last block / masked writeback path that replaced the jnp.pad + slice.
    xr = jax.random.normal(kr, (3, 5, fpn_dim), jnp.float32)
    out_r = jax.block_until_ready(projector_forward(xr, w1, b1, w2, b2))
    ref_r = _ref_forward(xr, w1, b1, w2, b2)
    assert out_r.shape == (3, 5, fpn_dim)
    assert jnp.allclose(out_r, ref_r, atol=1e-5, rtol=1e-5)

    # bf16 operands with f32 accumulation: ~2-3x effective MXU throughput and
    # half the HBM/VMEM traffic (loose tolerance vs. the f32 reference).
    out_bf16 = jax.block_until_ready(projector_forward(
        x.astype(jnp.bfloat16),
        w1.astype(jnp.bfloat16), b1.astype(jnp.bfloat16),
        w2.astype(jnp.bfloat16), b2.astype(jnp.bfloat16)))
    assert out_bf16.shape == (batch, seq, fpn_dim)
    assert jnp.allclose(out_bf16.astype(jnp.float32), ref, atol=0.2, rtol=0.1)

    print("KERNEL_OK")
</pallas_src>

<mosaic_0001>
module attributes {stable_mosaic.version = 11 : i64} {
  func.func @_projector_kernel(%arg0: i32, %arg1: memref<16x256xf32, #tpu.memory_space<vmem>>, %arg2: memref<256x256xf32, #tpu.memory_space<vmem>>, %arg3: memref<1x256xf32, #tpu.memory_space<vmem>>, %arg4: memref<256x256xf32, #tpu.memory_space<vmem>>, %arg5: memref<1x256xf32, #tpu.memory_space<vmem>>, %arg6: memref<16x256xf32, #tpu.memory_space<vmem>>) attributes {dimension_semantics = [#tpu.dimension_semantics<parallel>], iteration_bounds = array<i64: 1>, scalar_prefetch = 0 : i64, scratch_operands = 0 : i64, tpu.core_type = #tpu.core_type<tc>, window_params = [{transform_indices = @transform_0, window_bounds = array<i64: 16, 256>}, {pipeline_mode = #tpu.pipeline_mode<synchronous>, transform_indices = @transform_1, window_bounds = array<i64: 256, 256>}, {pipeline_mode = #tpu.pipeline_mode<synchronous>, transform_indices = @transform_2, window_bounds = array<i64: 1, 256>}, {pipeline_mode = #tpu.pipeline_mode<synchronous>, transform_indices = @transform_3, window_bounds = array<i64: 256, 256>}, {pipeline_mode = #tpu.pipeline_mode<synchronous>, transform_indices = @transform_4, window_bounds = array<i64: 1, 256>}, {transform_indices = @transform_5, window_bounds = array<i64: 16, 256>}]} {
    %c0 = arith.constant 0 : index
    %c0_0 = arith.constant 0 : index
    %0 = vector.load %arg1[%c0, %c0_0] : memref<16x256xf32, #tpu.memory_space<vmem>>, vector<16x256xf32>
    %c0_1 = arith.constant 0 : index
    %c0_2 = arith.constant 0 : index
    %1 = vector.load %arg2[%c0_1, %c0_2] : memref<256x256xf32, #tpu.memory_space<vmem>>, vector<256x256xf32>
    %cst = arith.constant dense<0.000000e+00> : vector<16x256xf32>
    %2 = tpu.matmul %0, %1, %cst {dimension_numbers = #tpu.dot_dimension_numbers<[1], [0], [0], [1], [0, 0, 1, 1], [], []>, precision = #tpu.contract_precision<fp32>} : vector<16x256xf32>, vector<256x256xf32>, vector<16x256xf32> -> vector<16x256xf32>
    %c0_3 = arith.constant 0 : index
    %c0_4 = arith.constant 0 : index
    %3 = vector.load %arg3[%c0_3, %c0_4] : memref<1x256xf32, #tpu.memory_space<vmem>>, vector<1x256xf32>
    %4 = vector.broadcast %3 : vector<1x256xf32> to vector<16x256xf32>
    %5 = arith.addf %2, %4 : vector<16x256xf32>
    %cst_5 = arith.constant 0.000000e+00 : f32
    %6 = vector.broadcast %cst_5 : f32 to vector<16x256xf32>
    %7 = arith.maximumf %5, %6 : vector<16x256xf32>
    %c0_6 = arith.constant 0 : index
    %c0_7 = arith.constant 0 : index
    %8 = vector.load %arg4[%c0_6, %c0_7] : memref<256x256xf32, #tpu.memory_space<vmem>>, vector<256x256xf32>
    %cst_8 = arith.constant dense<0.000000e+00> : vector<16x256xf32>
    %9 = tpu.matmul %7, %8, %cst_8 {dimension_numbers = #tpu.dot_dimension_numbers<[1], [0], [0], [1], [0, 0, 1, 1], [], []>, precision = #tpu.contract_precision<fp32>} : vector<16x256xf32>, vector<256x256xf32>, vector<16x256xf32> -> vector<16x256xf32>
    %c0_9 = arith.constant 0 : index
    %c0_10 = arith.constant 0 : index
    %10 = vector.load %arg5[%c0_9, %c0_10] : memref<1x256xf32, #tpu.memory_space<vmem>>, vector<1x256xf32>
    %11 = vector.broadcast %10 : vector<1x256xf32> to vector<16x256xf32>
    %12 = arith.addf %9, %11 : vector<16x256xf32>
    %cst_11 = arith.constant 0.000000e+00 : f32
    %13 = vector.broadcast %cst_11 : f32 to vector<16x256xf32>
    %14 = arith.maximumf %12, %13 : vector<16x256xf32>
    %c0_12 = arith.constant 0 : index
    %c0_13 = arith.constant 0 : index
    %15 = vector.load %arg6[%c0_12, %c0_13] : memref<16x256xf32, #tpu.memory_space<vmem>>, vector<16x256xf32>
    tpu.vector_store %arg6[%c0_12, %c0_13], %14 {strides = array<i32>} : memref<16x256xf32, #tpu.memory_space<vmem>>, vector<16x256xf32>,
    return
  }
  func.func @transform_0(%arg0: i32) -> (i32, i32) {
    %c0_i32 = arith.constant 0 : i32
    %c0_i32_0 = arith.constant 0 : i32
    return %arg0, %c0_i32 : i32, i32
  }
  func.func @transform_1(%arg0: i32) -> (i32, i32) {
    %c0_i32 = arith.constant 0 : i32
    %c0_i32_0 = arith.constant 0 : i32
    %c0_i32_1 = arith.constant 0 : i32
    return %c0_i32, %c0_i32_0 : i32, i32
  }
  func.func @transform_2(%arg0: i32) -> (i32, i32) {
    %c0_i32 = arith.constant 0 : i32
    %c0_i32_0 = arith.constant 0 : i32
    %c0_i32_1 = arith.constant 0 : i32
    return %c0_i32, %c0_i32_0 : i32, i32
  }
  func.func @transform_3(%arg0: i32) -> (i32, i32) {
    %c0_i32 = arith.constant 0 : i32
    %c0_i32_0 = arith.constant 0 : i32
    %c0_i32_1 = arith.constant 0 : i32
    return %c0_i32, %c0_i32_0 : i32, i32
  }
  func.func @transform_4(%arg0: i32) -> (i32, i32) {
    %c0_i32 = arith.constant 0 : i32
    %c0_i32_0 = arith.constant 0 : i32
    %c0_i32_1 = arith.constant 0 : i32
    return %c0_i32, %c0_i32_0 : i32, i32
  }
  func.func @transform_5(%arg0: i32) -> (i32, i32) {
    %c0_i32 = arith.constant 0 : i32
    %c0_i32_0 = arith.constant 0 : i32
    return %arg0, %c0_i32 : i32, i32
  }
}

</mosaic_0001>

<bundles_post_ra>
// kernel: tpu_custom_call.1
= control target key start
LH: loop header
LB: loop body
LE: loop exit
PB: predicated region body
PF: predicated region fallthrough
CT: control target
= control target key end

     0   :  { %10 = vsyncpa [#allocation3], 0  ;;  %s5361_s0 = inlined_call_operand.hbm [shape: f32[16,256], index: 0, kind: input, shape index: {}]   ;;  %s5362_s1 = inlined_call_operand.hbm [shape: f32[256,256], index: 1, kind: input, shape index: {}]   ;;  %s5363_s2 = inlined_call_operand.vmem [shape: f32[1,256], index: 2, kind: input, shape index: {}]   ;;  %s5364_s3 = inlined_call_operand.hbm [shape: f32[256,256], index: 3, kind: input, shape index: {}]   ;;  %s5365_s4 = inlined_call_operand.vmem [shape: f32[1,256], index: 4, kind: input, shape index: {}]   ;;  %s5366_s5 = inlined_call_operand.hbm [shape: f32[16,256], index: 5, kind: output, shape index: {}]  }
   0x1   :  { %11 = vsyncpa [#allocation6], 0 }
   0x2   :  { %12 = vsyncpa [#allocation4], 0  ;;  %s3032_s18 = smov [#allocation5]   ;;  %s3033_s20 = smov [#allocation2]  }
   0x3   :  { %s30_s19 = sshll.u32 %s3032_s18, 4  ;;  %s18_s21 = sshll.u32 %s3033_s20, 4  ;;  %s31_s19 = int_to_ptr.vmem [resolvable:$true] %s30_s19  ;;  %s19_s21 = int_to_ptr.vmem [resolvable:$true] %s18_s21 }
   0x4   :  { %s2954_s22 = scalar_lea.vmem %s31_s19, 8192  ;;  %p2959_p1 = scmp.lt.s32.totalorder %s31_s19, %s31_s19 }
   0x5   :  { %p2955_p0 = scmp.ne.s32.totalorder %s31_s19, %s2954_s22  ;;  %p2960_p2 = scmp.lt.s32.totalorder %s2954_s22, %s2954_s22 }
   0x7   :  { %p2961_p3 = por %p2960_p2, %p2959_p1 }
   0x9   :  { %p2962_p4 = pnand %p2961_p3, %p2955_p0 }
   0xb   :  { %2965 = shalt.err (!%p2962_p4)
}
   0xc   :  { %s3034_s23 = smov 256   ;;  %s3035_s24 = smov 16  }
   0xd   :  { %36 = dma.hbm_to_vmem [thread:$0]  %s5362_s1, 8192, %s31_s19, [#allocation6], %s3034_s23, %s3034_s23, %s3035_s24  }
   0xe   :  { %s2974_s27 = scalar_lea.vmem %s19_s21, 512  ;;  %p2979_p6 = scmp.lt.s32.totalorder %s19_s21, %s19_s21 }
   0xf   :  { %p2975_p5 = scmp.ne.s32.totalorder %s19_s21, %s2974_s27  ;;  %p2980_p7 = scmp.lt.s32.totalorder %s2974_s27, %s2974_s27 }
  0x11   :  { %p2981_p8 = por %p2980_p7, %p2979_p6 }
  0x13   :  { %p2982_p9 = pnand %p2981_p8, %p2975_p5 }
  0x15   :  { %2985 = shalt.err (!%p2982_p9)
}
  0x16   :  { %24 = dma.hbm_to_vmem [thread:$0]  %s5361_s0, 512, %s19_s21, [#allocation3], %s3034_s23, %s3034_s23, %s3035_s24  }
  0x17   :  { %s3036_s30 = smov [#allocation7]  }
  0x18   :  { %s44_s6 = sshll.u32 %s3036_s30, 4  ;;  %s45_s6 = int_to_ptr.vmem [resolvable:$true] %s44_s6 }
  0x19   :  { %s2994_s7 = scalar_lea.vmem %s45_s6, 8192  ;;  %p2999_p11 = scmp.lt.s32.totalorder %s45_s6, %s45_s6 }
  0x1a   :  { %p2995_p10 = scmp.ne.s32.totalorder %s45_s6, %s2994_s7  ;;  %p3000_p12 = scmp.lt.s32.totalorder %s2994_s7, %s2994_s7 }
  0x1c   :  { %p3001_p13 = por %p3000_p12, %p2999_p11 }
  0x1e   :  { %p3002_p0 = pnand %p3001_p13, %p2995_p10 }
  0x20   :  { %3005 = shalt.err (!%p3002_p0)
}
  0x21   :  { %50 = dma.hbm_to_vmem [thread:$0]  %s5364_s3, 8192, %s45_s6, [#allocation6], %s3034_s23, %s3034_s23, %s3035_s24  }
  0x22   :  { %3026 = dma.done.wait [#allocation3], 512  }
  0x23   :  { %3027 = vsyncadd [#allocation3], 4294966784 }
  0x24   :  { %3028 = dma.done.wait [#allocation6], 16384  }
  0x25   :  { %3029 = vsyncadd [#allocation6], 4294950912  ;;  %v97_v0 = vld [vmem:[#allocation5 + $0xf8] sm:$0xff]  ;;  %v96_v1 = vld [vmem:[#allocation5 + $0xf0] sm:$0xff] }
  0x26   :  { %v95_v2 = vld [vmem:[#allocation5 + $0xe8] sm:$0xff]  ;;  %v3086_v3 = vand.u32 4294901760, %v97_v0  ;;  %v3088_v4 = vand.u32 4294901760, %v96_v1  ;;  %v94_v6 = vld [vmem:[#allocation5 + $0xe0] sm:$0xff]  ;;  %v93_v7 = vld [vmem:[#allocation5 + $0xd8] sm:$0xff] }
  0x27   :  { %v3090_v5 = vand.u32 4294901760, %v95_v2  ;;  %v92_v8 = vld [vmem:[#allocation5 + $0xd0] sm:$0xff]  ;;  %v3092_v9 = vand.u32 4294901760, %v94_v6  ;;  %v3094_v10 = vand.u32 4294901760, %v93_v7  ;;  %v91_v12 = vld [vmem:[#allocation5 + $0xc8] sm:$0xff]  ;;  %v90_v13 = vld [vmem:[#allocation5 + $0xc0] sm:$0xff] }
  0x28   :  { %v3096_v11 = vand.u32 4294901760, %v92_v8  ;;  %v89_v14 = vld [vmem:[#allocation5 + $0xb8] sm:$0xff]  ;;  %143 = vmatprep.subr.mxu0 %v3086_v3  ;;  %v3099_v15 = vand.u32 4294901760, %v91_v12  ;;  %v3101_v16 = vand.u32 4294901760, %v90_v13  ;;  %v3106_v18 = vsub.f32 %v97_v0, %v3086_v3  ;;  %v3108_v19 = vld [vmem:[#allocation5 + $0xb0] sm:$0xff]  ;;  %v3110_v20 = vld [vmem:[#allocation5 + $0xa8] sm:$0xff] }
  0x29   :  { %v3103_v17 = vand.u32 4294901760, %v89_v14  ;;  %v3112_v21 = vld [vmem:[#allocation5 + $0xa0] sm:$0xff]  ;;  %145 = vmatpush1.msra.mxu0 %v3088_v4  ;;  %v3116_v22 = vand.u32 4294901760, %v3108_v19  ;;  %v3119_v23 = vsub.f32 %v96_v1, %v3088_v4  ;;  %v3122_v24 = vand.u32 4294901760, %v3110_v20  ;;  %v3127_v26 = vld [vmem:[#allocation5 + $0x98] sm:$0xff]  ;;  %v3129_v27 = vld [vmem:[#allocation5 + $0x90] sm:$0xff] }
  0x2a   :  { %v3125_v25 = vsub.f32 %v95_v2, %v3090_v5  ;;  %v3131_v28 = vld [vmem:[#allocation5 + $0x88] sm:$0xff]  ;;  %147 = vmatprep.subr.mxu0 %v3090_v5  ;;  %v5380_v29 = vand.u32 4294901760, %v3106_v18  ;;  %v3136_v30 = vand.u32 4294901760, %v3112_v21  ;;  %v3139_v31 = vsub.f32 %v94_v6, %v3092_v9  ;;  %v3153_v37 = vld [vmem:[#allocation5 + $0x80] sm:$0xff]  ;;  %v3177_v46 = vld [vmem:[#allocation5 + $0x78] sm:$0xff] }
  0x2b   :  { %5841 = vst [vmem:[#allocation12_spill] sm:$0xff] %v3122_v24  ;;  %v3142_v32 = vand.u32 4294901760, %v3127_v26  ;;  %149 = vmatpush1.msra.mxu0 %v3092_v9  ;;  %v5378_v33 = vand.u32 4294901760, %v3119_v23  ;;  %v3148_v35 = vsub.f32 %v93_v7, %v3094_v10  ;;  %v3151_v36 = vand.u32 4294901760, %v3129_v27  ;;  %v3187_v51 = vld [vmem:[#allocation5 + $0x70] sm:$0xff]  ;;  %v3194_v56 = vld [vmem:[#allocation5 + $0x68] sm:$0xff] }
  0x2c   :  { %5842 = vst [vmem:[#allocation13_spill] sm:$0xff] %v3136_v30  ;;  %v5377_v34 = vand.u32 4294901760, %v3125_v25  ;;  %151 = vmatprep.subr.mxu0 %v3094_v10  ;;  %v306_v38 = vsub.f32 %v3106_v18, %v5380_v29  ;;  %v5375_v39 = vand.u32 4294901760, %v3139_v31  ;;  %v3161_v40 = vsub.f32 %v92_v8, %v3096_v11  ;;  %v3206_v61 = vld [vmem:[#allocation5 + $0x60] sm:$0xff]  ;;  %v3218_v2 = vld [vmem:[#allocation5 + $0x58] sm:$0xff] }
  0x2d   :  { %5843 = vst [vmem:[#allocation14_spill] sm:$0xff] %v3142_v32  ;;  %5844 = vst [vmem:[#allocation15_spill] sm:$0xff] %v3151_v36  ;;  %v3164_v41 = vand.u32 4294901760, %v3131_v28  ;;  %153 = vmatpush1.msra.mxu0 %v3096_v11  ;;  %v312_v42 = vsub.f32 %v3119_v23, %v5378_v33  ;;  %v5373_v44 = vand.u32 4294901760, %v3148_v35  ;;  %v3175_v45 = vsub.f32 %v91_v12, %v3099_v15 }
  0x2e   :  { %v318_v43 = vsub.f32 %v3125_v25, %v5377_v34  ;;  %155 = vmatprep.subr.mxu0 %v3099_v15  ;;  %v307_v47 = vand.u32 4294901760, %v306_v38  ;;  %v324_v48 = vsub.f32 %v3139_v31, %v5375_v39  ;;  %v5372_v49 = vand.u32 4294901760, %v3161_v40  ;;  %v3309_v39 = vld [vmem:[#allocation5 + $0x28] sm:$0xff]  ;;  %v3319_v34 = vld [vmem:[#allocation5 + $0x20] sm:$0xff] }
  0x2f   :  { %5845 = vst [vmem:[#allocation16_spill] sm:$0xff] %v3164_v41  ;;  %v3185_v50 = vand.u32 4294901760, %v3153_v37  ;;  %157 = vmatpush1.msra.mxu0 %v3101_v16  ;;  %v313_v52 = vand.u32 4294901760, %v312_v42  ;;  %v330_v54 = vsub.f32 %v3148_v35, %v5373_v44  ;;  %v5370_v55 = vand.u32 4294901760, %v3175_v45 }
  0x30   :  { %v319_v53 = vand.u32 4294901760, %v318_v43  ;;  %159 = vmatprep.subr.mxu0 %v3103_v17  ;;  %308 = vmatprep.subr.mxu1 %v307_v47  ;;  %v325_v57 = vand.u32 4294901760, %v324_v48  ;;  %v336_v58 = vsub.f32 %v3161_v40, %v5372_v49  ;;  %v3201_v59 = vsub.f32 %v90_v13, %v3101_v16  ;;  %v3229_v13 = vld [vmem:[#allocation5 + $0x50] sm:$0xff] }
  0x31   :  { %5846 = vst [vmem:[#allocation17_spill] sm:$0xff] %v3185_v50  ;;  %v3204_v60 = vand.u32 4294901760, %v3177_v46  ;;  %161 = vmatpush1.msra.mxu0 %v3116_v22  ;;  %314 = vmatpush1.msra.mxu1 %v313_v52  ;;  %v331_v62 = vand.u32 4294901760, %v330_v54  ;;  %v342_v63 = vsub.f32 %v3175_v45, %v5370_v55  ;;  %v3213_v0 = vsub.f32 %v89_v14, %v3103_v17  ;;  %v3296_v49 = vld [vmem:[#allocation5 + $0x30] sm:$0xff] }
  0x32   :  { %v3216_v1 = vand.u32 4294901760, %v3187_v51  ;;  %163 = vmatprep.subr.mxu0 %v3122_v24  ;;  %320 = vmatprep.subr.mxu1 %v319_v53  ;;  %v337_v6 = vand.u32 4294901760, %v336_v58  ;;  %v5368_v7 = vand.u32 4294901760, %v3201_v59  ;;  %v3224_v8 = vsub.f32 %v3108_v19, %v3116_v22 }
  0x33   :  { %5847 = vst [vmem:[#allocation18_spill] sm:$0xff] %v3204_v60  ;;  %v3227_v12 = vand.u32 4294901760, %v3194_v56  ;;  %165 = vmatpush1.msra.mxu0 %v3136_v30  ;;  %326 = vmatpush1.msra.mxu1 %v325_v57  ;;  %v343_v14 = vand.u32 4294901760, %v342_v63  ;;  %v5367_v38 = vand.u32 4294901760, %v3213_v0  ;;  %v3235_v42 = vsub.f32 %v3110_v20, %v3122_v24  ;;  %v3252_v20 = vld [vmem:[#allocation5 + $0x48] sm:$0xff] }
  0x34   :  { %5848 = vst [vmem:[#allocation19_spill] sm:$0xff] %v3216_v1  ;;  %v3238_v43 = vand.u32 4294901760, %v3206_v61  ;;  %167 = vmatprep.subr.mxu0 %v3142_v32  ;;  %332 = vmatprep.subr.mxu1 %v331_v62  ;;  %v348_v19 = vsub.f32 %v3201_v59, %v5368_v7  ;;  %v5369_v47 = vand.u32 4294901760, %v3224_v8  ;;  %v3247_v48 = vsub.f32 %v3112_v21, %v3136_v30 }
  0x35   :  { %5849 = vst [vmem:[#allocation20_spill] sm:$0xff] %v3227_v12  ;;  %v3250_v52 = vand.u32 4294901760, %v3218_v2  ;;  %169 = vmatpush1.msra.mxu0 %v3151_v36  ;;  %338 = vmatpush1.msra.mxu1 %v337_v6  ;;  %v354_v53 = vsub.f32 %v3213_v0, %v5367_v38  ;;  %v5371_v54 = vand.u32 4294901760, %v3235_v42  ;;  %v3261_v57 = vsub.f32 %v3127_v26, %v3142_v32  ;;  %v3275_v38 = vld [vmem:[#allocation5 + $0x40] sm:$0xff] }
  0x36   :  { %5850 = vst [vmem:[#allocation21_spill] sm:$0xff] %v3238_v43  ;;  %v3264_v21 = vand.u32 4294901760, %v3229_v13  ;;  %171 = vmatprep.subr.mxu0 %v3164_v41  ;;  %344 = vmatprep.subr.mxu1 %v343_v14  ;;  %v349_v58 = vand.u32 4294901760, %v348_v19  ;;  %v360_v62 = vsub.f32 %v3224_v8, %v5369_v47  ;;  %v5374_v63 = vand.u32 4294901760, %v3247_v48  ;;  %v3285_v47 = vld [vmem:[#allocation5 + $0x38] sm:$0xff] }
  0x37   :  { %5851 = vst [vmem:[#allocation22_spill] sm:$0xff] %v3250_v52  ;;  %v3273_v6 = vsub.f32 %v3129_v27, %v3151_v36  ;;  %173 = vmatpush1.msra.mxu0 %v3185_v50  ;;  %v355_v26 = vand.u32 4294901760, %v354_v53  ;;  %v366_v14 = vsub.f32 %v3235_v42, %v5371_v54  ;;  %v5376_v19 = vand.u32 4294901760, %v3261_v57  ;;  %v3399_v36 = vld [vmem:[#allocation5 + $0x1f8] sm:$0xff] }
  0x38   :  { %5852 = vst [vmem:[#allocation23_spill] sm:$0xff] %v3264_v21  ;;  %v3283_v7 = vand.u32 4294901760, %v3252_v20  ;;  %350 = vmatpush1.msra.mxu1 %v349_v58  ;;  %175 = vmatprep.subr.mxu0 %v3204_v60  ;;  %v361_v27 = vand.u32 4294901760, %v360_v62  ;;  %v372_v55 = vsub.f32 %v3247_v48, %v5374_v63  ;;  %v3294_v54 = vsub.f32 %v3131_v28, %v3164_v41 }
  0x39   :  { %v5379_v53 = vand.u32 4294901760, %v3273_v6  ;;  %356 = vmatprep.subr.mxu1 %v355_v26  ;;  %177 = vmatpush1.msra.mxu0 %v3216_v1  ;;  %v367_v44 = vand.u32 4294901760, %v366_v14  ;;  %v378_v58 = vsub.f32 %v3261_v57, %v5376_v19  ;;  %v3303_v62 = vand.u32 4294901760, %v3275_v38 }
  0x3a   :  { %5853 = vst [vmem:[#allocation24_spill] sm:$0xff] %v3283_v7  ;;  %v3307_v63 = vsub.f32 %v3153_v37, %v3185_v50  ;;  %362 = vmatpush1.msra.mxu1 %v361_v27  ;;  %179 = vmatprep.subr.mxu0 %v3227_v12  ;;  %v373_v28 = vand.u32 4294901760, %v372_v55  ;;  %v5383_v14 = vand.u32 4294901760, %v3294_v54  ;;  %v3317_v19 = vand.u32 4294901760, %v3285_v47 }
  0x3b   :  { %5854 = vst [vmem:[#allocation25_spill] sm:$0xff] %v3303_v62  ;;  %v384_v26 = vsub.f32 %v3273_v6, %v5379_v53  ;;  %368 = vmatprep.subr.mxu1 %v367_v44  ;;  %181 = vmatpush1.msra.mxu0 %v3238_v43  ;;  %v379_v37 = vand.u32 4294901760, %v378_v58  ;;  %v3325_v55 = vsub.f32 %v3177_v46, %v3204_v60  ;;  %v3328_v33 = vand.u32 4294901760, %v3296_v49  ;;  %v3330_v53 = vld [vmem:[#allocation5 + $0x18] sm:$0xff] }
  0x3c   :  { %5855 = vst [vmem:[#allocation26_spill] sm:$0xff] %v3317_v19  ;;  %v5386_v27 = vand.u32 4294901760, %v3307_v63  ;;  %374 = vmatpush1.msra.mxu1 %v373_v28  ;;  %183 = vmatprep.subr.mxu0 %v3250_v52  ;;  %v390_v44 = vsub.f32 %v3294_v54, %v5383_v14  ;;  %v3338_v58 = vsub.f32 %v3187_v51, %v3216_v1  ;;  %v3341_v46 = vand.u32 4294901760, %v3309_v39  ;;  %v3355_v51 = vld [vmem:[#allocation5 + $0x10] sm:$0xff] }
  0x3d   :  { %5856 = vst [vmem:[#allocation27_spill] sm:$0xff] %v3328_v33  ;;  %v385_v29 = vand.u32 4294901760, %v384_v26  ;;  %380 = vmatprep.subr.mxu1 %v379_v37  ;;  %185 = vmatpush1.msra.mxu0 %v3264_v21  ;;  %v3350_v60 = vsub.f32 %v3194_v56, %v3227_v12  ;;  %v3353_v14 = vand.u32 4294901760, %v3319_v34  ;;  %v3364_v26 = vand.u32 4294901760, %v3330_v53  ;;  %v3366_v56 = vld [vmem:[#allocation5 + $0x8] sm:$0xff] }
  0x3e   :  { %5857 = vst [vmem:[#allocation28_spill] sm:$0xff] %v3341_v46  ;;  %v396_v28 = vsub.f32 %v3307_v63, %v5386_v27  ;;  %187 = vmatprep.subr.mxu0 %v3283_v7  ;;  %v391_v37 = vand.u32 4294901760, %v390_v44  ;;  %v3361_v27 = vsub.f32 %v3206_v61, %v3238_v43  ;;  %v5861_v50 = vand.u32 4294901760, %v3325_v55  ;;  %v3389_v44 = vld [vmem:[#allocation5] sm:$0xff] }
  0x3f   :  { %5858 = vst [vmem:[#allocation29_spill] sm:$0xff] %v3353_v14  ;;  %386 = vmatpush1.msra.mxu1 %v385_v29  ;;  %5860 = vst [vmem:[#allocation31_spill] sm:$0xff] %v3364_v26  ;;  %189 = vmatpush1.msra.mxu0 %v3303_v62  ;;  %v3375_v1 = vsub.f32 %v3218_v2, %v3250_v52  ;;  %v5863_v61 = vand.u32 4294901760, %v3338_v58  ;;  %v3397_v41 = vand.u32 4294901760, %v3366_v56  ;;  %v3417_v24 = vand.u32 4294901760, %v3389_v44 }
  0x40   :  { %5859 = vst [vmem:[#allocation30_spill] sm:$0xff] %v3361_v27  ;;  %v397_v12 = vand.u32 4294901760, %v396_v28  ;;  %v402_v29 = vsub.f32 %v3325_v55, %v5861_v50  ;;  %392 = vmatprep.subr.mxu1 %v391_v37  ;;  %191 = vmatprep.subr.mxu0 %v3317_v19  ;;  %v3383_v28 = vand.u32 4294901760, %v3355_v51  ;;  %v3387_v50 = vsub.f32 %v3229_v13, %v3264_v21 }
  0x41   :  { %5862 = vst [vmem:[#allocation32_spill] sm:$0xff] %v3375_v1  ;;  %v408_v43 = vsub.f32 %v3338_v58, %v5863_v61  ;;  %193 = vmatpush1.msra.mxu0 %v3328_v33  ;;  %v5866_v37 = vand.u32 4294901760, %v3350_v60  ;;  %5867 = vst [vmem:[#allocation35_spill] sm:$0xff] %v3397_v41  ;;  %v5868_v13 = vand.u32 4294901760, %v3361_v27  ;;  %v3408_v21 = vsub.f32 %v3252_v20, %v3283_v7 }
  0x42   :  { %5864 = vst [vmem:[#allocation33_spill] sm:$0xff] %v3383_v28  ;;  %5865 = vst [vmem:[#allocation34_spill] sm:$0xff] %v3387_v50  ;;  %398 = vmatpush1.msra.mxu1 %v397_v12  ;;  %v403_v2 = vand.u32 4294901760, %v402_v29  ;;  %195 = vmatprep.subr.mxu0 %v3341_v46  ;;  %v3423_v29 = vld [vmem:[#allocation5 + $0x1e8] sm:$0xff] }
  0x43   :  { %v414_v52 = vsub.f32 %v3350_v60, %v5866_v37  ;;  %v409_v32 = vand.u32 4294901760, %v408_v43  ;;  %v420_v12 = vsub.f32 %v3361_v27, %v5868_v13  ;;  %5869 = vst [vmem:[#allocation36_spill] sm:$0xff] %v3408_v21  ;;  %v3410_v37 = vld [vmem:[#allocation5 + $0x1f0] sm:$0xff]  ;;  %197 = vmatpush1.msra.mxu0 %v3353_v14  ;;  %v5870_v43 = vand.u32 4294901760, %v3375_v1  ;;  %5871 = vst [vmem:[#allocation37_spill] sm:$0xff] %v3417_v24 }
  0x44   :  { %404 = vmatprep.subr.mxu1 %v403_v2  ;;  %v3421_v13 = vsub.f32 %v3275_v38, %v3303_v62  ;;  %199 = vmatprep.subr.mxu0 %v3364_v26  ;;  %v3442_v62 = vand.u32 4294901760, %v3410_v37 }
  0x45   :  { %v415_v61 = vand.u32 4294901760, %v414_v52  ;;  %v426_v30 = vsub.f32 %v3375_v1, %v5870_v43  ;;  %410 = vmatpush1.msra.mxu1 %v409_v32  ;;  %v421_v20 = vand.u32 4294901760, %v420_v12  ;;  %v5873_v52 = vand.u32 4294901760, %v3387_v50  ;;  %v3433_v1 = vld [vmem:[#allocation5 + $0x1e0] sm:$0xff]  ;;  %201 = vmatpush1.msra.mxu0 %v3383_v28 }
  0x46   :  { %5872 = vst [vmem:[#allocation38_spill] sm:$0xff] %v3421_v13  ;;  %v3431_v43 = vand.u32 4294901760, %v3399_v36  ;;  %v3439_v12 = vsub.f32 %v3285_v47, %v3317_v19  ;;  %5876 = vst [vmem:[#allocation41_spill] sm:$0xff] %v3442_v62  ;;  %203 = vmatprep.subr.mxu0 %v3397_v41  ;;  %v3452_v32 = vsub.f32 %v3296_v49, %v3328_v33  ;;  %v3455_v47 = vand.u32 4294901760, %v3423_v29  ;;  %v3469_v49 = vld [vmem:[#allocation5 + $0x1d0] sm:$0xff] }
  0x47   :  { %v432_v2 = vsub.f32 %v3387_v50, %v5873_v52  ;;  %416 = vmatprep.subr.mxu1 %v415_v61  ;;  %v427_v38 = vand.u32 4294901760, %v426_v30  ;;  %v3444_v52 = vld [vmem:[#allocation5 + $0x1d8] sm:$0xff]  ;;  %v5877_v61 = vand.u32 4294901760, %v3408_v21  ;;  %205 = vmatpush1.msra.mxu0 %v3417_v24  ;;  %v5880_v19 = vand.u32 4294901760, %v3421_v13 }
  0x48   :  { %5874 = vst [vmem:[#allocation39_spill] sm:$0xff] %v3431_v43  ;;  %5875 = vst [vmem:[#allocation40_spill] sm:$0xff] %v3439_v12  ;;  %422 = vmatpush1.msra.mxu1 %v421_v20  ;;  %v3464_v50 = vsub.f32 %v3309_v39, %v3341_v46  ;;  %207 = vmatprep.subr.mxu0 %v3431_v43  ;;  %v3480_v39 = vld [vmem:[#allocation5 + $0x1c8] sm:$0xff] }
  0x49   :  { %v433_v7 = vand.u32 4294901760, %v432_v2  ;;  %v438_v30 = vsub.f32 %v3408_v21, %v5877_v61  ;;  %5878 = vst [vmem:[#allocation42_spill] sm:$0xff] %v3452_v32  ;;  %5879 = vst [vmem:[#allocation43_spill] sm:$0xff] %v3455_v47  ;;  %428 = vmatprep.subr.mxu1 %v427_v38  ;;  %v444_v20 = vsub.f32 %v3421_v13, %v5880_v19  ;;  %v3467_v61 = vand.u32 4294901760, %v3433_v1 }
  0x4a   :  { %5881 = vst [vmem:[#allocation44_spill] sm:$0xff] %v3464_v50  ;;  %v5429_v38 = vand.u32 4294901760, %v3452_v32  ;;  %v3475_v19 = vsub.f32 %v3319_v34, %v3353_v14  ;;  %v3478_v2 = vand.u32 4294901760, %v3444_v52  ;;  %v5885_v13 = vand.u32 4294901760, %v3439_v12  ;;  %209 = vmatpush2.msra.mxu0 %v3442_v62 }
  0x4b   :  { %5882 = vst [vmem:[#allocation45_spill] sm:$0xff] %v3467_v61  ;;  %434 = vmatpush1.msra.mxu1 %v433_v7  ;;  %v439_v33 = vand.u32 4294901760, %v438_v30  ;;  %v445_v46 = vand.u32 4294901760, %v444_v20  ;;  %v3489_v30 = vsub.f32 %v3330_v53, %v3364_v26  ;;  %211 = vmatprep.subr.mxu0 %v3455_v47  ;;  %v3497_v14 = vand.u32 4294901760, %v3469_v49  ;;  %v3503_v7 = vld [vmem:[#allocation5 + $0x1c0] sm:$0xff] }
  0x4c   :  { %5883 = vst [vmem:[#allocation46_spill] sm:$0xff] %v3475_v19  ;;  %5884 = vst [vmem:[#allocation47_spill] sm:$0xff] %v3478_v2  ;;  %v450_v21 = vsub.f32 %v3439_v12, %v5885_v13  ;;  %v456_v34 = vsub.f32 %v3452_v32, %v5429_v38  ;;  %v3501_v13 = vsub.f32 %v3355_v51, %v3383_v28  ;;  %213 = vmatpush2.msra.mxu0 %v3467_v61  ;;  %v3513_v32 = vld [vmem:[#allocation5 + $0x1b8] sm:$0xff] }
  0x4d   :  { %5886 = vst [vmem:[#allocation48_spill] sm:$0xff] %v3489_v30  ;;  %440 = vmatprep.subr.mxu1 %v439_v33  ;;  %5887 = vst [vmem:[#allocation49_spill] sm:$0xff] %v3497_v14  ;;  %v5889_v33 = vand.u32 4294901760, %v3464_v50  ;;  %v3511_v20 = vand.u32 4294901760, %v3480_v39  ;;  %v5891_v51 = vand.u32 4294901760, %v3475_v19  ;;  %215 = vmatprep.subr.mxu0 %v3478_v2 }
  0x4e   :  { %5888 = vst [vmem:[#allocation50_spill] sm:$0xff] %v3501_v13  ;;  %446 = vmatpush1.msra.mxu1 %v445_v46  ;;  %v451_v53 = vand.u32 4294901760, %v450_v21  ;;  %v457_v12 = vand.u32 4294901760, %v456_v34  ;;  %v3522_v46 = vsub.f32 %v3366_v56, %v3397_v41  ;;  %217 = vmatpush2.msra.mxu0 %v3497_v14  ;;  %v3535_v21 = vsub.f32 %v3389_v44, %v3417_v24  ;;  %v3558_v24 = vld [vmem:[#allocation5 + $0x198] sm:$0xff] }
  0x4f   :  { %v462_v26 = vsub.f32 %v3464_v50, %v5889_v33  ;;  %5890 = vst [vmem:[#allocation51_spill] sm:$0xff] %v3511_v20  ;;  %v468_v28 = vsub.f32 %v3475_v19, %v5891_v51  ;;  %v3524_v33 = vld [vmem:[#allocation5 + $0x1b0] sm:$0xff]  ;;  %v5893_v50 = vand.u32 4294901760, %v3489_v30  ;;  %v3531_v51 = vand.u32 4294901760, %v3503_v7  ;;  %v3537_v19 = vld [vmem:[#allocation5 + $0x1a8] sm:$0xff]  ;;  %219 = vmatprep.subr.mxu0 %v3511_v20 }
  0x50   :  { %5892 = vst [vmem:[#allocation52_spill] sm:$0xff] %v3522_v46  ;;  %452 = vmatprep.subr.mxu1 %v451_v53  ;;  %5895 = vst [vmem:[#allocation54_spill] sm:$0xff] %v3535_v21  ;;  %v5896_v53 = vand.u32 4294901760, %v3501_v13  ;;  %v3545_v41 = vand.u32 4294901760, %v3513_v32 }
  0x51   :  { %v463_v38 = vand.u32 4294901760, %v462_v26  ;;  %v474_v34 = vsub.f32 %v3489_v30, %v5893_v50  ;;  %5894 = vst [vmem:[#allocation53_spill] sm:$0xff] %v3531_v51  ;;  %458 = vmatpush1.msra.mxu1 %v457_v12  ;;  %v469_v56 = vand.u32 4294901760, %v468_v28  ;;  %v3547_v30 = vld [vmem:[#allocation5 + $0x1a0] sm:$0xff]  ;;  %221 = vmatpush2.msra.mxu0 %v3531_v51  ;;  %v5452_v12 = vand.u32 4294901760, %v3535_v21 }
  0x52   :  { %v480_v26 = vsub.f32 %v3501_v13, %v5896_v53  ;;  %5897 = vst [vmem:[#allocation55_spill] sm:$0xff] %v3545_v41  ;;  %v3553_v28 = vsub.f32 %v3399_v36, %v3431_v43  ;;  %v3556_v53 = vand.u32 4294901760, %v3524_v33  ;;  %v5900_v13 = vand.u32 4294901760, %v3522_v46  ;;  %223 = vmatprep.subr.mxu0 %v3545_v41 }
  0x53   :  { %464 = vmatprep.subr.mxu1 %v463_v38  ;;  %v475_v44 = vand.u32 4294901760, %v474_v34  ;;  %v3566_v34 = vsub.f32 %v3410_v37, %v3442_v62  ;;  %v3569_v36 = vand.u32 4294901760, %v3537_v19  ;;  %v492_v43 = vsub.f32 %v3535_v21, %v5452_v12  ;;  %v3583_v37 = vld [vmem:[#allocation5 + $0x190] sm:$0xff] }
  0x54   :  { %5898 = vst [vmem:[#allocation56_spill] sm:$0xff] %v3553_v28  ;;  %5899 = vst [vmem:[#allocation57_spill] sm:$0xff] %v3556_v53  ;;  %470 = vmatpush1.msra.mxu1 %v469_v56  ;;  %v481_v50 = vand.u32 4294901760, %v480_v26  ;;  %v486_v38 = vsub.f32 %v3522_v46, %v5900_v13  ;;  %225 = vmatpush2.msra.mxu0 %v3556_v53  ;;  %v3578_v13 = vsub.f32 %v3423_v29, %v3455_v47  ;;  %v3594_v29 = vld [vmem:[#allocation5 + $0x188] sm:$0xff] }
  0x55   :  { %5901 = vst [vmem:[#allocation58_spill] sm:$0xff] %v3566_v34  ;;  %5902 = vst [vmem:[#allocation59_spill] sm:$0xff] %v3569_v36  ;;  %476 = vmatprep.subr.mxu1 %v475_v44  ;;  %v3581_v26 = vand.u32 4294901760, %v3547_v30  ;;  %v5463_v44 = vand.u32 4294901760, %v3566_v34  ;;  %227 = vmatprep.subr.mxu0 %v3569_v36  ;;  %v3589_v12 = vsub.f32 %v3433_v1, %v3467_v61  ;;  %v3592_v56 = vand.u32 4294901760, %v3558_v24 }
  0x56   :  { %5903 = vst [vmem:[#allocation60_spill] sm:$0xff] %v3578_v13  ;;  %482 = vmatpush1.msra.mxu1 %v481_v50  ;;  %v487_v62 = vand.u32 4294901760, %v486_v38  ;;  %v493_v47 = vand.u32 4294901760, %v492_v43  ;;  %v5907_v21 = vand.u32 4294901760, %v3553_v28  ;;  %v3603_v38 = vsub.f32 %v3444_v52, %v3478_v2  ;;  %v3617_v50 = vld [vmem:[#allocation5 + $0x180] sm:$0xff] }
  0x57   :  { %5904 = vst [vmem:[#allocation61_spill] sm:$0xff] %v3581_v26  ;;  %5905 = vst [vmem:[#allocation62_spill] sm:$0xff] %v3589_v12  ;;  %229 = vmatpush2.msra.mxu0 %v3581_v26  ;;  %v504_v1 = vsub.f32 %v3566_v34, %v5463_v44  ;;  %v3611_v43 = vand.u32 4294901760, %v3583_v37  ;;  %v3624_v61 = vand.u32 4294901760, %v3594_v29  ;;  %v3626_v34 = vld [vmem:[#allocation5 + $0x178] sm:$0xff]  ;;  %v5913_v27 = vand.u32 4294901760, %v3589_v12 }
  0x58   :  { %5906 = vst [vmem:[#allocation63_spill] sm:$0xff] %v3592_v56  ;;  %v498_v46 = vsub.f32 %v3553_v28, %v5907_v21  ;;  %5908 = vst [vmem:[#allocation64_spill] sm:$0xff] %v3603_v38  ;;  %488 = vmatprep.subr.mxu1 %v487_v62  ;;  %231 = vmatprep.subr.mxu0 %v3592_v56  ;;  %v3615_v21 = vsub.f32 %v3469_v49, %v3497_v14  ;;  %v5911_v62 = vand.u32 4294901760, %v3578_v13 }
  0x59   :  { %5909 = vst [vmem:[#allocation65_spill] sm:$0xff] %v3611_v43  ;;  %494 = vmatpush1.msra.mxu1 %v493_v47  ;;  %5912 = vst [vmem:[#allocation67_spill] sm:$0xff] %v3624_v61  ;;  %v505_v28 = vand.u32 4294901760, %v504_v1  ;;  %v516_v49 = vsub.f32 %v3589_v12, %v5913_v27  ;;  %233 = vmatpush2.msra.mxu0 %v3611_v43  ;;  %v5915_v14 = vand.u32 4294901760, %v3603_v38  ;;  %v3644_v27 = vand.u32 4294901760, %v3617_v50  ;;  %v3650_v12 = vld [vmem:[#allocation5 + $0x168] sm:$0xff] }
  0x5a   :  { %5910 = vst [vmem:[#allocation66_spill] sm:$0xff] %v3615_v21  ;;  %v499_v52 = vand.u32 4294901760, %v498_v46  ;;  %v510_v2 = vsub.f32 %v3578_v13, %v5911_v62  ;;  %v3635_v46 = vsub.f32 %v3480_v39, %v3511_v20  ;;  %v3637_v62 = vld [vmem:[#allocation5 + $0x170] sm:$0xff]  ;;  %235 = vmatprep.subr.mxu0 %v3624_v61  ;;  %v3648_v47 = vsub.f32 %v3503_v7, %v3531_v51 }
  0x5b   :  { %v522_v1 = vsub.f32 %v3603_v38, %v5915_v14  ;;  %5916 = vst [vmem:[#allocation69_spill] sm:$0xff] %v3644_v27  ;;  %v517_v39 = vand.u32 4294901760, %v516_v49  ;;  %v3657_v14 = vand.u32 4294901760, %v3626_v34  ;;  %v3659_v38 = vld [vmem:[#allocation5 + $0x160] sm:$0xff]  ;;  %237 = vmatpush2.msra.mxu0 %v3644_v27  ;;  %v3668_v49 = vand.u32 4294901760, %v3637_v62 }
  0x5c   :  { %5914 = vst [vmem:[#allocation68_spill] sm:$0xff] %v3635_v46  ;;  %500 = vmatprep.subr.mxu1 %v499_v52  ;;  %v511_v44 = vand.u32 4294901760, %v510_v2  ;;  %5917 = vst [vmem:[#allocation70_spill] sm:$0xff] %v3648_v47  ;;  %v5918_v52 = vand.u32 4294901760, %v3615_v21  ;;  %v5486_v7 = vand.u32 4294901760, %v3648_v47  ;;  %v5922_v51 = vand.u32 4294901760, %v3635_v46 }
  0x5d   :  { %506 = vmatpush2.msra.mxu1 %v505_v28  ;;  %5919 = vst [vmem:[#allocation71_spill] sm:$0xff] %v3657_v14  ;;  %v523_v13 = vand.u32 4294901760, %v522_v1  ;;  %v3665_v28 = vsub.f32 %v3513_v32, %v3545_v41  ;;  %5921 = vst [vmem:[#allocation73_spill] sm:$0xff] %v3668_v49  ;;  %239 = vmatprep.subr.mxu0 %v3657_v14  ;;  %v3678_v1 = vsub.f32 %v3524_v33, %v3556_v53  ;;  %v3695_v33 = vld [vmem:[#allocation5 + $0x150] sm:$0xff] }
  0x5e   :  { %v528_v2 = vsub.f32 %v3615_v21, %v5918_v52  ;;  %512 = vmatprep.subr.mxu1 %v511_v44  ;;  %v3670_v52 = vld [vmem:[#allocation5 + $0x158] sm:$0xff]  ;;  %v534_v44 = vsub.f32 %v3635_v46, %v5922_v51  ;;  %v3681_v32 = vand.u32 4294901760, %v3650_v12  ;;  %v540_v41 = vsub.f32 %v3648_v47, %v5486_v7  ;;  %241 = vmatpush2.msra.mxu0 %v3668_v49 }
  0x5f   :  { %5920 = vst [vmem:[#allocation72_spill] sm:$0xff] %v3665_v28  ;;  %518 = vmatpush2.msra.mxu1 %v517_v39  ;;  %5923 = vst [vmem:[#allocation74_spill] sm:$0xff] %v3678_v1  ;;  %v3690_v51 = vsub.f32 %v3537_v19, %v3569_v36  ;;  %v3701_v7 = vsub.f32 %v3547_v30, %v3581_v26  ;;  %v3704_v39 = vand.u32 4294901760, %v3670_v52  ;;  %v3706_v19 = vld [vmem:[#allocation5 + $0x148] sm:$0xff]  ;;  %v5929_v47 = vand.u32 4294901760, %v3665_v28 }
  0x60   :  { %v529_v20 = vand.u32 4294901760, %v528_v2  ;;  %5924 = vst [vmem:[#allocation75_spill] sm:$0xff] %v3681_v32  ;;  %524 = vmatprep.subr.mxu1 %v523_v13  ;;  %v3693_v2 = vand.u32 4294901760, %v3659_v38  ;;  %v535_v53 = vand.u32 4294901760, %v534_v44  ;;  %v5497_v13 = vand.u32 4294901760, %v3678_v1  ;;  %243 = vmatprep.subr.mxu0 %v3681_v32 }
  0x61   :  { %5925 = vst [vmem:[#allocation76_spill] sm:$0xff] %v3690_v51  ;;  %5927 = vst [vmem:[#allocation78_spill] sm:$0xff] %v3701_v7  ;;  %v541_v36 = vand.u32 4294901760, %v540_v41  ;;  %v546_v46 = vsub.f32 %v3665_v28, %v5929_v47  ;;  %v3715_v44 = vsub.f32 %v3558_v24, %v3592_v56  ;;  %v3723_v41 = vand.u32 4294901760, %v3695_v33 }
  0x62   :  { %5926 = vst [vmem:[#allocation77_spill] sm:$0xff] %v3693_v2  ;;  %530 = vmatpush2.msra.mxu1 %v529_v20  ;;  %5928 = vst [vmem:[#allocation79_spill] sm:$0xff] %v3704_v39  ;;  %245 = vmatpush2.msra.mxu0 %v3693_v2  ;;  %v552_v30 = vsub.f32 %v3678_v1, %v5497_v13  ;;  %v3727_v47 = vsub.f32 %v3583_v37, %v3611_v43  ;;  %v3729_v20 = vld [vmem:[#allocation5 + $0x140] sm:$0xff]  ;;  %v3736_v26 = vand.u32 4294901760, %v3706_v19  ;;  %v3738_v1 = vld [vmem:[#allocation5 + $0x138] sm:$0xff] }
  0x63   :  { %5930 = vst [vmem:[#allocation80_spill] sm:$0xff] %v3715_v44  ;;  %536 = vmatprep.subr.mxu1 %v535_v53  ;;  %247 = vmatprep.subr.mxu0 %v3704_v39  ;;  %5931 = vst [vmem:[#allocation81_spill] sm:$0xff] %v3723_v41  ;;  %v547_v24 = vand.u32 4294901760, %v546_v46  ;;  %v5933_v53 = vand.u32 4294901760, %v3690_v51  ;;  %v5935_v21 = vand.u32 4294901760, %v3701_v7  ;;  %v3747_v46 = vsub.f32 %v3594_v29, %v3624_v61 }
  0x64   :  { %5932 = vst [vmem:[#allocation82_spill] sm:$0xff] %v3727_v47  ;;  %542 = vmatpush2.msra.mxu1 %v541_v36  ;;  %5934 = vst [vmem:[#allocation83_spill] sm:$0xff] %v3736_v26  ;;  %v553_v28 = vand.u32 4294901760, %v552_v30  ;;  %249 = vmatpush2.msra.mxu0 %v3723_v41  ;;  %v5937_v43 = vand.u32 4294901760, %v3715_v44  ;;  %v3760_v36 = vsub.f32 %v3617_v50, %v3644_v27 }
  0x65   :  { %v558_v56 = vsub.f32 %v3690_v51, %v5933_v53  ;;  %v564_v37 = vsub.f32 %v3701_v7, %v5935_v21  ;;  %5936 = vst [vmem:[#allocation84_spill] sm:$0xff] %v3747_v46  ;;  %v3749_v53 = vld [vmem:[#allocation5 + $0x130] sm:$0xff]  ;;  %548 = vmatprep.subr.mxu1 %v547_v24  ;;  %251 = vmatprep.subr.mxu0 %v3736_v26  ;;  %v3756_v21 = vand.u32 4294901760, %v3729_v20  ;;  %v3762_v7 = vld [vmem:[#allocation5 + $0x128] sm:$0xff]  ;;  %v5940_v24 = vand.u32 4294901760, %v3727_v47 }
  0x66   :  { %v570_v30 = vsub.f32 %v3715_v44, %v5937_v43  ;;  %5939 = vst [vmem:[#allocation86_spill] sm:$0xff] %v3760_v36  ;;  %554 = vmatpush2.msra.mxu1 %v553_v28  ;;  %v3769_v43 = vand.u32 4294901760, %v3738_v1  ;;  %v3771_v44 = vld [vmem:[#allocation5 + $0x120] sm:$0xff]  ;;  %v5520_v50 = vand.u32 4294901760, %v3760_v36  ;;  %v3777_v28 = vsub.f32 %v3626_v34, %v3657_v14 }
  0x67   :  { %v559_v13 = vand.u32 4294901760, %v558_v56  ;;  %5938 = vst [vmem:[#allocation85_spill] sm:$0xff] %v3756_v21  ;;  %v565_v29 = vand.u32 4294901760, %v564_v37  ;;  %v576_v56 = vsub.f32 %v3727_v47, %v5940_v24  ;;  %253 = vmatpush2.msra.mxu0 %v3756_v21  ;;  %v3780_v37 = vand.u32 4294901760, %v3749_v53  ;;  %v3782_v24 = vld [vmem:[#allocation5 + $0x118] sm:$0xff] }
  0x68   :  { %5941 = vst [vmem:[#allocation87_spill] sm:$0xff] %v3769_v43  ;;  %v571_v51 = vand.u32 4294901760, %v570_v30  ;;  %5942 = vst [vmem:[#allocation88_spill] sm:$0xff] %v3777_v28  ;;  %v5943_v27 = vand.u32 4294901760, %v3747_v46  ;;  %255 = vmatprep.subr.mxu0 %v3769_v43  ;;  %v3790_v30 = vsub.f32 %v3637_v62, %v3668_v49  ;;  %v3793_v34 = vand.u32 4294901760, %v3762_v7  ;;  %v3807_v62 = vld [vmem:[#allocation5 + $0x110] sm:$0xff] }
  0x69   :  { %560 = vmatprep.subr.mxu1 %v559_v13  ;;  %v577_v61 = vand.u32 4294901760, %v576_v56  ;;  %v588_v14 = vsub.f32 %v3760_v36, %v5520_v50  ;;  %257 = vmatpush2.msra.mxu0 %v3780_v37  ;;  %v3805_v56 = vand.u32 4294901760, %v3771_v44  ;;  %v3813_v50 = vsub.f32 %v3659_v38, %v3693_v2 }
  0x6a   :  { %566 = vmatpush2.msra.mxu1 %v565_v29  ;;  %v582_v13 = vsub.f32 %v3747_v46, %v5943_v27  ;;  %5944 = vst [vmem:[#allocation89_spill] sm:$0xff] %v3790_v30  ;;  %5945 = vst [vmem:[#allocation90_spill] sm:$0xff] %v3793_v34  ;;  %v3802_v27 = vsub.f32 %v3650_v12, %v3681_v32  ;;  %259 = vmatprep.subr.mxu0 %v3793_v34  ;;  %v3816_v29 = vand.u32 4294901760, %v3782_v24  ;;  %v3818_v12 = vld [vmem:[#allocation5 + $0x108] sm:$0xff] }
  0x6b   :  { %572 = vmatprep.subr.mxu1 %v571_v51  ;;  %5947 = vst [vmem:[#allocation92_spill] sm:$0xff] %v3805_v56  ;;  %v5531_v51 = vand.u32 4294901760, %v3790_v30  ;;  %5948 = vst [vmem:[#allocation93_spill] sm:$0xff] %v3813_v50  ;;  %v589_v32 = vand.u32 4294901760, %v588_v14  ;;  %v5950_v36 = vand.u32 4294901760, %v3777_v28  ;;  %261 = vmatpush2.msra.mxu0 %v3805_v56  ;;  %v3835_v14 = vand.u32 4294901760, %v3807_v62 }
  0x6c   :  { %5946 = vst [vmem:[#allocation91_spill] sm:$0xff] %v3802_v27  ;;  %578 = vmatpush2.msra.mxu1 %v577_v61  ;;  %v583_v49 = vand.u32 4294901760, %v582_v13  ;;  %5949 = vst [vmem:[#allocation94_spill] sm:$0xff] %v3816_v29  ;;  %v3827_v13 = vsub.f32 %v3670_v52, %v3704_v39  ;;  %263 = vmatprep.subr.mxu0 %v3816_v29  ;;  %v3841_v61 = vld [vmem:[#allocation5 + $0x100] sm:$0xff]  ;;  %v3848_v2 = vand.u32 4294901760, %v3818_v12  ;;  %v5954_v47 = vand.u32 4294901760, %v3813_v50 }
  0x6d   :  { %v594_v46 = vsub.f32 %v3777_v28, %v5950_v36  ;;  %v600_v38 = vsub.f32 %v3790_v30, %v5531_v51  ;;  %v3839_v36 = vsub.f32 %v3695_v33, %v3723_v41  ;;  %v63_v30 = vld [vmem:[#allocation2 + $0x8] sm:$0xff]  ;;  %265 = vmatpush2.msra.mxu0 %v3835_v14 }
  0x6e   :  { %5951 = vst [vmem:[#allocation95_spill] sm:$0xff] %v3827_v13  ;;  %584 = vmatprep.subr.mxu1 %v583_v49  ;;  %v5953_v49 = vand.u32 4294901760, %v3802_v27  ;;  %v612_v33 = vsub.f32 %v3813_v50, %v5954_v47  ;;  %v5955_v41 = vand.u32 4294901760, %v3827_v13  ;;  %267 = vmatprep.subr.mxu0 %v3848_v2  ;;  %v3868_v47 = vsub.f32 %v3729_v20, %v3756_v21 }
  0x6f   :  { %5952 = vst [vmem:[#allocation96_spill] sm:$0xff] %v3839_v36  ;;  %590 = vmatpush2.msra.mxu1 %v589_v32  ;;  %v595_v52 = vand.u32 4294901760, %v594_v46  ;;  %v601_v28 = vand.u32 4294901760, %v600_v38  ;;  %v3857_v46 = vsub.f32 %v3706_v19, %v3736_v26  ;;  %v3864_v38 = vand.u32 4294901760, %v3841_v61 }
  0x70   :  { %v606_v39 = vsub.f32 %v3802_v27, %v5953_v49  ;;  %v62_v49 = vld [vmem:[#allocation2] sm:$0xff]  ;;  %v618_v27 = vsub.f32 %v3827_v13, %v5955_v41  ;;  %5956 = vst [vmem:[#allocation97_spill] sm:$0xff] %v3868_v47  ;;  %v613_v32 = vand.u32 4294901760, %v612_v33  ;;  %v5957_v19 = vand.u32 4294901760, %v3839_v36 }
  0x71   :  { %596 = vmatprep.subr.mxu1 %v595_v52  ;;  %v3874_v26 = vand.u32 4294901760, %v63_v30  ;;  %269 = vmatpush2.msra.mxu0 %v3864_v38  ;;  %v5548_v13 = vand.u32 4294901760, %v3868_v47  ;;  %v3880_v20 = vsub.f32 %v3738_v1, %v3769_v43 }
  0x72   :  { %v607_v51 = vand.u32 4294901760, %v606_v39  ;;  %602 = vmatpush2.msra.mxu1 %v601_v28  ;;  %v624_v52 = vsub.f32 %v3839_v36, %v5957_v19  ;;  %v5549_v39 = vand.u32 4294901760, %v3857_v46  ;;  %v619_v41 = vand.u32 4294901760, %v618_v27  ;;  %706 = vmatprep.subr.mxu0 %v3106_v18 }
  0x73   :  { %5958 = vst [vmem:[#allocation98_spill] sm:$0xff] %v3874_v26  ;;  %v3882_v28 = vand.u32 4294901760, %v62_v49  ;;  %v3888_v21 = vsub.f32 %v63_v30, %v3874_v26  ;;  %v3893_v27 = vsub.f32 %v3749_v53, %v3780_v37  ;;  %v636_v1 = vsub.f32 %v3868_v47, %v5548_v13  ;;  %688 = vmatprep.mubr.f32.mxu1 %v3874_v26 }
  0x74   :  { %608 = vmatprep.subr.mxu1 %v607_v51  ;;  %v625_v33 = vand.u32 4294901760, %v624_v52  ;;  %v630_v19 = vsub.f32 %v3857_v46, %v5549_v39  ;;  %v5552_v51 = vand.u32 4294901760, %v3880_v20  ;;  %v3904_v30 = vsub.f32 %v3762_v7, %v3793_v34 }
  0x75   :  { %5959 = vst [vmem:[#allocation99_spill] sm:$0xff] %v3882_v28  ;;  %614 = vmatpush2.msra.mxu1 %v613_v32  ;;  %5960 = vst [vmem:[#allocation100_spill] sm:$0xff] %v3893_v27  ;;  %v3900_v32 = vsub.f32 %v62_v49, %v3882_v28  ;;  %v5553_v53 = vand.u32 4294901760, %v3888_v21  ;;  %v3911_v13 = vsub.f32 %v3771_v44, %v3805_v56  ;;  %v637_v39 = vand.u32 4294901760, %v636_v1 }
  0x76   :  { %620 = vmatprep.subr.mxu1 %v619_v41  ;;  %v631_v52 = vand.u32 4294901760, %v630_v19  ;;  %v5556_v41 = vand.u32 4294901760, %v3893_v27  ;;  %v642_v49 = vsub.f32 %v3880_v20, %v5552_v51  ;;  %v5562_v34 = vand.u32 4294901760, %v3904_v30 }
  0x77   :  { %626 = vmatpush2.msra.mxu1 %v625_v33  ;;  %v5561_v7 = vand.u32 4294901760, %v3900_v32  ;;  %v273_v33 = vsub.f32 %v3888_v21, %v5553_v53  ;;  %v3927_v1 = vsub.f32 %v3782_v24, %v3816_v29  ;;  %v3937_v26 = vsub.f32 %v3807_v62, %v3835_v14 }
  0x78   :  { %632 = vmatprep.subr.mxu1 %v631_v52  ;;  %v648_v19 = vsub.f32 %v3893_v27, %v5556_v41  ;;  %v643_v51 = vand.u32 4294901760, %v642_v49  ;;  %v654_v53 = vsub.f32 %v3904_v30, %v5562_v34  ;;  %v5961_v56 = vand.u32 4294901760, %v3911_v13 }
  0x79   :  { %638 = vmatpush2.msra.mxu1 %v637_v39  ;;  %v279_v52 = vsub.f32 %v3900_v32, %v5561_v7  ;;  %v274_v41 = vand.u32 4294901760, %v273_v33  ;;  %v5566_v39 = vand.u32 4294901760, %v3927_v1  ;;  %v5565_v7 = vand.u32 4294901760, %v3937_v26 }
  0x7a   :  { %v649_v44 = vand.u32 4294901760, %v648_v19  ;;  %v660_v24 = vsub.f32 %v3911_v13, %v5961_v56  ;;  %644 = vmatprep.subr.mxu1 %v643_v51  ;;  %v655_v29 = vand.u32 4294901760, %v654_v53  ;;  %v3946_v34 = vsub.f32 %v3818_v12, %v3848_v2 }
  0x7b   :  { %v280_v49 = vand.u32 4294901760, %v279_v52  ;;  %275 = vmatprep.mubr.f32.mxu0 %v274_v41  ;;  %v666_v33 = vsub.f32 %v3927_v1, %v5566_v39  ;;  %v3953_v56 = vsub.f32 %v3841_v61, %v3864_v38  ;;  %v672_v51 = vsub.f32 %v3937_v26, %v5565_v7  ;;  %v5976_v7 = vld [vmem:[#allocation42_spill] sm:$0xff]  ;;  %v5977_v39 = vld [vmem:[#allocation19_spill] sm:$0xff] }
  0x7c   :  { %650 = vmatpush2.msra.mxu1 %v649_v44  ;;  %v661_v62 = vand.u32 4294901760, %v660_v24  ;;  %v5564_v12 = vand.u32 4294901760, %v3946_v34  ;;  %v5963_v24 = vld [vmem:[#allocation12_spill] sm:$0xff] }
  0x7d   :  { %5962 = vst [vmem:[#allocation101_spill] sm:$0xff] %v3953_v56  ;;  %281 = vmatmul.mubr.f32.vlgmr.msra.gmra.mxu0 %v280_v49  ;;  %656 = vmatprep.subr.mxu1 %v655_v29  ;;  %v667_v53 = vand.u32 4294901760, %v666_v33  ;;  %v5563_v41 = vand.u32 4294901760, %v3953_v56  ;;  %v673_v19 = vand.u32 4294901760, %v672_v51  ;;  %v5964_v49 = vld [vmem:[#allocation30_spill] sm:$0xff]  ;;  %v5966_v33 = vld [vmem:[#allocation32_spill] sm:$0xff] }
  0x7e   :  { %709 = vmatpush1.msra.mxu0 %v3119_v23  ;;  %662 = vmatpush2.msra.mxu1 %v661_v62  ;;  %v678_v61 = vsub.f32 %v3946_v34, %v5564_v12  ;;  %v5965_v62 = vld [vmem:[#allocation13_spill] sm:$0xff]  ;;  %v5967_v51 = vld [vmem:[#allocation14_spill] sm:$0xff] }
  0x7f   :  { %712 = vmatprep.subr.mxu0 %v3125_v25  ;;  %668 = vmatprep.subr.mxu1 %v667_v53  ;;  %v684_v29 = vsub.f32 %v3953_v56, %v5563_v41  ;;  %v5968_v53 = vld [vmem:[#allocation34_spill] sm:$0xff]  ;;  %v5974_v41 = vld [vmem:[#allocation40_spill] sm:$0xff] }
  0x80   :  { %715 = vmatpush1.msra.mxu0 %v3139_v31  ;;  %674 = vmatpush2.msra.mxu1 %v673_v19  ;;  %v679_v44 = vand.u32 4294901760, %v678_v61  ;;  %v5969_v19 = vld [vmem:[#allocation15_spill] sm:$0xff]  ;;  %v5970_v61 = vld [vmem:[#allocation36_spill] sm:$0xff]  ;;  %v5975_v12 = vld [vmem:[#allocation18_spill] sm:$0xff] }
  0x81   :  { %718 = vmatprep.subr.mxu0 %v3148_v35  ;;  %v685_v52 = vand.u32 4294901760, %v684_v29  ;;  %v5971_v29 = vld [vmem:[#allocation16_spill] sm:$0xff] }
  0x82   :  { %721 = vmatpush1.msra.mxu0 %v3161_v40  ;;  %680 = vmatprep.subr.mxu1 %v679_v44  ;;  %v5972_v44 = vld [vmem:[#allocation38_spill] sm:$0xff] }
  0x83   :  { %724 = vmatprep.subr.mxu0 %v3175_v45  ;;  %686 = vmatpush2.msra.mxu1 %v685_v52  ;;  %v5973_v52 = vld [vmem:[#allocation17_spill] sm:$0xff] }
  0x84   :  { %727 = vmatpush1.msra.mxu0 %v3201_v59  ;;  %690 = vmatmul.mubr.f32.vlgmr.msra.gmra.mxu1 %v3882_v28  ;;  %v5978_v28 = vld [vmem:[#allocation44_spill] sm:$0xff] }
  0x85   :  { %730 = vmatprep.subr.mxu0 %v3213_v0  ;;  %918 = vmatprep.subr.mxu1 %v3086_v3 }
  0x86   :  { %733 = vmatpush1.msra.mxu0 %v3224_v8  ;;  %920 = vmatpush1.msra.mxu1 %v3088_v4 }
  0x87   :  { %736 = vmatprep.subr.mxu0 %v3235_v42  ;;  %922 = vmatprep.subr.mxu1 %v3090_v5 }
  0x88   :  { %739 = vmatpush1.msra.mxu0 %v3247_v48  ;;  %924 = vmatpush1.msra.mxu1 %v3092_v9 }
  0x89   :  { %742 = vmatprep.subr.mxu0 %v3261_v57  ;;  %926 = vmatprep.subr.mxu1 %v3094_v10 }
  0x8a   :  { %745 = vmatpush1.msra.mxu0 %v3273_v6  ;;  %928 = vmatpush1.msra.mxu1 %v3096_v11 }
  0x8b   :  { %748 = vmatprep.subr.mxu0 %v3294_v54  ;;  %930 = vmatprep.subr.mxu1 %v3099_v15 }
  0x8c   :  { %751 = vmatpush1.msra.mxu0 %v3307_v63  ;;  %932 = vmatpush1.msra.mxu1 %v3101_v16 }
  0x8d   :  { %754 = vmatprep.subr.mxu0 %v3325_v55  ;;  %934 = vmatprep.subr.mxu1 %v3103_v17 }
  0x8e   :  { %757 = vmatpush1.msra.mxu0 %v3338_v58  ;;  %936 = vmatpush1.msra.mxu1 %v3116_v22 }
  0x8f   :  { %760 = vmatprep.subr.mxu0 %v3350_v60  ;;  %938 = vmatprep.subr.mxu1 %v5963_v24 }
  0x90   :  { %763 = vmatpush1.msra.mxu0 %v5964_v49  ;;  %940 = vmatpush1.msra.mxu1 %v5965_v62  ;;  %v6025_v49 = vld [vmem:[#allocation57_spill] sm:$0xff] }
  0x91   :  { %766 = vmatprep.subr.mxu0 %v5966_v33  ;;  %942 = vmatprep.subr.mxu1 %v5967_v51  ;;  %v6003_v51 = vld [vmem:[#allocation35_spill] sm:$0xff] }
  0x92   :  { %769 = vmatpush1.msra.mxu0 %v5968_v53  ;;  %944 = vmatpush1.msra.mxu1 %v5969_v19  ;;  %v5979_v53 = vld [vmem:[#allocation20_spill] sm:$0xff]  ;;  %v5980_v19 = vld [vmem:[#allocation46_spill] sm:$0xff]  ;;  %v6011_v33 = vld [vmem:[#allocation43_spill] sm:$0xff] }
  0x93   :  { %772 = vmatprep.subr.mxu0 %v5970_v61  ;;  %946 = vmatprep.subr.mxu1 %v5971_v29  ;;  %v5981_v61 = vld [vmem:[#allocation21_spill] sm:$0xff]  ;;  %v5982_v29 = vld [vmem:[#allocation48_spill] sm:$0xff] }
  0x94   :  { %775 = vmatpush1.msra.mxu0 %v5972_v44  ;;  %948 = vmatpush1.msra.mxu1 %v5973_v52  ;;  %v5983_v44 = vld [vmem:[#allocation22_spill] sm:$0xff] }
  0x95   :  { %778 = vmatprep.subr.mxu0 %v5974_v41  ;;  %950 = vmatprep.subr.mxu1 %v5975_v12  ;;  %v5984_v52 = vld [vmem:[#allocation50_spill] sm:$0xff]  ;;  %v5985_v41 = vld [vmem:[#allocation23_spill] sm:$0xff]  ;;  %v5986_v12 = vld [vmem:[#allocation52_spill] sm:$0xff] }
  0x96   :  { %781 = vmatpush1.msra.mxu0 %v5976_v7  ;;  %952 = vmatpush1.msra.mxu1 %v5977_v39  ;;  %v5987_v7 = vld [vmem:[#allocation24_spill] sm:$0xff]  ;;  %v5988_v39 = vld [vmem:[#allocation54_spill] sm:$0xff] }
  0x97   :  { %784 = vmatprep.subr.mxu0 %v5978_v28  ;;  %954 = vmatprep.subr.mxu1 %v5979_v53  ;;  %v5989_v28 = vld [vmem:[#allocation25_spill] sm:$0xff]  ;;  %v5990_v53 = vld [vmem:[#allocation56_spill] sm:$0xff] }
  0x98   :  { %787 = vmatpush1.msra.mxu0 %v5980_v19  ;;  %956 = vmatpush1.msra.mxu1 %v5981_v61  ;;  %v5991_v19 = vld [vmem:[#allocation26_spill] sm:$0xff] }
  0x99   :  { %790 = vmatprep.subr.mxu0 %v5982_v29  ;;  %958 = vmatprep.subr.mxu1 %v5983_v44  ;;  %v5992_v61 = vld [vmem:[#allocation58_spill] sm:$0xff]  ;;  %v5993_v29 = vld [vmem:[#allocation27_spill] sm:$0xff]  ;;  %v5994_v44 = vld [vmem:[#allocation60_spill] sm:$0xff] }
  0x9a   :  { %793 = vmatpush1.msra.mxu0 %v5984_v52  ;;  %960 = vmatpush1.msra.mxu1 %v5985_v41  ;;  %v5995_v52 = vld [vmem:[#allocation28_spill] sm:$0xff]  ;;  %v5996_v41 = vld [vmem:[#allocation62_spill] sm:$0xff] }
  0x9b   :  { %796 = vmatprep.subr.mxu0 %v5986_v12  ;;  %962 = vmatprep.subr.mxu1 %v5987_v7  ;;  %v5997_v12 = vld [vmem:[#allocation29_spill] sm:$0xff]  ;;  %v5998_v7 = vld [vmem:[#allocation64_spill] sm:$0xff] }
  0x9c   :  { %799 = vmatpush1.msra.mxu0 %v5988_v39  ;;  %964 = vmatpush1.msra.mxu1 %v5989_v28  ;;  %v65_v39 = vld [vmem:[#allocation2 + $0x18] sm:$0xff] }
  0x9d   :  { %802 = vmatprep.subr.mxu0 %v5990_v53  ;;  %966 = vmatprep.subr.mxu1 %v5991_v19  ;;  %v5999_v28 = vld [vmem:[#allocation31_spill] sm:$0xff]  ;;  %v6000_v53 = vld [vmem:[#allocation66_spill] sm:$0xff]  ;;  %v6001_v19 = vld [vmem:[#allocation33_spill] sm:$0xff] }
  0x9e   :  { %805 = vmatpush2.msra.mxu0 %v5992_v61  ;;  %968 = vmatpush1.msra.mxu1 %v5993_v29  ;;  %v6002_v61 = vld [vmem:[#allocation68_spill] sm:$0xff]  ;;  %v64_v29 = vld [vmem:[#allocation2 + $0x10] sm:$0xff] }
  0x9f   :  { %808 = vmatprep.subr.mxu0 %v5994_v44  ;;  %970 = vmatprep.subr.mxu1 %v5995_v52  ;;  %v6004_v44 = vld [vmem:[#allocation70_spill] sm:$0xff]  ;;  %v4037_v52 = vand.u32 4294901760, %v65_v39 }
  0xa0   :  { %811 = vmatpush2.msra.mxu0 %v5996_v41  ;;  %972 = vmatpush1.msra.mxu1 %v5997_v12  ;;  %v6005_v41 = vld [vmem:[#allocation37_spill] sm:$0xff]  ;;  %v6006_v12 = vld [vmem:[#allocation72_spill] sm:$0xff] }
  0xa1   :  { %814 = vmatprep.subr.mxu0 %v5998_v7  ;;  %974 = vmatprep.subr.mxu1 %v5999_v28  ;;  %v6007_v7 = vld [vmem:[#allocation39_spill] sm:$0xff]  ;;  %v6008_v28 = vld [vmem:[#allocation74_spill] sm:$0xff] }
  0xa2   :  { %817 = vmatpush2.msra.mxu0 %v6000_v53  ;;  %976 = vmatpush1.msra.mxu1 %v6001_v19  ;;  %v4043_v53 = vand.u32 4294901760, %v64_v29  ;;  %v6009_v19 = vld [vmem:[#allocation41_spill] sm:$0xff] }
  0xa3   :  { %820 = vmatprep.subr.mxu0 %v6002_v61  ;;  %978 = vmatprep.subr.mxu1 %v6003_v51  ;;  %v6010_v61 = vld [vmem:[#allocation76_spill] sm:$0xff]  ;;  %v6012_v51 = vld [vmem:[#allocation78_spill] sm:$0xff] }
  0xa4   :  { %823 = vmatpush2.msra.mxu0 %v6004_v44  ;;  %980 = vmatpush1.msra.mxu1 %v6005_v41  ;;  %v4050_v44 = vsub.f32 %v65_v39, %v4037_v52  ;;  %v6013_v41 = vld [vmem:[#allocation45_spill] sm:$0xff]  ;;  %v4057_v62 = vsub.f32 %v64_v29, %v4043_v53 }
  0xa5   :  { %826 = vmatprep.subr.mxu0 %v6006_v12  ;;  %982 = vmatprep.subr.mxu1 %v6007_v7  ;;  %v6014_v12 = vld [vmem:[#allocation80_spill] sm:$0xff]  ;;  %v6015_v7 = vld [vmem:[#allocation47_spill] sm:$0xff] }
  0xa6   :  { %829 = vmatpush2.msra.mxu0 %v6008_v28  ;;  %984 = vmatpush2.msra.mxu1 %v6009_v19  ;;  %v6016_v28 = vld [vmem:[#allocation82_spill] sm:$0xff]  ;;  %v6017_v19 = vld [vmem:[#allocation49_spill] sm:$0xff]  ;;  %v5570_v39 = vand.u32 4294901760, %v4050_v44  ;;  %v5572_v29 = vand.u32 4294901760, %v4057_v62 }
  0xa7   :  { %832 = vmatprep.subr.mxu0 %v6010_v61  ;;  %986 = vmatprep.subr.mxu1 %v6011_v33  ;;  %v6018_v61 = vld [vmem:[#allocation84_spill] sm:$0xff]  ;;  %v6019_v33 = vld [vmem:[#allocation51_spill] sm:$0xff] }
  0xa8   :  { %835 = vmatpush2.msra.mxu0 %v6012_v51  ;;  %988 = vmatpush2.msra.mxu1 %v6013_v41  ;;  %v6020_v51 = vld [vmem:[#allocation86_spill] sm:$0xff]  ;;  %v6021_v41 = vld [vmem:[#allocation53_spill] sm:$0xff] }
  0xa9   :  { %838 = vmatprep.subr.mxu0 %v6014_v12  ;;  %990 = vmatprep.subr.mxu1 %v6015_v7  ;;  %v6022_v12 = vld [vmem:[#allocation88_spill] sm:$0xff]  ;;  %v6023_v7 = vld [vmem:[#allocation55_spill] sm:$0xff] }
  0xaa   :  { %841 = vmatpush2.msra.mxu0 %v6016_v28  ;;  %992 = vmatpush2.msra.mxu1 %v6017_v19  ;;  %v6024_v28 = vld [vmem:[#allocation89_spill] sm:$0xff]  ;;  %v6026_v19 = vld [vmem:[#allocation91_spill] sm:$0xff] }
  0xab   :  { %844 = vmatprep.subr.mxu0 %v6018_v61  ;;  %994 = vmatprep.subr.mxu1 %v6019_v33  ;;  %v6027_v61 = vld [vmem:[#allocation59_spill] sm:$0xff] }
  0xac   :  { %847 = vmatpush2.msra.mxu0 %v6020_v51  ;;  %996 = vmatpush2.msra.mxu1 %v6021_v41  ;;  %v289_v41 = vsub.f32 %v4050_v44, %v5570_v39  ;;  %v6028_v51 = vld [vmem:[#allocation61_spill] sm:$0xff] }
  0xad   :  { %850 = vmatprep.subr.mxu0 %v6022_v12  ;;  %998 = vmatprep.subr.mxu1 %v6023_v7  ;;  %v6029_v12 = vld [vmem:[#allocation95_spill] sm:$0xff] }
  0xae   :  { %853 = vmatpush2.msra.mxu0 %v6024_v28  ;;  %1000 = vmatpush2.msra.mxu1 %v6025_v49  ;;  %v6030_v7 = vld [vmem:[#allocation63_spill] sm:$0xff]  ;;  %v6031_v49 = vld [vmem:[#allocation65_spill] sm:$0xff]  ;;  %v290_v39 = vand.u32 4294901760, %v289_v41 }
  0xaf   :  { %856 = vmatprep.subr.mxu0 %v6026_v19  ;;  %1002 = vmatprep.subr.mxu1 %v6027_v61  ;;  %v295_v19 = vsub.f32 %v4057_v62, %v5572_v29  ;;  %v6036_v29 = vld [vmem:[#allocation75_spill] sm:$0xff] }
  0xb0   :  { %859 = vmatpush2.msra.mxu0 %v3813_v50  ;;  %1004 = vmatpush2.msra.mxu1 %v6028_v51  ;;  %v6032_v50 = vld [vmem:[#allocation67_spill] sm:$0xff]  ;;  %v6033_v51 = vld [vmem:[#allocation69_spill] sm:$0xff] }
  0xb1   :  { %862 = vmatprep.subr.mxu0 %v6029_v12  ;;  %1006 = vmatprep.subr.mxu1 %v6030_v7  ;;  %v6034_v7 = vld [vmem:[#allocation71_spill] sm:$0xff]  ;;  %v6035_v12 = vld [vmem:[#allocation73_spill] sm:$0xff] }
  0xb2   :  { %865 = vmatpush2.msra.mxu0 %v3839_v36  ;;  %1008 = vmatpush2.msra.mxu1 %v6031_v49  ;;  %v296_v36 = vand.u32 4294901760, %v295_v19  ;;  %v6038_v41 = vld [vmem:[#allocation79_spill] sm:$0xff] }
  0xb3   :  { %868 = vmatprep.subr.mxu0 %v3857_v46  ;;  %1010 = vmatprep.subr.mxu1 %v6032_v50  ;;  %v6040_v19 = vld [vmem:[#allocation83_spill] sm:$0xff] }
  0xb4   :  { %871 = vmatpush2.msra.mxu0 %v3868_v47  ;;  %1012 = vmatpush2.msra.mxu1 %v6033_v51  ;;  %v6037_v47 = vld [vmem:[#allocation77_spill] sm:$0xff] }
  0xb5   :  { %874 = vmatprep.subr.mxu0 %v3880_v20  ;;  %1014 = vmatprep.subr.mxu1 %v6034_v7 }
  0xb6   :  { %877 = vmatpush2.msra.mxu0 %v3893_v27  ;;  %1016 = vmatpush2.msra.mxu1 %v6035_v12  ;;  %v6039_v27 = vld [vmem:[#allocation81_spill] sm:$0xff] }
  0xb7   :  { %880 = vmatprep.subr.mxu0 %v3904_v30  ;;  %1018 = vmatprep.subr.mxu1 %v6036_v29 }
  0xb8   :  { %291 = vmatprep.mubr.f32.mxu0 %v290_v39  ;;  %883 = vmatpush2.msra.mxu0 %v3911_v13  ;;  %v6041_v39 = vld [vmem:[#allocation85_spill] sm:$0xff] }
  0xb9   :  { %1020 = vmatpush2.msra.mxu1 %v6037_v47  ;;  %297 = vmatmul.mubr.f32.gmra.mxu0 %v296_v36  ;;  %v6042_v36 = vand.u32 4294901760, %v3106_v18  ;;  %v6048_v18 = vld [vmem:[#allocation94_spill] sm:$0xff] }
  0xba   :  { %886 = vmatprep.subr.mxu0 %v3927_v1  ;;  %1022 = vmatprep.subr.mxu1 %v6038_v41 }
  0xbb   :  { %889 = vmatpush2.msra.mxu0 %v3937_v26  ;;  %1024 = vmatpush2.msra.mxu1 %v6039_v27  ;;  %v6043_v27 = vand.u32 4294901760, %v3119_v23  ;;  %v6049_v23 = vand.u32 4294901760, %v3148_v35  ;;  %v6053_v35 = vand.u32 4294901760, %v3201_v59  ;;  %v6058_v59 = vand.u32 4294901760, %v4050_v44 }
  0xbc   :  { %892 = vmatprep.subr.mxu0 %v3946_v34  ;;  %1026 = vmatprep.subr.mxu1 %v6040_v19  ;;  %v6044_v19 = vld [vmem:[#allocation90_spill] sm:$0xff] }
  0xbd   :  { %895 = vmatpush2.msra.mxu0 %v3953_v56  ;;  %898 = vmatprep.mubr.f32.mxu0 %v3888_v21  ;;  %v6045_v56 = vand.u32 4294901760, %v3125_v25  ;;  %v6050_v25 = vand.u32 4294901760, %v3161_v40  ;;  %v6056_v40 = vand.u32 4294901760, %v3224_v8  ;;  %v6065_v8 = vand.u32 4294901760, %v3325_v55  ;;  %v6079_v55 = vld [vmem:[#allocation16_spill] sm:$0xff] }
  0xbe   :  { %1028 = vmatpush2.msra.mxu1 %v6041_v39  ;;  %901 = vmatmul.mubr.f32.vlgmr.msra.gmra.mxu0 %v3900_v32  ;;  %v6046_v39 = vand.u32 4294901760, %v3139_v31  ;;  %v6051_v31 = vand.u32 4294901760, %v3175_v45  ;;  %v6057_v45 = vand.u32 4294901760, %v3235_v42 }
  0xbf   :  { %1030 = vmatprep.subr.mxu1 %v3769_v43  ;;  %1073 = vmatprep.subr.mxu0 %v6042_v36  ;;  %v6047_v43 = vld [vmem:[#allocation92_spill] sm:$0xff]  ;;  %v6085_v36 = vld [vmem:[#allocation18_spill] sm:$0xff] }
  0xc0   :  { %1032 = vmatpush2.msra.mxu1 %v3780_v37  ;;  %1077 = vmatpush1.msra.mxu0 %v6043_v27  ;;  %v6052_v27 = vand.u32 4294901760, %v3888_v21  ;;  %v6059_v21 = vand.u32 4294901760, %v3247_v48  ;;  %v6070_v48 = vld [vmem:[#allocation13_spill] sm:$0xff] }
  0xc1   :  { %696 = vmatprep.mubr.f32.mxu1 %v4037_v52  ;;  %1034 = vmatprep.subr.mxu1 %v6044_v19 }
  0xc2   :  { %1081 = vmatprep.subr.mxu0 %v6045_v56  ;;  %698 = vmatmul.mubr.f32.gmra.mxu1 %v4043_v53  ;;  %v6054_v56 = vand.u32 4294901760, %v3900_v32 }
  0xc3   :  { %1085 = vmatpush1.msra.mxu0 %v6046_v39  ;;  %1036 = vmatpush2.msra.mxu1 %v6047_v43  ;;  %v6055_v39 = vand.u32 4294901760, %v3213_v0  ;;  %v6061_v0 = vand.u32 4294901760, %v3261_v57  ;;  %v6073_v57 = vld [vmem:[#allocation14_spill] sm:$0xff] }
  0xc4   :  { %908 = vmatprep.mubr.f32.mxu0 %v4050_v44  ;;  %1038 = vmatprep.subr.mxu1 %v6048_v18 }
  0xc5   :  { %1089 = vmatprep.subr.mxu0 %v6049_v23  ;;  %911 = vmatmul.mubr.f32.gmra.mxu0 %v4057_v62  ;;  %v6086_v23 = vld [vmem:[#allocation42_spill] sm:$0xff] }
  0xc6   :  { %1040 = vmatpush2.msra.mxu1 %v3835_v14  ;;  %1093 = vmatpush1.msra.mxu0 %v6050_v25  ;;  %v6087_v25 = vand.u32 4294901760, %v6086_v23 }
  0xc7   :  { %1042 = vmatprep.subr.mxu1 %v3848_v2  ;;  %1097 = vmatprep.subr.mxu0 %v6051_v31  ;;  %v6088_v31 = vld [vmem:[#allocation19_spill] sm:$0xff] }
  0xc8   :  { %1044 = vmatpush2.msra.mxu1 %v3864_v38  ;;  %1048 = vmatprep.mubr.f32.mxu1 %v6052_v27  ;;  %v6089_v27 = vld [vmem:[#allocation44_spill] sm:$0xff] }
  0xc9   :  { %1101 = vmatpush1.msra.mxu0 %v6053_v35  ;;  %1052 = vmatmul.mubr.f32.vlgmr.msra.gmra.mxu1 %v6054_v56  ;;  %v6090_v35 = vand.u32 4294901760, %v6089_v27  ;;  %v6091_v56 = vld [vmem:[#allocation20_spill] sm:$0xff] }
  0xca   :  { %1105 = vmatprep.subr.mxu0 %v6055_v39  ;;  %1344 = vmatprep.subr.mxu1 %v3086_v3  ;;  %v6060_v3 = vand.u32 4294901760, %v4057_v62  ;;  %v6083_v62 = vld [vmem:[#allocation40_spill] sm:$0xff]  ;;  %v6092_v39 = vld [vmem:[#allocation46_spill] sm:$0xff] }
  0xcb   :  { %1109 = vmatpush1.msra.mxu0 %v6056_v40  ;;  %1346 = vmatpush1.msra.mxu1 %v3088_v4  ;;  %v6062_v4 = vand.u32 4294901760, %v3273_v6  ;;  %v6076_v6 = vld [vmem:[#allocation15_spill] sm:$0xff]  ;;  %v6084_v44 = vand.u32 4294901760, %v6083_v62  ;;  %v6093_v40 = vand.u32 4294901760, %v6092_v39 }
  0xcc   :  { %1113 = vmatprep.subr.mxu0 %v6057_v45  ;;  %1348 = vmatprep.subr.mxu1 %v3090_v5  ;;  %v6063_v5 = vand.u32 4294901760, %v3294_v54  ;;  %v6094_v45 = vld [vmem:[#allocation21_spill] sm:$0xff] }
  0xcd   :  { %1060 = vmatprep.mubr.f32.mxu1 %v6058_v59  ;;  %1117 = vmatpush1.msra.mxu0 %v6059_v21  ;;  %v6095_v59 = vld [vmem:[#allocation48_spill] sm:$0xff] }
  0xce   :  { %1350 = vmatpush1.msra.mxu1 %v3092_v9  ;;  %1121 = vmatprep.subr.mxu0 %v6061_v0  ;;  %v6064_v9 = vand.u32 4294901760, %v3307_v63  ;;  %v6096_v21 = vand.u32 4294901760, %v6095_v59  ;;  %v6098_v0 = vld [vmem:[#allocation50_spill] sm:$0xff] }
  0xcf   :  { %1064 = vmatmul.mubr.f32.gmra.mxu1 %v6060_v3  ;;  %1352 = vmatprep.subr.mxu1 %v3094_v10  ;;  %v6066_v10 = vand.u32 4294901760, %v3338_v58  ;;  %v6080_v58 = vld [vmem:[#allocation38_spill] sm:$0xff] }
  0xd0   :  { %1125 = vmatpush1.msra.mxu0 %v6062_v4  ;;  %1354 = vmatpush1.msra.mxu1 %v3096_v11  ;;  %v6067_v11 = vand.u32 4294901760, %v3350_v60  ;;  %v6081_v32 = vand.u32 4294901760, %v6080_v58  ;;  %v6097_v3 = vld [vmem:[#allocation22_spill] sm:$0xff]  ;;  %v6099_v4 = vand.u32 4294901760, %v6098_v0 }
  0xd1   :  { %1129 = vmatprep.subr.mxu0 %v6063_v5  ;;  %1356 = vmatprep.subr.mxu1 %v3099_v15  ;;  %v6068_v15 = vld [vmem:[#allocation30_spill] sm:$0xff]  ;;  %v6100_v5 = vld [vmem:[#allocation23_spill] sm:$0xff] }
  0xd2   :  { %1133 = vmatpush1.msra.mxu0 %v6064_v9  ;;  %1358 = vmatpush1.msra.mxu1 %v3101_v16  ;;  %v6069_v42 = vand.u32 4294901760, %v6068_v15  ;;  %v6071_v16 = vld [vmem:[#allocation32_spill] sm:$0xff] }
  0xd3   :  { %1137 = vmatprep.subr.mxu0 %v6065_v8  ;;  %1360 = vmatprep.subr.mxu1 %v3103_v17  ;;  %v6072_v54 = vand.u32 4294901760, %v6071_v16  ;;  %v6074_v17 = vld [vmem:[#allocation34_spill] sm:$0xff]  ;;  %v6101_v9 = vld [vmem:[#allocation52_spill] sm:$0xff] }
  0xd4   :  { %1141 = vmatpush1.msra.mxu0 %v6066_v10  ;;  %1362 = vmatpush1.msra.mxu1 %v3116_v22  ;;  %v6075_v63 = vand.u32 4294901760, %v6074_v17  ;;  %v6077_v22 = vld [vmem:[#allocation36_spill] sm:$0xff]  ;;  %v6102_v8 = vand.u32 4294901760, %v6101_v9 }
  0xd5   :  { %1145 = vmatprep.subr.mxu0 %v6067_v11  ;;  %1364 = vmatprep.subr.mxu1 %v5963_v24  ;;  %v6078_v60 = vand.u32 4294901760, %v6077_v22  ;;  %v6082_v24 = vld [vmem:[#allocation17_spill] sm:$0xff]  ;;  %v6103_v10 = vld [vmem:[#allocation24_spill] sm:$0xff]  ;;  %v6104_v11 = vld [vmem:[#allocation54_spill] sm:$0xff] }
  0xd6   :  { %1149 = vmatpush1.msra.mxu0 %v6069_v42  ;;  %1366 = vmatpush1.msra.mxu1 %v6070_v48  ;;  %v6105_v15 = vand.u32 4294901760, %v6104_v11  ;;  %v6106_v42 = vld [vmem:[#allocation25_spill] sm:$0xff]  ;;  %v6107_v48 = vld [vmem:[#allocation56_spill] sm:$0xff] }
  0xd7   :  { %1153 = vmatprep.subr.mxu0 %v6072_v54  ;;  %1368 = vmatprep.subr.mxu1 %v6073_v57  ;;  %v6108_v16 = vand.u32 4294901760, %v6107_v48  ;;  %v6109_v54 = vld [vmem:[#allocation26_spill] sm:$0xff] }
  0xd8   :  { %1157 = vmatpush1.msra.mxu0 %v6075_v63  ;;  %1370 = vmatpush1.msra.mxu1 %v6076_v6  ;;  %v6110_v57 = vld [vmem:[#allocation58_spill] sm:$0xff]  ;;  %v6112_v63 = vld [vmem:[#allocation27_spill] sm:$0xff]  ;;  %v6113_v6 = vld [vmem:[#allocation60_spill] sm:$0xff] }
  0xd9   :  { %1161 = vmatprep.subr.mxu0 %v6078_v60  ;;  %1372 = vmatprep.subr.mxu1 %v6079_v55  ;;  %v6111_v17 = vand.u32 4294901760, %v6110_v57  ;;  %v6114_v22 = vand.u32 4294901760, %v6113_v6  ;;  %v6115_v60 = vld [vmem:[#allocation28_spill] sm:$0xff]  ;;  %v6116_v55 = vld [vmem:[#allocation62_spill] sm:$0xff] }
  0xda   :  { %1165 = vmatpush1.msra.mxu0 %v6081_v32  ;;  %1374 = vmatpush1.msra.mxu1 %v6082_v24  ;;  %v6117_v58 = vand.u32 4294901760, %v6116_v55  ;;  %v6118_v32 = vld [vmem:[#allocation29_spill] sm:$0xff]  ;;  %v6119_v24 = vld [vmem:[#allocation64_spill] sm:$0xff] }
  0xdb   :  { %1169 = vmatprep.subr.mxu0 %v6084_v44  ;;  %1376 = vmatprep.subr.mxu1 %v6085_v36  ;;  %v6120_v62 = vand.u32 4294901760, %v6119_v24  ;;  %v6121_v44 = vld [vmem:[#allocation31_spill] sm:$0xff]  ;;  %v6122_v36 = vld [vmem:[#allocation66_spill] sm:$0xff]  ;;  %v6153_v55 = vld [vmem:[#allocation53_spill] sm:$0xff] }
  0xdc   :  { %1173 = vmatpush1.msra.mxu0 %v6087_v25  ;;  %1378 = vmatpush1.msra.mxu1 %v6088_v31  ;;  %v6123_v23 = vand.u32 4294901760, %v6122_v36  ;;  %v6124_v25 = vld [vmem:[#allocation33_spill] sm:$0xff]  ;;  %v6125_v31 = vld [vmem:[#allocation68_spill] sm:$0xff]  ;;  %v6156_v24 = vld [vmem:[#allocation55_spill] sm:$0xff] }
  0xdd   :  { %1177 = vmatprep.subr.mxu0 %v6090_v35  ;;  %1380 = vmatprep.subr.mxu1 %v6091_v56  ;;  %v6126_v27 = vand.u32 4294901760, %v6125_v31  ;;  %v6127_v35 = vld [vmem:[#allocation35_spill] sm:$0xff]  ;;  %v6128_v56 = vld [vmem:[#allocation70_spill] sm:$0xff]  ;;  %v6163_v31 = vld [vmem:[#allocation61_spill] sm:$0xff] }
  0xde   :  { %1181 = vmatpush1.msra.mxu0 %v6093_v40  ;;  %1382 = vmatpush1.msra.mxu1 %v6094_v45  ;;  %v6129_v39 = vand.u32 4294901760, %v6128_v56  ;;  %v6130_v40 = vld [vmem:[#allocation37_spill] sm:$0xff]  ;;  %v6131_v45 = vld [vmem:[#allocation72_spill] sm:$0xff]  ;;  %v6159_v36 = vld [vmem:[#allocation91_spill] sm:$0xff] }
  0xdf   :  { %1185 = vmatprep.subr.mxu0 %v6096_v21  ;;  %1384 = vmatprep.subr.mxu1 %v6097_v3  ;;  %v6132_v59 = vand.u32 4294901760, %v6131_v45  ;;  %v6133_v21 = vld [vmem:[#allocation39_spill] sm:$0xff]  ;;  %v6134_v3 = vld [vmem:[#allocation74_spill] sm:$0xff] }
  0xe0   :  { %1189 = vmatpush1.msra.mxu0 %v6099_v4  ;;  %1386 = vmatpush1.msra.mxu1 %v6100_v5  ;;  %v6135_v0 = vand.u32 4294901760, %v6134_v3  ;;  %v6136_v4 = vld [vmem:[#allocation41_spill] sm:$0xff]  ;;  %v6137_v5 = vld [vmem:[#allocation76_spill] sm:$0xff]  ;;  %v6166_v56 = vld [vmem:[#allocation63_spill] sm:$0xff] }
  0xe1   :  { %1193 = vmatprep.subr.mxu0 %v6102_v8  ;;  %1388 = vmatprep.subr.mxu1 %v6103_v10  ;;  %v6138_v9 = vand.u32 4294901760, %v6137_v5  ;;  %v6139_v8 = vld [vmem:[#allocation43_spill] sm:$0xff]  ;;  %v6140_v10 = vld [vmem:[#allocation78_spill] sm:$0xff] }
  0xe2   :  { %1197 = vmatpush1.msra.mxu0 %v6105_v15  ;;  %1390 = vmatpush1.msra.mxu1 %v6106_v42  ;;  %v6141_v11 = vand.u32 4294901760, %v6140_v10  ;;  %v6142_v15 = vld [vmem:[#allocation45_spill] sm:$0xff]  ;;  %v6143_v42 = vld [vmem:[#allocation80_spill] sm:$0xff] }
  0xe3   :  { %1201 = vmatprep.subr.mxu0 %v6108_v16  ;;  %1392 = vmatprep.subr.mxu1 %v6109_v54  ;;  %v6144_v48 = vand.u32 4294901760, %v6143_v42  ;;  %v6145_v16 = vld [vmem:[#allocation47_spill] sm:$0xff]  ;;  %v6146_v54 = vld [vmem:[#allocation82_spill] sm:$0xff]  ;;  %v1517_v42 = vld [vmem:[#allocation7 + $0xc8] sm:$0xff] }
  0xe4   :  { %1205 = vmatpush2.msra.mxu0 %v6111_v17  ;;  %1394 = vmatpush1.msra.mxu1 %v6112_v63  ;;  %v6147_v57 = vand.u32 4294901760, %v6146_v54  ;;  %v6148_v17 = vld [vmem:[#allocation49_spill] sm:$0xff]  ;;  %v6149_v63 = vld [vmem:[#allocation84_spill] sm:$0xff] }
  0xe5   :  { %1209 = vmatprep.subr.mxu0 %v6114_v22  ;;  %1396 = vmatprep.subr.mxu1 %v6115_v60  ;;  %v6150_v6 = vand.u32 4294901760, %v6149_v63  ;;  %v6151_v22 = vld [vmem:[#allocation86_spill] sm:$0xff] }
  0xe6   :  { %1213 = vmatpush2.msra.mxu0 %v6117_v58  ;;  %1398 = vmatpush1.msra.mxu1 %v6118_v32  ;;  %v6152_v60 = vand.u32 4294901760, %v6151_v22  ;;  %v6154_v58 = vld [vmem:[#allocation88_spill] sm:$0xff] }
  0xe7   :  { %1217 = vmatprep.subr.mxu0 %v6120_v62  ;;  %1400 = vmatprep.subr.mxu1 %v6121_v44  ;;  %v6155_v32 = vand.u32 4294901760, %v6154_v58  ;;  %v6157_v62 = vand.u32 4294901760, %v6024_v28  ;;  %v6158_v44 = vld [vmem:[#allocation57_spill] sm:$0xff] }
  0xe8   :  { %1221 = vmatpush2.msra.mxu0 %v6123_v23  ;;  %1402 = vmatpush1.msra.mxu1 %v6124_v25  ;;  %v6160_v23 = vand.u32 4294901760, %v6159_v36 }
  0xe9   :  { %1225 = vmatprep.subr.mxu0 %v6126_v27  ;;  %1404 = vmatprep.subr.mxu1 %v6127_v35  ;;  %v6164_v27 = vld [vmem:[#allocation95_spill] sm:$0xff] }
  0xea   :  { %1229 = vmatpush2.msra.mxu0 %v6129_v39  ;;  %1406 = vmatpush1.msra.mxu1 %v6130_v40  ;;  %v6165_v35 = vand.u32 4294901760, %v6164_v27  ;;  %v6167_v39 = vld [vmem:[#allocation96_spill] sm:$0xff]  ;;  %v6169_v40 = vand.u32 4294901760, %v3857_v46  ;;  %v6175_v46 = vand.u32 4294901760, %v3904_v30  ;;  %v6180_v30 = vand.u32 4294901760, %v3946_v34  ;;  %v1522_v34 = vld [vmem:[#allocation7 + $0xf0] sm:$0xff] }
  0xeb   :  { %1233 = vmatprep.subr.mxu0 %v6132_v59  ;;  %1408 = vmatprep.subr.mxu1 %v6133_v21  ;;  %v6168_v28 = vand.u32 4294901760, %v6167_v39  ;;  %v6172_v59 = vand.u32 4294901760, %v3880_v20  ;;  %v6173_v21 = vld [vmem:[#allocation100_spill] sm:$0xff]  ;;  %v6177_v20 = vand.u32 4294901760, %v3927_v1  ;;  %v6186_v1 = vld [vmem:[#allocation99_spill] sm:$0xff] }
  0xec   :  { %1237 = vmatpush2.msra.mxu0 %v6135_v0  ;;  %1410 = vmatpush2.msra.mxu1 %v6136_v4  ;;  %v6174_v3 = vand.u32 4294901760, %v6173_v21  ;;  %v1521_v0 = vld [vmem:[#allocation7 + $0xe8] sm:$0xff]  ;;  %v1519_v4 = vld [vmem:[#allocation7 + $0xd8] sm:$0xff]  ;;  %v1512_v39 = vld [vmem:[#allocation7 + $0xa0] sm:$0xff] }
  0xed   :  { %1241 = vmatprep.subr.mxu0 %v6138_v9  ;;  %1412 = vmatprep.subr.mxu1 %v6139_v8  ;;  %v4345_v9 = vand.u32 4294901760, %v1519_v4  ;;  %v1518_v8 = vld [vmem:[#allocation7 + $0xd0] sm:$0xff] }
  0xee   :  { %1245 = vmatpush2.msra.mxu0 %v6141_v11  ;;  %1414 = vmatpush2.msra.mxu1 %v6142_v15  ;;  %v4353_v15 = vand.u32 4294901760, %v1518_v8 }
  0xef   :  { %1249 = vmatprep.subr.mxu0 %v6144_v48  ;;  %1416 = vmatprep.subr.mxu1 %v6145_v16  ;;  %v4361_v54 = vsub.f32 %v1519_v4, %v4345_v9 }
  0xf0   :  { %1253 = vmatpush2.msra.mxu0 %v6147_v57  ;;  %1418 = vmatpush2.msra.mxu1 %v6148_v17  ;;  %v1516_v57 = vld [vmem:[#allocation7 + $0xc0] sm:$0xff] }
  0xf1   :  { %1257 = vmatprep.subr.mxu0 %v6150_v6  ;;  %1420 = vmatprep.subr.mxu1 %v6019_v33  ;;  %v6161_v33 = vld [vmem:[#allocation93_spill] sm:$0xff]  ;;  %v4371_v6 = vsub.f32 %v1518_v8, %v4353_v15  ;;  %v4373_v22 = vand.u32 4294901760, %v1516_v57 }
  0xf2   :  { %1261 = vmatpush2.msra.mxu0 %v6152_v60  ;;  %1422 = vmatpush2.msra.mxu1 %v6153_v55  ;;  %v6162_v25 = vand.u32 4294901760, %v6161_v33  ;;  %v1515_v60 = vld [vmem:[#allocation7 + $0xb8] sm:$0xff] }
  0xf3   :  { %1265 = vmatprep.subr.mxu0 %v6155_v32  ;;  %1424 = vmatprep.subr.mxu1 %v6156_v24  ;;  %v5590_v32 = vand.u32 4294901760, %v4361_v54  ;;  %v4389_v33 = vsub.f32 %v1516_v57, %v4373_v22 }
  0xf4   :  { %1269 = vmatpush2.msra.mxu0 %v6157_v62  ;;  %1426 = vmatpush2.msra.mxu1 %v6158_v44  ;;  %v1514_v62 = vld [vmem:[#allocation7 + $0xb0] sm:$0xff] }
  0xf5   :  { %1273 = vmatprep.subr.mxu0 %v6160_v23  ;;  %1428 = vmatprep.subr.mxu1 %v6027_v61  ;;  %v6170_v61 = vld [vmem:[#allocation97_spill] sm:$0xff]  ;;  %v5588_v23 = vand.u32 4294901760, %v4371_v6  ;;  %v1756_v27 = vsub.f32 %v4361_v54, %v5590_v32 }
  0xf6   :  { %1277 = vmatpush2.msra.mxu0 %v6162_v25  ;;  %1430 = vmatpush2.msra.mxu1 %v6163_v31  ;;  %v6171_v45 = vand.u32 4294901760, %v6170_v61  ;;  %v1513_v25 = vld [vmem:[#allocation7 + $0xa8] sm:$0xff]  ;;  %v5586_v61 = vand.u32 4294901760, %v4389_v33 }
  0xf7   :  { %1281 = vmatprep.subr.mxu0 %v6165_v35  ;;  %1432 = vmatprep.subr.mxu1 %v6166_v56  ;;  %v4396_v56 = vand.u32 4294901760, %v1515_v60  ;;  %v1757_v21 = vand.u32 4294901760, %v1756_v27 }
  0xf8   :  { %1285 = vmatpush2.msra.mxu0 %v6168_v28  ;;  %1434 = vmatpush2.msra.mxu1 %v6031_v49  ;;  %v6179_v49 = vld [vmem:[#allocation81_spill] sm:$0xff] }
  0xf9   :  { %1289 = vmatprep.subr.mxu0 %v6169_v40  ;;  %1436 = vmatprep.subr.mxu1 %v6032_v50  ;;  %v6176_v50 = vand.u32 4294901760, %v3911_v13  ;;  %v1762_v40 = vsub.f32 %v4371_v6, %v5588_v23 }
  0xfa   :  { %1293 = vmatpush2.msra.mxu0 %v6171_v45  ;;  %1438 = vmatpush2.msra.mxu1 %v6033_v51  ;;  %v6182_v51 = vld [vmem:[#allocation101_spill] sm:$0xff]  ;;  %v4402_v45 = vand.u32 4294901760, %v1514_v62 }
  0xfb   :  { %1297 = vmatprep.subr.mxu0 %v6172_v59  ;;  %1440 = vmatprep.subr.mxu1 %v6034_v7  ;;  %v6178_v7 = vand.u32 4294901760, %v3937_v26  ;;  %v6183_v13 = vand.u32 4294901760, %v6182_v51  ;;  %v1523_v26 = vld [vmem:[#allocation7 + $0xf8] sm:$0xff]  ;;  %v1509_v51 = vld [vmem:[#allocation7 + $0x88] sm:$0xff] }
  0xfc   :  { %1301 = vmatpush2.msra.mxu0 %v6174_v3  ;;  %1442 = vmatpush2.msra.mxu1 %v6035_v12  ;;  %v6181_v12 = vld [vmem:[#allocation83_spill] sm:$0xff] }
  0xfd   :  { %1305 = vmatprep.subr.mxu0 %v6175_v46  ;;  %1444 = vmatprep.subr.mxu1 %v6036_v29  ;;  %v6184_v29 = vld [vmem:[#allocation98_spill] sm:$0xff]  ;;  %v1511_v59 = vld [vmem:[#allocation7 + $0x98] sm:$0xff]  ;;  %v4408_v46 = vsub.f32 %v1515_v60, %v4396_v56 }
  0xfe   :  { %1309 = vmatpush2.msra.mxu0 %v6176_v50  ;;  %1446 = vmatpush2.msra.mxu1 %v6037_v47  ;;  %v6185_v47 = vld [vmem:[#allocation85_spill] sm:$0xff]  ;;  %v4410_v50 = vand.u32 4294901760, %v1513_v25 }
  0xff   :  { %1313 = vmatprep.subr.mxu0 %v6177_v20  ;;  %1448 = vmatprep.subr.mxu1 %v6038_v41  ;;  %v6187_v41 = vld [vmem:[#allocation87_spill] sm:$0xff]  ;;  %v1510_v20 = vld [vmem:[#allocation7 + $0x90] sm:$0xff] }
 0x100   :  { %1317 = vmatpush2.msra.mxu0 %v6178_v7  ;;  %1450 = vmatpush2.msra.mxu1 %v6179_v49  ;;  %v1763_v7 = vand.u32 4294901760, %v1762_v40  ;;  %v1774_v49 = vsub.f32 %v4389_v33, %v5586_v61  ;;  %v1499_v61 = vld [vmem:[#allocation7 + $0x38] sm:$0xff] }
 0x101   :  { %1321 = vmatprep.subr.mxu0 %v6180_v30  ;;  %1452 = vmatprep.subr.mxu1 %v6181_v12  ;;  %v4417_v30 = vsub.f32 %v1514_v62, %v4402_v45  ;;  %v4419_v12 = vand.u32 4294901760, %v1512_v39 }
 0x102   :  { %1325 = vmatpush2.msra.mxu0 %v6183_v13  ;;  %1327 = vmatprep.mubr.f32.mxu0 %v6184_v29 }
 0x103   :  { %1454 = vmatpush2.msra.mxu1 %v6185_v47  ;;  %1329 = vmatmul.mubr.f32.vlgmr.msra.gmra.mxu0 %v6186_v1  ;;  %v4424_v47 = vsub.f32 %v1513_v25, %v4410_v50 }
 0x104   :  { %1456 = vmatprep.subr.mxu1 %v6187_v41  ;;  %1335 = vmatprep.mubr.f32.mxu0 %v4037_v52  ;;  %v1508_v41 = vld [vmem:[#allocation7 + $0x80] sm:$0xff] }
 0x105   :  { %1458 = vmatpush2.msra.mxu1 %v3780_v37  ;;  %1472 = vmatprep.mubr.f32.mxu1 %v6184_v29  ;;  %v4323_v37 = vand.u32 4294901760, %v1523_v26  ;;  %v5584_v29 = vand.u32 4294901760, %v4408_v46  ;;  %v5581_v8 = vand.u32 4294901760, %v4424_v47 }
 0x106   :  { %1460 = vmatprep.subr.mxu1 %v6044_v19  ;;  %v4326_v19 = vand.u32 4294901760, %v1522_v34 }
 0x107   :  { %1462 = vmatpush2.msra.mxu1 %v6047_v43  ;;  %1337 = vmatmul.mubr.f32.gmra.mxu0 %v4043_v53  ;;  %6188 = vst [vmem:[#allocation12_spill] sm:$0xff] %v4323_v37  ;;  %v4330_v43 = vsub.f32 %v1523_v26, %v4323_v37  ;;  %v1775_v26 = vand.u32 4294901760, %v1774_v49  ;;  %v1780_v4 = vsub.f32 %v4408_v46, %v5584_v29  ;;  %v1504_v49 = vld [vmem:[#allocation7 + $0x60] sm:$0xff] }
 0x108   :  { %1464 = vmatprep.subr.mxu1 %v6048_v18  ;;  %v4332_v18 = vand.u32 4294901760, %v1521_v0  ;;  %1569 = vmatprep.subr.mxu0 %v4323_v37 }
 0x109   :  { %1466 = vmatpush2.msra.mxu1 %v3835_v14  ;;  %6189 = vst [vmem:[#allocation51_spill] sm:$0xff] %v4330_v43  ;;  %v1520_v14 = vld [vmem:[#allocation7 + $0xe0] sm:$0xff]  ;;  %1571 = vmatpush1.msra.mxu0 %v4326_v19  ;;  %v5595_v5 = vand.u32 4294901760, %v4330_v43  ;;  %v1781_v62 = vand.u32 4294901760, %v1780_v4  ;;  %v1503_v4 = vld [vmem:[#allocation7 + $0x58] sm:$0xff] }
 0x10a   :  { %1468 = vmatprep.subr.mxu1 %v3848_v2  ;;  %v4336_v2 = vsub.f32 %v1522_v34, %v4326_v19  ;;  %1573 = vmatprep.subr.mxu0 %v4332_v18  ;;  %v5583_v34 = vand.u32 4294901760, %v4417_v30 }
 0x10b   :  { %1470 = vmatpush2.msra.mxu1 %v3864_v38  ;;  %v4338_v38 = vand.u32 4294901760, %v1520_v14  ;;  %v1732_v48 = vsub.f32 %v4330_v43, %v5595_v5  ;;  %v1496_v5 = vld [vmem:[#allocation7 + $0x20] sm:$0xff] }
 0x10c   :  { %1474 = vmatmul.mubr.f32.vlgmr.msra.gmra.mxu1 %v6186_v1  ;;  %v5594_v10 = vand.u32 4294901760, %v4336_v2  ;;  %v4426_v1 = vand.u32 4294901760, %v1511_v59  ;;  %v1786_v57 = vsub.f32 %v4417_v30, %v5583_v34 }
 0x10d   :  { %1480 = vmatprep.mubr.f32.mxu1 %v4037_v52  ;;  %v4343_v52 = vsub.f32 %v1521_v0, %v4332_v18  ;;  %v4351_v11 = vsub.f32 %v1520_v14, %v4338_v38  ;;  %1575 = vmatpush1.msra.mxu0 %v4338_v38  ;;  %v1733_v55 = vand.u32 4294901760, %v1732_v48  ;;  %v4431_v0 = vsub.f32 %v1512_v39, %v4419_v12 }
 0x10e   :  { %1577 = vmatprep.subr.mxu0 %v4345_v9  ;;  %v1738_v17 = vsub.f32 %v4336_v2, %v5594_v10  ;;  %v4433_v14 = vand.u32 4294901760, %v1510_v20  ;;  %v4443_v48 = vand.u32 4294901760, %v1509_v51  ;;  %v1787_v27 = vand.u32 4294901760, %v1786_v57 }
 0x10f   :  { %v5592_v16 = vand.u32 4294901760, %v4343_v52  ;;  %v5591_v63 = vand.u32 4294901760, %v4351_v11  ;;  %1579 = vmatpush1.msra.mxu0 %v4353_v15  ;;  %1734 = vmatprep.subr.mxu1 %v1733_v55  ;;  %6190 = vst [vmem:[#allocation89_spill] sm:$0xff] %v4431_v0  ;;  %v4453_v55 = vand.u32 4294901760, %v1508_v41  ;;  %v4556_v10 = vand.u32 4294901760, %v1499_v61 }
 0x110   :  { %1482 = vmatmul.mubr.f32.gmra.mxu1 %v4043_v53  ;;  %v4363_v53 = vand.u32 4294901760, %v1517_v42  ;;  %v1739_v44 = vand.u32 4294901760, %v1738_v17  ;;  %v5580_v17 = vand.u32 4294901760, %v4431_v0  ;;  %v4451_v60 = vsub.f32 %v1510_v20, %v4433_v14 }
 0x111   :  { %v1744_v58 = vsub.f32 %v4343_v52, %v5592_v16  ;;  %v1750_v36 = vsub.f32 %v4351_v11, %v5591_v63  ;;  %v4461_v25 = vsub.f32 %v1509_v51, %v4443_v48  ;;  %v4469_v40 = vsub.f32 %v1508_v41, %v4453_v55  ;;  %v1497_v16 = vld [vmem:[#allocation7 + $0x28] sm:$0xff]  ;;  %6208 = vst [vmem:[#allocation15_spill] sm:$0xff] %v4556_v10 }
 0x112   :  { %v4381_v24 = vsub.f32 %v1517_v42, %v4363_v53  ;;  %1581 = vmatprep.subr.mxu0 %v4363_v53  ;;  %1740 = vmatpush1.msra.mxu1 %v1739_v44  ;;  %v4441_v42 = vsub.f32 %v1511_v59, %v4426_v1  ;;  %6192 = vst [vmem:[#allocation65_spill] sm:$0xff] %v4451_v60  ;;  %v1505_v59 = vld [vmem:[#allocation7 + $0x68] sm:$0xff] }
 0x113   :  { %1583 = vmatpush1.msra.mxu0 %v4373_v22  ;;  %v1745_v31 = vand.u32 4294901760, %v1744_v58  ;;  %v1751_v28 = vand.u32 4294901760, %v1750_v36  ;;  %v1507_v58 = vld [vmem:[#allocation7 + $0x78] sm:$0xff]  ;;  %v1792_v44 = vsub.f32 %v4424_v47, %v5581_v8  ;;  %6193 = vst [vmem:[#allocation67_spill] sm:$0xff] %v4461_v25  ;;  %v1798_v39 = vsub.f32 %v4431_v0, %v5580_v17  ;;  %6194 = vst [vmem:[#allocation69_spill] sm:$0xff] %v4469_v40 }
 0x114   :  { %v5587_v35 = vand.u32 4294901760, %v4381_v24  ;;  %1585 = vmatprep.subr.mxu0 %v4396_v56  ;;  %6191 = vst [vmem:[#allocation59_spill] sm:$0xff] %v4441_v42  ;;  %v5578_v36 = vand.u32 4294901760, %v4441_v42  ;;  %v5579_v20 = vand.u32 4294901760, %v4461_v25  ;;  %v5582_v41 = vand.u32 4294901760, %v4469_v40 }
 0x115   :  { %1746 = vmatprep.subr.mxu1 %v1745_v31  ;;  %1587 = vmatpush1.msra.mxu0 %v4402_v45  ;;  %v1506_v31 = vld [vmem:[#allocation7 + $0x70] sm:$0xff]  ;;  %v1799_v51 = vand.u32 4294901760, %v1798_v39 }
 0x116   :  { %v1768_v3 = vsub.f32 %v4381_v24, %v5587_v35  ;;  %1752 = vmatpush1.msra.mxu1 %v1751_v28  ;;  %1589 = vmatprep.subr.mxu0 %v4410_v50  ;;  %v5577_v28 = vand.u32 4294901760, %v4451_v60  ;;  %v1502_v39 = vld [vmem:[#allocation7 + $0x50] sm:$0xff] }
 0x117   :  { %1758 = vmatprep.subr.mxu1 %v1757_v21  ;;  %1591 = vmatpush1.msra.mxu0 %v4419_v12  ;;  %v1793_v21 = vand.u32 4294901760, %v1792_v44  ;;  %v4513_v29 = vand.u32 4294901760, %v1502_v39 }
 0x118   :  { %v1769_v13 = vand.u32 4294901760, %v1768_v3  ;;  %1764 = vmatpush1.msra.mxu1 %v1763_v7  ;;  %1593 = vmatprep.subr.mxu0 %v4426_v1  ;;  %v1804_v3 = vsub.f32 %v4441_v42, %v5578_v36  ;;  %v4476_v7 = vand.u32 4294901760, %v1507_v58  ;;  %v1822_v36 = vsub.f32 %v4469_v40, %v5582_v41 }
 0x119   :  { %1595 = vmatpush1.msra.mxu0 %v4433_v14  ;;  %6201 = vst [vmem:[#allocation92_spill] sm:$0xff] %v4513_v29 }
 0x11a   :  { %1770 = vmatprep.subr.mxu1 %v1769_v13  ;;  %1597 = vmatprep.subr.mxu0 %v4443_v48  ;;  %v1810_v13 = vsub.f32 %v4451_v60, %v5577_v28  ;;  %v1805_v57 = vand.u32 4294901760, %v1804_v3  ;;  %v4488_v44 = vsub.f32 %v1507_v58, %v4476_v7  ;;  %v4499_v3 = vand.u32 4294901760, %v1504_v49 }
 0x11b   :  { %1776 = vmatpush1.msra.mxu1 %v1775_v26  ;;  %1599 = vmatpush1.msra.mxu0 %v4453_v55  ;;  %v4482_v26 = vand.u32 4294901760, %v1506_v31 }
 0x11c   :  { %1782 = vmatprep.subr.mxu1 %v1781_v62  ;;  %v1816_v62 = vsub.f32 %v4461_v25, %v5579_v20  ;;  %6195 = vst [vmem:[#allocation71_spill] sm:$0xff] %v4488_v44  ;;  %1601 = vmatprep.subr.mxu0 %v4476_v7  ;;  %v1811_v28 = vand.u32 4294901760, %v1810_v13  ;;  %6197 = vst [vmem:[#allocation75_spill] sm:$0xff] %v4499_v3  ;;  %v1501_v20 = vld [vmem:[#allocation7 + $0x48] sm:$0xff]  ;;  %v5585_v17 = vand.u32 4294901760, %v4488_v44  ;;  %v1500_v13 = vld [vmem:[#allocation7 + $0x40] sm:$0xff] }
 0x11d   :  { %1788 = vmatpush1.msra.mxu1 %v1787_v27  ;;  %v4490_v27 = vand.u32 4294901760, %v1505_v59  ;;  %1603 = vmatpush1.msra.mxu0 %v4482_v26  ;;  %v4511_v34 = vsub.f32 %v1504_v49, %v4499_v3 }
 0x11e   :  { %1794 = vmatprep.subr.mxu1 %v1793_v21  ;;  %v4497_v21 = vsub.f32 %v1506_v31, %v4482_v26  ;;  %v1817_v58 = vand.u32 4294901760, %v1816_v62  ;;  %v1823_v31 = vand.u32 4294901760, %v1822_v36  ;;  %v4523_v36 = vand.u32 4294901760, %v1501_v20 }
 0x11f   :  { %1800 = vmatpush1.msra.mxu1 %v1799_v51  ;;  %v4504_v8 = vsub.f32 %v1505_v59, %v4490_v27  ;;  %v4506_v51 = vand.u32 4294901760, %v1503_v4  ;;  %1605 = vmatprep.subr.mxu0 %v4490_v27  ;;  %6200 = vst [vmem:[#allocation90_spill] sm:$0xff] %v4511_v34  ;;  %v1828_v59 = vsub.f32 %v4488_v44, %v5585_v17  ;;  %v5596_v49 = vand.u32 4294901760, %v4511_v34 }
 0x120   :  { %6196 = vst [vmem:[#allocation73_spill] sm:$0xff] %v4497_v21  ;;  %1806 = vmatprep.subr.mxu1 %v1805_v57  ;;  %v5589_v41 = vand.u32 4294901760, %v4497_v21  ;;  %1607 = vmatpush1.msra.mxu0 %v4499_v3  ;;  %6203 = vst [vmem:[#allocation30_spill] sm:$0xff] %v4523_v36  ;;  %v4533_v17 = vand.u32 4294901760, %v1500_v13  ;;  %v4541_v23 = vsub.f32 %v1501_v20, %v4523_v36 }
 0x121   :  { %6198 = vst [vmem:[#allocation77_spill] sm:$0xff] %v4504_v8  ;;  %6199 = vst [vmem:[#allocation79_spill] sm:$0xff] %v4506_v51  ;;  %1812 = vmatpush1.msra.mxu1 %v1811_v28  ;;  %v5593_v57 = vand.u32 4294901760, %v4504_v8  ;;  %v4521_v62 = vsub.f32 %v1503_v4, %v4506_v51  ;;  %1609 = vmatprep.subr.mxu0 %v4506_v51  ;;  %v1829_v4 = vand.u32 4294901760, %v1828_v59 }
 0x122   :  { %1818 = vmatprep.subr.mxu1 %v1817_v58  ;;  %v1834_v28 = vsub.f32 %v4497_v21, %v5589_v41  ;;  %v4531_v58 = vsub.f32 %v1502_v39, %v4513_v29  ;;  %6205 = vst [vmem:[#allocation32_spill] sm:$0xff] %v4533_v17  ;;  %1611 = vmatpush1.msra.mxu0 %v4513_v29  ;;  %6206 = vst [vmem:[#allocation14_spill] sm:$0xff] %v4541_v23  ;;  %v1498_v41 = vld [vmem:[#allocation7 + $0x30] sm:$0xff] }
 0x123   :  { %6202 = vst [vmem:[#allocation94_spill] sm:$0xff] %v4521_v62  ;;  %1824 = vmatpush1.msra.mxu1 %v1823_v31  ;;  %v1840_v35 = vsub.f32 %v4504_v8, %v5593_v57  ;;  %v5601_v31 = vand.u32 4294901760, %v4521_v62  ;;  %1613 = vmatprep.subr.mxu0 %v4523_v36  ;;  %v1846_v32 = vsub.f32 %v4511_v34, %v5596_v49  ;;  %v4562_v8 = vand.u32 4294901760, %v1498_v41 }
 0x124   :  { %6204 = vst [vmem:[#allocation13_spill] sm:$0xff] %v4531_v58  ;;  %v1835_v39 = vand.u32 4294901760, %v1834_v28  ;;  %v5604_v63 = vand.u32 4294901760, %v4531_v58  ;;  %v4549_v59 = vsub.f32 %v1500_v13, %v4533_v17  ;;  %1615 = vmatpush1.msra.mxu0 %v4533_v17  ;;  %1830 = vmatprep.subr.mxu1 %v1829_v4  ;;  %v5607_v28 = vand.u32 4294901760, %v4541_v23 }
 0x125   :  { %v1841_v57 = vand.u32 4294901760, %v1840_v35  ;;  %v1852_v20 = vsub.f32 %v4521_v62, %v5601_v31  ;;  %v1847_v49 = vand.u32 4294901760, %v1846_v32  ;;  %6209 = vst [vmem:[#allocation36_spill] sm:$0xff] %v4562_v8  ;;  %v1495_v35 = vld [vmem:[#allocation7 + $0x18] sm:$0xff]  ;;  %v4568_v62 = vsub.f32 %v1499_v61, %v4556_v10  ;;  %v1494_v32 = vld [vmem:[#allocation7 + $0x10] sm:$0xff]  ;;  %1617 = vmatprep.subr.mxu0 %v4556_v10  ;;  %v1540_v10 = vld [vmem:[#allocation7 + $0x180] sm:$0xff] }
 0x126   :  { %6207 = vst [vmem:[#allocation34_spill] sm:$0xff] %v4549_v59  ;;  %1836 = vmatpush1.msra.mxu1 %v1835_v39  ;;  %v1858_v13 = vsub.f32 %v4531_v58, %v5604_v63  ;;  %v5612_v34 = vand.u32 4294901760, %v4549_v59  ;;  %v1864_v31 = vsub.f32 %v4541_v23, %v5607_v28  ;;  %v4570_v39 = vand.u32 4294901760, %v1497_v16  ;;  %v1493_v28 = vld [vmem:[#allocation7 + $0x8] sm:$0xff]  ;;  %1619 = vmatpush1.msra.mxu0 %v4562_v8 }
 0x127   :  { %1842 = vmatprep.subr.mxu1 %v1841_v57  ;;  %v1853_v4 = vand.u32 4294901760, %v1852_v20  ;;  %6210 = vst [vmem:[#allocation16_spill] sm:$0xff] %v4568_v62  ;;  %v4577_v57 = vsub.f32 %v1498_v41, %v4562_v8  ;;  %v4579_v20 = vand.u32 4294901760, %v1496_v5  ;;  %v5617_v23 = vand.u32 4294901760, %v4568_v62 }
 0x128   :  { %6211 = vst [vmem:[#allocation38_spill] sm:$0xff] %v4570_v39  ;;  %1848 = vmatpush1.msra.mxu1 %v1847_v49  ;;  %v1859_v63 = vand.u32 4294901760, %v1858_v13  ;;  %v1870_v58 = vsub.f32 %v4549_v59, %v5612_v34  ;;  %v1865_v61 = vand.u32 4294901760, %v1864_v31  ;;  %v4584_v21 = vsub.f32 %v1497_v16, %v4570_v39  ;;  %v1492_v13 = vld [vmem:[#allocation7] sm:$0xff]  ;;  %1621 = vmatprep.subr.mxu0 %v4570_v39  ;;  %v1555_v31 = vld [vmem:[#allocation7 + $0x1f8] sm:$0xff]  ;;  %v1553_v39 = vld [vmem:[#allocation7 + $0x1e8] sm:$0xff] }
 0x129   :  { %6212 = vst [vmem:[#allocation17_spill] sm:$0xff] %v4577_v57  ;;  %6213 = vst [vmem:[#allocation40_spill] sm:$0xff] %v4579_v20  ;;  %1854 = vmatprep.subr.mxu1 %v1853_v4  ;;  %v4586_v49 = vand.u32 4294901760, %v1495_v35  ;;  %v5624_v34 = vand.u32 4294901760, %v4577_v57  ;;  %v4591_v59 = vsub.f32 %v1496_v5, %v4579_v20  ;;  %v4593_v8 = vand.u32 4294901760, %v1494_v32  ;;  %1623 = vmatpush1.msra.mxu0 %v4579_v20 }
 0x12a   :  { %6214 = vst [vmem:[#allocation18_spill] sm:$0xff] %v4584_v21  ;;  %1860 = vmatpush1.msra.mxu1 %v1859_v63  ;;  %v1871_v41 = vand.u32 4294901760, %v1870_v58  ;;  %v1876_v16 = vsub.f32 %v4568_v62, %v5617_v23  ;;  %v4603_v63 = vand.u32 4294901760, %v1493_v28  ;;  %v4613_v23 = vand.u32 4294901760, %v1492_v13 }
 0x12b   :  { %6215 = vst [vmem:[#allocation42_spill] sm:$0xff] %v4586_v49  ;;  %6216 = vst [vmem:[#allocation19_spill] sm:$0xff] %v4591_v59  ;;  %1866 = vmatprep.subr.mxu1 %v1865_v61  ;;  %v4601_v4 = vsub.f32 %v1495_v35, %v4586_v49  ;;  %1625 = vmatprep.subr.mxu0 %v4586_v49  ;;  %v1882_v5 = vsub.f32 %v4577_v57, %v5624_v34  ;;  %v5635_v58 = vand.u32 4294901760, %v4591_v59  ;;  %v1554_v34 = vld [vmem:[#allocation7 + $0x1f0] sm:$0xff] }
 0x12c   :  { %6217 = vst [vmem:[#allocation44_spill] sm:$0xff] %v4593_v8  ;;  %6219 = vst [vmem:[#allocation46_spill] sm:$0xff] %v4603_v63  ;;  %1872 = vmatpush1.msra.mxu1 %v1871_v41  ;;  %v4611_v61 = vsub.f32 %v1494_v32, %v4593_v8  ;;  %1627 = vmatpush1.msra.mxu0 %v4593_v8  ;;  %v1877_v35 = vand.u32 4294901760, %v1876_v16  ;;  %v6222_v62 = vand.u32 4294901760, %v4584_v21 }
 0x12d   :  { %6218 = vst [vmem:[#allocation20_spill] sm:$0xff] %v4601_v4  ;;  %6221 = vst [vmem:[#allocation48_spill] sm:$0xff] %v4613_v23  ;;  %v5640_v41 = vand.u32 4294901760, %v4601_v4  ;;  %v4621_v20 = vsub.f32 %v1493_v28, %v4603_v63  ;;  %1629 = vmatprep.subr.mxu0 %v4603_v63  ;;  %v1883_v32 = vand.u32 4294901760, %v1882_v5  ;;  %v1894_v57 = vsub.f32 %v4591_v59, %v5635_v58  ;;  %v1552_v63 = vld [vmem:[#allocation7 + $0x1e0] sm:$0xff] }
 0x12e   :  { %6220 = vst [vmem:[#allocation21_spill] sm:$0xff] %v4611_v61  ;;  %v1888_v49 = vsub.f32 %v4584_v21, %v6222_v62  ;;  %v5643_v8 = vand.u32 4294901760, %v4611_v61  ;;  %v4629_v16 = vsub.f32 %v1492_v13, %v4613_v23  ;;  %1631 = vmatpush1.msra.mxu0 %v4613_v23  ;;  %1878 = vmatprep.subr.mxu1 %v1877_v35  ;;  %v4636_v21 = vand.u32 4294901760, %v1555_v31 }
 0x12f   :  { %6223 = vst [vmem:[#allocation22_spill] sm:$0xff] %v4621_v20  ;;  %v1900_v28 = vsub.f32 %v4601_v4, %v5640_v41  ;;  %v5646_v5 = vand.u32 4294901760, %v4621_v20  ;;  %1884 = vmatpush1.msra.mxu1 %v1883_v32  ;;  %v1895_v58 = vand.u32 4294901760, %v1894_v57  ;;  %v4642_v23 = vand.u32 4294901760, %v1554_v34  ;;  %v1550_v57 = vld [vmem:[#allocation7 + $0x1d0] sm:$0xff] }
 0x130   :  { %6224 = vst [vmem:[#allocation50_spill] sm:$0xff] %v4629_v16  ;;  %v1889_v62 = vand.u32 4294901760, %v1888_v49  ;;  %6225 = vst [vmem:[#allocation23_spill] sm:$0xff] %v4636_v21  ;;  %v1906_v13 = vsub.f32 %v4611_v61, %v5643_v8  ;;  %v5651_v59 = vand.u32 4294901760, %v4629_v16  ;;  %v1551_v49 = vld [vmem:[#allocation7 + $0x1d8] sm:$0xff]  ;;  %v4648_v4 = vsub.f32 %v1555_v31, %v4636_v21  ;;  %1633 = vmatprep.subr.mxu0 %v4636_v21 }
 0x131   :  { %6226 = vst [vmem:[#allocation52_spill] sm:$0xff] %v4642_v23  ;;  %v1901_v35 = vand.u32 4294901760, %v1900_v28  ;;  %v1912_v41 = vsub.f32 %v4621_v20, %v5646_v5  ;;  %v4650_v32 = vand.u32 4294901760, %v1553_v39  ;;  %v4659_v28 = vand.u32 4294901760, %v1552_v63  ;;  %v1549_v5 = vld [vmem:[#allocation7 + $0x1c8] sm:$0xff]  ;;  %1635 = vmatpush2.msra.mxu0 %v4642_v23 }
 0x132   :  { %1890 = vmatprep.subr.mxu1 %v1889_v62  ;;  %6227 = vst [vmem:[#allocation24_spill] sm:$0xff] %v4648_v4  ;;  %v1907_v8 = vand.u32 4294901760, %v1906_v13  ;;  %v1918_v61 = vsub.f32 %v4629_v16, %v5651_v59  ;;  %v4657_v62 = vsub.f32 %v1554_v34, %v4642_v23  ;;  %v5656_v20 = vand.u32 4294901760, %v4648_v4  ;;  %v1548_v13 = vld [vmem:[#allocation7 + $0x1c0] sm:$0xff] }
 0x133   :  { %6228 = vst [vmem:[#allocation54_spill] sm:$0xff] %v4650_v32  ;;  %1896 = vmatpush1.msra.mxu1 %v1895_v58  ;;  %6230 = vst [vmem:[#allocation56_spill] sm:$0xff] %v4659_v28  ;;  %v1913_v31 = vand.u32 4294901760, %v1912_v41  ;;  %v4664_v21 = vsub.f32 %v1553_v39, %v4650_v32  ;;  %v4666_v58 = vand.u32 4294901760, %v1551_v49  ;;  %1637 = vmatprep.subr.mxu0 %v4650_v32  ;;  %v4673_v23 = vand.u32 4294901760, %v1550_v57  ;;  %v1547_v41 = vld [vmem:[#allocation7 + $0x1b8] sm:$0xff] }
 0x134   :  { %6229 = vst [vmem:[#allocation25_spill] sm:$0xff] %v4657_v62  ;;  %1902 = vmatprep.subr.mxu1 %v1901_v35  ;;  %v1919_v34 = vand.u32 4294901760, %v1918_v61  ;;  %v5663_v59 = vand.u32 4294901760, %v4657_v62  ;;  %v4671_v16 = vsub.f32 %v1552_v63, %v4659_v28  ;;  %1639 = vmatpush2.msra.mxu0 %v4659_v28  ;;  %v1924_v39 = vsub.f32 %v4648_v4, %v5656_v20 }
 0x135   :  { %6231 = vst [vmem:[#allocation26_spill] sm:$0xff] %v4664_v21  ;;  %6232 = vst [vmem:[#allocation58_spill] sm:$0xff] %v4666_v58  ;;  %1908 = vmatpush1.msra.mxu1 %v1907_v8  ;;  %v4681_v35 = vsub.f32 %v1551_v49, %v4666_v58  ;;  %v4683_v8 = vand.u32 4294901760, %v1549_v5  ;;  %1641 = vmatprep.subr.mxu0 %v4666_v58  ;;  %v4693_v20 = vand.u32 4294901760, %v1548_v13  ;;  %v6239_v4 = vand.u32 4294901760, %v4664_v21 }
 0x136   :  { %6233 = vst [vmem:[#allocation27_spill] sm:$0xff] %v4671_v16  ;;  %6234 = vst [vmem:[#allocation60_spill] sm:$0xff] %v4673_v23  ;;  %1914 = vmatprep.subr.mxu1 %v1913_v31  ;;  %v1930_v63 = vsub.f32 %v4657_v62, %v5663_v59  ;;  %v5672_v61 = vand.u32 4294901760, %v4671_v16  ;;  %v4691_v31 = vsub.f32 %v1550_v57, %v4673_v23  ;;  %1643 = vmatpush2.msra.mxu0 %v4673_v23  ;;  %v1546_v23 = vld [vmem:[#allocation7 + $0x1b0] sm:$0xff] }
 0x137   :  { %6235 = vst [vmem:[#allocation28_spill] sm:$0xff] %v4681_v35  ;;  %6236 = vst [vmem:[#allocation62_spill] sm:$0xff] %v4683_v8  ;;  %1920 = vmatpush1.msra.mxu1 %v1919_v34  ;;  %v1925_v49 = vand.u32 4294901760, %v1924_v39  ;;  %v1936_v58 = vsub.f32 %v4664_v21, %v6239_v4  ;;  %v5677_v34 = vand.u32 4294901760, %v4681_v35  ;;  %v4701_v28 = vsub.f32 %v1549_v5, %v4683_v8 }
 0x138   :  { %6237 = vst [vmem:[#allocation29_spill] sm:$0xff] %v4691_v31  ;;  %6238 = vst [vmem:[#allocation64_spill] sm:$0xff] %v4693_v20  ;;  %1645 = vmatprep.subr.mxu0 %v4683_v8  ;;  %v1931_v59 = vand.u32 4294901760, %v1930_v63  ;;  %v1942_v57 = vsub.f32 %v4671_v16, %v5672_v61  ;;  %v5680_v62 = vand.u32 4294901760, %v4691_v31  ;;  %v4709_v39 = vsub.f32 %v1548_v13, %v4693_v20  ;;  %v1545_v8 = vld [vmem:[#allocation7 + $0x1a8] sm:$0xff] }
 0x139   :  { %6240 = vst [vmem:[#allocation31_spill] sm:$0xff] %v4701_v28  ;;  %1647 = vmatpush2.msra.mxu0 %v4693_v20  ;;  %1926 = vmatprep.subr.mxu1 %v1925_v49  ;;  %v1937_v4 = vand.u32 4294901760, %v1936_v58  ;;  %v1948_v5 = vsub.f32 %v4681_v35, %v5677_v34  ;;  %v5683_v63 = vand.u32 4294901760, %v4701_v28  ;;  %v4716_v21 = vand.u32 4294901760, %v1547_v41  ;;  %v1544_v20 = vld [vmem:[#allocation7 + $0x1a0] sm:$0xff] }
 0x13a   :  { %6241 = vst [vmem:[#allocation66_spill] sm:$0xff] %v4709_v39  ;;  %1932 = vmatpush2.msra.mxu1 %v1931_v59  ;;  %v1943_v61 = vand.u32 4294901760, %v1942_v57  ;;  %v1954_v13 = vsub.f32 %v4691_v31, %v5680_v62  ;;  %v5690_v16 = vand.u32 4294901760, %v4709_v39  ;;  %v4728_v35 = vand.u32 4294901760, %v1546_v23  ;;  %v1543_v59 = vld [vmem:[#allocation7 + $0x198] sm:$0xff]  ;;  %v1542_v57 = vld [vmem:[#allocation7 + $0x190] sm:$0xff] }
 0x13b   :  { %6242 = vst [vmem:[#allocation33_spill] sm:$0xff] %v4716_v21  ;;  %1938 = vmatprep.subr.mxu1 %v1937_v4  ;;  %v1949_v58 = vand.u32 4294901760, %v1948_v5  ;;  %v1960_v49 = vsub.f32 %v4701_v28, %v5683_v63  ;;  %v4726_v34 = vsub.f32 %v1547_v41, %v4716_v21  ;;  %1649 = vmatprep.subr.mxu0 %v4716_v21  ;;  %v4734_v5 = vand.u32 4294901760, %v1545_v8  ;;  %v1541_v31 = vld [vmem:[#allocation7 + $0x188] sm:$0xff] }
 0x13c   :  { %6244 = vst [vmem:[#allocation35_spill] sm:$0xff] %v4728_v35  ;;  %1944 = vmatpush2.msra.mxu1 %v1943_v61  ;;  %v1955_v62 = vand.u32 4294901760, %v1954_v13  ;;  %v1966_v4 = vsub.f32 %v4709_v39, %v5690_v16  ;;  %v4738_v28 = vsub.f32 %v1546_v23, %v4728_v35  ;;  %v4740_v32 = vand.u32 4294901760, %v1544_v20  ;;  %1651 = vmatpush2.msra.mxu0 %v4728_v35 }
 0x13d   :  { %6243 = vst [vmem:[#allocation68_spill] sm:$0xff] %v4726_v34  ;;  %6245 = vst [vmem:[#allocation70_spill] sm:$0xff] %v4734_v5  ;;  %1950 = vmatprep.subr.mxu1 %v1949_v58  ;;  %v1961_v63 = vand.u32 4294901760, %v1960_v49  ;;  %v5695_v41 = vand.u32 4294901760, %v4726_v34  ;;  %v4744_v13 = vsub.f32 %v1545_v8, %v4734_v5  ;;  %v4746_v16 = vand.u32 4294901760, %v1543_v59  ;;  %1653 = vmatprep.subr.mxu0 %v4734_v5 }
 0x13e   :  { %6246 = vst [vmem:[#allocation37_spill] sm:$0xff] %v4738_v28  ;;  %6247 = vst [vmem:[#allocation72_spill] sm:$0xff] %v4740_v32  ;;  %1956 = vmatpush2.msra.mxu1 %v1955_v62  ;;  %v1967_v61 = vand.u32 4294901760, %v1966_v4  ;;  %v4748_v39 = vand.u32 4294901760, %v1542_v57  ;;  %v5700_v58 = vand.u32 4294901760, %v4738_v28  ;;  %v4756_v49 = vsub.f32 %v1544_v20, %v4740_v32  ;;  %1655 = vmatpush2.msra.mxu0 %v4740_v32  ;;  %v1538_v32 = vld [vmem:[#allocation7 + $0x170] sm:$0xff] }
 0x13f   :  { %6248 = vst [vmem:[#allocation39_spill] sm:$0xff] %v4744_v13  ;;  %6249 = vst [vmem:[#allocation74_spill] sm:$0xff] %v4746_v16  ;;  %1962 = vmatprep.subr.mxu1 %v1961_v63  ;;  %v1972_v23 = vsub.f32 %v4726_v34, %v5695_v41  ;;  %v4758_v62 = vand.u32 4294901760, %v1541_v31  ;;  %v5707_v8 = vand.u32 4294901760, %v4744_v13  ;;  %v4763_v4 = vsub.f32 %v1543_v59, %v4746_v16 }
 0x140   :  { %6250 = vst [vmem:[#allocation41_spill] sm:$0xff] %v4748_v39  ;;  %6251 = vst [vmem:[#allocation76_spill] sm:$0xff] %v4756_v49  ;;  %1968 = vmatpush2.msra.mxu1 %v1967_v61  ;;  %v4766_v63 = vsub.f32 %v1542_v57, %v4748_v39  ;;  %v4768_v5 = vand.u32 4294901760, %v1540_v10  ;;  %1657 = vmatprep.subr.mxu0 %v4746_v16  ;;  %v1978_v20 = vsub.f32 %v4738_v28, %v5700_v58 }
 0x141   :  { %6252 = vst [vmem:[#allocation43_spill] sm:$0xff] %v4758_v62  ;;  %6253 = vst [vmem:[#allocation78_spill] sm:$0xff] %v4763_v4  ;;  %v1973_v41 = vand.u32 4294901760, %v1972_v23  ;;  %v5712_v34 = vand.u32 4294901760, %v4756_v49  ;;  %v4776_v61 = vsub.f32 %v1541_v31, %v4758_v62  ;;  %1659 = vmatpush2.msra.mxu0 %v4748_v39  ;;  %v1984_v59 = vsub.f32 %v4744_v13, %v5707_v8  ;;  %v1539_v23 = vld [vmem:[#allocation7 + $0x178] sm:$0xff]  ;;  %v1537_v8 = vld [vmem:[#allocation7 + $0x168] sm:$0xff] }
 0x142   :  { %6254 = vst [vmem:[#allocation45_spill] sm:$0xff] %v4766_v63  ;;  %6255 = vst [vmem:[#allocation80_spill] sm:$0xff] %v4768_v5  ;;  %1661 = vmatprep.subr.mxu0 %v4758_v62  ;;  %v1979_v58 = vand.u32 4294901760, %v1978_v20  ;;  %v4790_v39 = vsub.f32 %v1540_v10, %v4768_v5  ;;  %v6258_v16 = vand.u32 4294901760, %v4763_v4  ;;  %v1536_v62 = vld [vmem:[#allocation7 + $0x160] sm:$0xff]  ;;  %v4803_v35 = vand.u32 4294901760, %v1539_v23 }
 0x143   :  { %6256 = vst [vmem:[#allocation47_spill] sm:$0xff] %v4776_v61  ;;  %1974 = vmatprep.subr.mxu1 %v1973_v41  ;;  %v1990_v31 = vsub.f32 %v4756_v49, %v5712_v34  ;;  %v5725_v28 = vand.u32 4294901760, %v4776_v61  ;;  %1663 = vmatpush2.msra.mxu0 %v4768_v5  ;;  %v1985_v57 = vand.u32 4294901760, %v1984_v59  ;;  %v6259_v41 = vand.u32 4294901760, %v4766_v63  ;;  %v1535_v59 = vld [vmem:[#allocation7 + $0x158] sm:$0xff]  ;;  %v1534_v5 = vld [vmem:[#allocation7 + $0x150] sm:$0xff] }
 0x144   :  { %6257 = vst [vmem:[#allocation82_spill] sm:$0xff] %v4790_v39  ;;  %v1996_v13 = vsub.f32 %v4763_v4, %v6258_v16  ;;  %1980 = vmatpush2.msra.mxu1 %v1979_v58  ;;  %v5728_v49 = vand.u32 4294901760, %v4790_v39  ;;  %6260 = vst [vmem:[#allocation49_spill] sm:$0xff] %v4803_v35  ;;  %v4805_v4 = vand.u32 4294901760, %v1538_v32  ;;  %v4807_v44 = vand.u32 4294901760, %v1537_v8  ;;  %1665 = vmatprep.subr.mxu0 %v4803_v35 }
 0x145   :  { %v2002_v20 = vsub.f32 %v4766_v63, %v6259_v41  ;;  %v1991_v34 = vand.u32 4294901760, %v1990_v31  ;;  %v2008_v10 = vsub.f32 %v4776_v61, %v5725_v28  ;;  %1986 = vmatprep.subr.mxu1 %v1985_v57  ;;  %v1533_v41 = vld [vmem:[#allocation7 + $0x148] sm:$0xff]  ;;  %v4813_v28 = vsub.f32 %v1539_v23, %v4803_v35  ;;  %v1526_v35 = vld [vmem:[#allocation7 + $0x110] sm:$0xff] }
 0x146   :  { %v1997_v21 = vand.u32 4294901760, %v1996_v13  ;;  %6261 = vst [vmem:[#allocation84_spill] sm:$0xff] %v4805_v4  ;;  %6262 = vst [vmem:[#allocation86_spill] sm:$0xff] %v4807_v44  ;;  %v2014_v31 = vsub.f32 %v4790_v39, %v5728_v49  ;;  %v4815_v61 = vand.u32 4294901760, %v1536_v62  ;;  %v4819_v13 = vsub.f32 %v1538_v32, %v4805_v4  ;;  %1667 = vmatpush2.msra.mxu0 %v4805_v4  ;;  %v1529_v4 = vld [vmem:[#allocation7 + $0x128] sm:$0xff] }
 0x147   :  { %v2003_v16 = vand.u32 4294901760, %v2002_v20  ;;  %1992 = vmatpush2.msra.mxu1 %v1991_v34  ;;  %v2009_v58 = vand.u32 4294901760, %v2008_v10  ;;  %6263 = vst [vmem:[#allocation53_spill] sm:$0xff] %v4813_v28  ;;  %v4822_v57 = vsub.f32 %v1537_v8, %v4807_v44  ;;  %v4824_v34 = vand.u32 4294901760, %v1535_v59  ;;  %v1532_v10 = vld [vmem:[#allocation7 + $0x140] sm:$0xff]  ;;  %1669 = vmatprep.subr.mxu0 %v4807_v44 }
 0x148   :  { %6264 = vst [vmem:[#allocation88_spill] sm:$0xff] %v4815_v61  ;;  %1998 = vmatprep.subr.mxu1 %v1997_v21  ;;  %6265 = vst [vmem:[#allocation55_spill] sm:$0xff] %v4819_v13  ;;  %v4826_v20 = vand.u32 4294901760, %v1534_v5  ;;  %v2015_v23 = vand.u32 4294901760, %v2014_v31  ;;  %v5735_v49 = vand.u32 4294901760, %v4813_v28  ;;  %v4831_v39 = vsub.f32 %v1536_v62, %v4815_v61  ;;  %1671 = vmatpush2.msra.mxu0 %v4815_v61  ;;  %v1531_v31 = vld [vmem:[#allocation7 + $0x138] sm:$0xff] }
 0x149   :  { %6266 = vst [vmem:[#allocation57_spill] sm:$0xff] %v4822_v57  ;;  %6267 = vst [vmem:[#allocation91_spill] sm:$0xff] %v4824_v34  ;;  %2004 = vmatpush2.msra.mxu1 %v2003_v16  ;;  %v4833_v21 = vand.u32 4294901760, %v1533_v41  ;;  %v5746_v8 = vand.u32 4294901760, %v4822_v57  ;;  %v4839_v63 = vsub.f32 %v1535_v59, %v4824_v34  ;;  %v4852_v32 = vand.u32 4294901760, %v1532_v10  ;;  %1673 = vmatprep.subr.mxu0 %v4824_v34 }
 0x14a   :  { %6268 = vst [vmem:[#allocation93_spill] sm:$0xff] %v4826_v20  ;;  %6269 = vst [vmem:[#allocation61_spill] sm:$0xff] %v4831_v39  ;;  %2010 = vmatprep.subr.mxu1 %v2009_v58  ;;  %v4842_v16 = vsub.f32 %v1534_v5, %v4826_v20  ;;  %v2020_v62 = vsub.f32 %v4813_v28, %v5735_v49  ;;  %v6275_v59 = vand.u32 4294901760, %v4819_v13  ;;  %1675 = vmatpush2.msra.mxu0 %v4826_v20 }
 0x14b   :  { %6270 = vst [vmem:[#allocation95_spill] sm:$0xff] %v4833_v21  ;;  %6271 = vst [vmem:[#allocation63_spill] sm:$0xff] %v4839_v63  ;;  %2016 = vmatpush2.msra.mxu1 %v2015_v23  ;;  %v4850_v58 = vsub.f32 %v1533_v41, %v4833_v21  ;;  %v2032_v23 = vsub.f32 %v4822_v57, %v5746_v8  ;;  %v6276_v28 = vand.u32 4294901760, %v4831_v39  ;;  %1677 = vmatprep.subr.mxu0 %v4833_v21  ;;  %v1527_v21 = vld [vmem:[#allocation7 + $0x118] sm:$0xff] }
 0x14c   :  { %6272 = vst [vmem:[#allocation96_spill] sm:$0xff] %v4842_v16  ;;  %6274 = vst [vmem:[#allocation100_spill] sm:$0xff] %v4852_v32  ;;  %v2026_v5 = vsub.f32 %v4819_v13, %v6275_v59  ;;  %v2021_v41 = vand.u32 4294901760, %v2020_v62  ;;  %v4869_v59 = vsub.f32 %v1532_v10, %v4852_v32  ;;  %v1530_v13 = vld [vmem:[#allocation7 + $0x130] sm:$0xff]  ;;  %v6278_v49 = vand.u32 4294901760, %v4839_v63  ;;  %1679 = vmatpush2.msra.mxu0 %v4852_v32 }
 0x14d   :  { %6273 = vst [vmem:[#allocation97_spill] sm:$0xff] %v4850_v58  ;;  %v2038_v34 = vsub.f32 %v4831_v39, %v6276_v28  ;;  %v5763_v44 = vand.u32 4294901760, %v4850_v58  ;;  %v2033_v61 = vand.u32 4294901760, %v2032_v23  ;;  %v6279_v62 = vand.u32 4294901760, %v4842_v16  ;;  %v1528_v28 = vld [vmem:[#allocation7 + $0x120] sm:$0xff] }
 0x14e   :  { %6277 = vst [vmem:[#allocation81_spill] sm:$0xff] %v4869_v59  ;;  %v2027_v8 = vand.u32 4294901760, %v2026_v5  ;;  %v2044_v57 = vsub.f32 %v4839_v63, %v6278_v49  ;;  %2022 = vmatprep.subr.mxu1 %v2021_v41  ;;  %v5766_v5 = vand.u32 4294901760, %v4869_v59  ;;  %v4883_v23 = vand.u32 4294901760, %v1531_v31 }
 0x14f   :  { %v2050_v20 = vsub.f32 %v4842_v16, %v6279_v62  ;;  %v2039_v10 = vand.u32 4294901760, %v2038_v34  ;;  %v2056_v39 = vsub.f32 %v4850_v58, %v5763_v44  ;;  %v4885_v17 = vand.u32 4294901760, %v1530_v13  ;;  %v1525_v16 = vld [vmem:[#allocation7 + $0x108] sm:$0xff] }
 0x150   :  { %6280 = vst [vmem:[#allocation83_spill] sm:$0xff] %v4883_v23  ;;  %2028 = vmatpush2.msra.mxu1 %v2027_v8  ;;  %v2045_v49 = vand.u32 4294901760, %v2044_v57  ;;  %v4887_v62 = vand.u32 4294901760, %v1529_v4  ;;  %v2062_v41 = vsub.f32 %v4869_v59, %v5766_v5  ;;  %v4893_v44 = vsub.f32 %v1531_v31, %v4883_v23  ;;  %1681 = vmatprep.subr.mxu0 %v4883_v23  ;;  %v1524_v8 = vld [vmem:[#allocation7 + $0x100] sm:$0xff] }
 0x151   :  { %v2051_v63 = vand.u32 4294901760, %v2050_v20  ;;  %6281 = vst [vmem:[#allocation101_spill] sm:$0xff] %v4885_v17  ;;  %2034 = vmatprep.subr.mxu1 %v2033_v61  ;;  %v2057_v34 = vand.u32 4294901760, %v2056_v39  ;;  %v4895_v58 = vand.u32 4294901760, %v1528_v28  ;;  %v4899_v57 = vsub.f32 %v1530_v13, %v4885_v17  ;;  %1683 = vmatpush2.msra.mxu0 %v4885_v17 }
 0x152   :  { %6282 = vst [vmem:[#allocation98_spill] sm:$0xff] %v4887_v62  ;;  %6283 = vst [vmem:[#allocation85_spill] sm:$0xff] %v4893_v44  ;;  %2040 = vmatpush2.msra.mxu1 %v2039_v10  ;;  %v4902_v20 = vsub.f32 %v1529_v4, %v4887_v62  ;;  %v4904_v61 = vand.u32 4294901760, %v1527_v21  ;;  %v4906_v39 = vand.u32 4294901760, %v1526_v35  ;;  %v2063_v31 = vand.u32 4294901760, %v2062_v41  ;;  %1685 = vmatprep.subr.mxu0 %v4887_v62 }
 0x153   :  { %6284 = vst [vmem:[#allocation99_spill] sm:$0xff] %v4895_v58  ;;  %6285 = vst [vmem:[#allocation87_spill] sm:$0xff] %v4899_v57  ;;  %2046 = vmatprep.subr.mxu1 %v2045_v49  ;;  %v5771_v5 = vand.u32 4294901760, %v4893_v44  ;;  %v4911_v59 = vsub.f32 %v1528_v28, %v4895_v58  ;;  %v4913_v10 = vand.u32 4294901760, %v1525_v16  ;;  %1687 = vmatpush2.msra.mxu0 %v4895_v58  ;;  %v4932_v4 = vand.u32 4294901760, %v1524_v8 }
 0x154   :  { %6286 = vst [vmem:[#allocation102_spill] sm:$0xff] %v4902_v20  ;;  %6287 = vst [vmem:[#allocation103_spill] sm:$0xff] %v4904_v61  ;;  %2052 = vmatpush2.msra.mxu1 %v2051_v63  ;;  %v5778_v13 = vand.u32 4294901760, %v4902_v20  ;;  %v4919_v23 = vsub.f32 %v1527_v21, %v4904_v61  ;;  %v4922_v49 = vsub.f32 %v1526_v35, %v4906_v39  ;;  %1689 = vmatprep.subr.mxu0 %v4904_v61 }
 0x155   :  { %6288 = vst [vmem:[#allocation104_spill] sm:$0xff] %v4906_v39  ;;  %6289 = vst [vmem:[#allocation105_spill] sm:$0xff] %v4911_v59  ;;  %2058 = vmatprep.subr.mxu1 %v2057_v34  ;;  %v2068_v28 = vsub.f32 %v4893_v44, %v5771_v5  ;;  %v4930_v63 = vsub.f32 %v1525_v16, %v4913_v10  ;;  %v6295_v35 = vand.u32 4294901760, %v4899_v57  ;;  %1691 = vmatpush2.msra.mxu0 %v4906_v39 }
 0x156   :  { %6290 = vst [vmem:[#allocation106_spill] sm:$0xff] %v4913_v10  ;;  %6291 = vst [vmem:[#allocation107_spill] sm:$0xff] %v4919_v23  ;;  %2064 = vmatpush2.msra.mxu1 %v2063_v31  ;;  %v2080_v34 = vsub.f32 %v4902_v20, %v5778_v13  ;;  %v5783_v5 = vand.u32 4294901760, %v4919_v23  ;;  %v6296_v44 = vand.u32 4294901760, %v4911_v59  ;;  %v4949_v58 = vsub.f32 %v1524_v8, %v4932_v4 }
 0x157   :  { %6292 = vst [vmem:[#allocation108_spill] sm:$0xff] %v4922_v49  ;;  %6293 = vst [vmem:[#allocation109_spill] sm:$0xff] %v4930_v63  ;;  %v2074_v21 = vsub.f32 %v4899_v57, %v6295_v35  ;;  %v2069_v16 = vand.u32 4294901760, %v2068_v28  ;;  %v5784_v31 = vand.u32 4294901760, %v4930_v63  ;;  %1693 = vmatprep.subr.mxu0 %v4913_v10  ;;  %v6298_v20 = vand.u32 4294901760, %v4922_v49 }
 0x158   :  { %6294 = vst [vmem:[#allocation110_spill] sm:$0xff] %v4932_v4  ;;  %v2086_v61 = vsub.f32 %v4911_v59, %v6296_v44  ;;  %6297 = vst [vmem:[#allocation111_spill] sm:$0xff] %v4949_v58  ;;  %v2081_v13 = vand.u32 4294901760, %v2080_v34  ;;  %v2092_v41 = vsub.f32 %v4919_v23, %v5783_v5  ;;  %1695 = vmatpush2.msra.mxu0 %v4932_v4  ;;  %v5790_v59 = vand.u32 4294901760, %v4949_v58 }
 0x159   :  { %v2075_v35 = vand.u32 4294901760, %v2074_v21  ;;  %v2098_v28 = vsub.f32 %v4922_v49, %v6298_v20  ;;  %2070 = vmatprep.subr.mxu1 %v2069_v16  ;;  %v2104_v8 = vsub.f32 %v4930_v63, %v5784_v31  ;;  %2132 = vmatprep.subr.mxu0 %v4330_v43  ;;  %v282_v16 = vpop.f32.mrf.mxu0 }
 0x15a   :  { %v2087_v44 = vand.u32 4294901760, %v2086_v61  ;;  %v2093_v21 = vand.u32 4294901760, %v2092_v41  ;;  %v2110_v20 = vsub.f32 %v4949_v58, %v5790_v59  ;;  %v132_v41 = vlaneseq }
 0x15b   :  { %2076 = vmatpush2.msra.mxu1 %v2075_v35  ;;  %v2099_v34 = vand.u32 4294901760, %v2098_v28  ;;  %v2105_v5 = vand.u32 4294901760, %v2104_v8  ;;  %v284_v31 = vpop.f32.mrf.mxu0  ;;  %v691_v35 = vpop.f32.mrf.mxu1 }
 0x15c   :  { %2082 = vmatprep.subr.mxu1 %v2081_v13  ;;  %v2111_v61 = vand.u32 4294901760, %v2110_v20  ;;  %v4968_v8 = vshrl.u32 %v132_v41, 7 }
 0x15d   :  { %2088 = vmatpush2.msra.mxu1 %v2087_v44  ;;  %v693_v13 = vpop.f32.mrf.mxu1 }
 0x15e   :  { %2094 = vmatprep.subr.mxu1 %v2093_v21  ;;  %6299 = vst [vmem:[#allocation112_spill] sm:$0xff] %v4968_v8  ;;  %v5820_v44 = vsub.s32 0, %v4968_v8  ;;  %v5829_v20 = vsub.s32 1, %v4968_v8 }
 0x15f   :  { %2100 = vmatpush2.msra.mxu1 %v2099_v34 }
 0x160   :  { %2106 = vmatprep.subr.mxu1 %v2105_v5  ;;  %v130_v5 = vld [vmem:[%s5363_s2] sm:$0x3] }
 0x161   :  { %2112 = vmatpush2.msra.mxu1 %v2111_v61  ;;  %v135_v61 = vrot.slane %v130_v5, %v5820_v44  ;;  %v139_v41 = vrot.slane %v130_v5, %v5829_v20 }
 0x162   :  { %2344 = vmatprep.subr.mxu1 %v4323_v37 }
 0x163   :  { %v283_v23 = vadd.f32 %v282_v16, %v135_v61  ;;  %v285_v4 = vadd.f32 %v284_v31, %v139_v41 }
 0x165   :  { %v692_v62 = vadd.f32 %v691_v35, %v283_v23  ;;  %v694_v36 = vadd.f32 %v693_v13, %v285_v4 }
 0x179   :  { %v298_v43 = vpop.f32.mrf.mxu0 }
 0x17a   :  { %v299_v10 = vadd.f32 %v298_v43, %v135_v61 }
 0x17b   :  { %v300_v28 = vpop.f32.mrf.mxu0 }
 0x17c   :  { %v301_v17 = vadd.f32 %v300_v28, %v139_v41 }
 0x17e   :  { %v902_v63 = vpop.f32.mrf.mxu0 }
 0x17f   :  { %v903_v25 = vadd.f32 %v902_v63, %v692_v62 }
 0x180   :  { %v904_v21 = vpop.f32.mrf.mxu0 }
 0x181   :  { %v905_v60 = vadd.f32 %v904_v21, %v694_v36 }
 0x182   :  { %v699_v49 = vpop.f32.mrf.mxu1 }
 0x183   :  { %v700_v29 = vadd.f32 %v699_v49, %v299_v10 }
 0x184   :  { %v701_v34 = vpop.f32.mrf.mxu1 }
 0x185   :  { %v912_v59 = vpop.f32.mrf.mxu0  ;;  %v702_v44 = vadd.f32 %v701_v34, %v301_v17 }
 0x186   :  { %v913_v8 = vadd.f32 %v912_v59, %v700_v29 }
 0x187   :  { %v914_v57 = vpop.f32.mrf.mxu0 }
 0x188   :  { %v915_v0 = vadd.f32 %v914_v57, %v702_v44 }
 0x189   :  { %v1053_v58 = vpop.f32.mrf.mxu1 }
 0x18a   :  { %v1054_v51 = vadd.f32 %v1053_v58, %v903_v25 }
 0x18b   :  { %v1055_v37 = vpop.f32.mrf.mxu1 }
 0x18c   :  { %v1056_v5 = vadd.f32 %v1055_v37, %v905_v60 }
 0x18f   :  { %v1065_v32 = vpop.f32.mrf.mxu1 }
 0x190   :  { %v1066_v31 = vadd.f32 %v1065_v32, %v913_v8 }
 0x191   :  { %v1067_v42 = vpop.f32.mrf.mxu1 }
 0x192   :  { %v1068_v28 = vadd.f32 %v1067_v42, %v915_v0 }
 0x1c3   :  { %v1330_v39 = vpop.f32.mrf.mxu0 }
 0x1c4   :  { %v1331_v16 = vadd.f32 %v1330_v39, %v1054_v51 }
 0x1c5   :  { %v1332_v40 = vpop.f32.mrf.mxu0 }
 0x1c6   :  { %v1333_v43 = vadd.f32 %v1332_v40, %v1056_v5 }
 0x1c7   :  { %v1338_v3 = vpop.f32.mrf.mxu0 }
 0x1c8   :  { %v1339_v41 = vadd.f32 %v1338_v3, %v1066_v31 }
 0x1c9   :  { %v1340_v23 = vpop.f32.mrf.mxu0 }
 0x1ca   :  { %v1341_v36 = vadd.f32 %v1340_v23, %v1068_v28  ;;  %v6305_v23 = vld [vmem:[#allocation59_spill] sm:$0xff]  ;;  %v6307_v28 = vld [vmem:[#allocation65_spill] sm:$0xff] }
 0x1cc   :  { %v1475_v20 = vpop.f32.mrf.mxu1 }
 0x1cd   :  { %v1476_v61 = vadd.f32 %v1475_v20, %v1331_v16 }
 0x1ce   :  { %v1477_v35 = vpop.f32.mrf.mxu1 }
 0x1cf   :  { %v1488_v4 = vmax.f32 %v1476_v61, 0.0  ;;  %v1478_v62 = vadd.f32 %v1477_v35, %v1333_v43  ;;  %v6303_v43 = vld [vmem:[#allocation89_spill] sm:$0xff]  ;;  %v6304_v61 = vld [vmem:[#allocation75_spill] sm:$0xff] }
 0x1d0   :  { %v1483_v10 = vpop.f32.mrf.mxu1  ;;  %v6306_v35 = vld [vmem:[#allocation79_spill] sm:$0xff] }
 0x1d1   :  { %v4979_v17 = vand.u32 4294901760, %v1488_v4  ;;  %v1489_v25 = vmax.f32 %v1478_v62, 0.0  ;;  %v1484_v58 = vadd.f32 %v1483_v10, %v1339_v41  ;;  %v6308_v41 = vld [vmem:[#allocation92_spill] sm:$0xff]  ;;  %v6310_v62 = vld [vmem:[#allocation30_spill] sm:$0xff]  ;;  %v6311_v10 = vld [vmem:[#allocation69_spill] sm:$0xff] }
 0x1d2   :  { %v1485_v29 = vpop.f32.mrf.mxu1 }
 0x1d3   :  { %6300 = vst [vmem:[#allocation113_spill] sm:$0xff] %v4979_v17  ;;  %v4982_v37 = vsub.f32 %v1488_v4, %v4979_v17  ;;  %v4984_v60 = vand.u32 4294901760, %v1489_v25  ;;  %v1490_v40 = vmax.f32 %v1484_v58, 0.0  ;;  %v1486_v51 = vadd.f32 %v1485_v29, %v1341_v36  ;;  %v6309_v4 = vld [vmem:[#allocation67_spill] sm:$0xff]  ;;  %v6312_v36 = vld [vmem:[#allocation32_spill] sm:$0xff]  ;;  %v6315_v29 = vld [vmem:[#allocation73_spill] sm:$0xff] }
 0x1d4   :  { %v6314_v58 = vld [vmem:[#allocation15_spill] sm:$0xff] }
 0x1d5   :  { %v5834_v32 = vand.u32 4294901760, %v4982_v37  ;;  %v1697_v0 = vsub.f32 %v1489_v25, %v4984_v60  ;;  %v4988_v42 = vand.u32 4294901760, %v1490_v40  ;;  %v1491_v3 = vmax.f32 %v1486_v51, 0.0  ;;  %2114 = vmatprep.mubr.f32.mxu1 %v4984_v60  ;;  %v6313_v25 = vld [vmem:[#allocation71_spill] sm:$0xff]  ;;  %v6317_v51 = vld [vmem:[#allocation77_spill] sm:$0xff] }
 0x1d6   :  { %2116 = vmatmul.mubr.f32.vlgmr.msra.gmra.mxu1 %v4979_v17  ;;  %v6334_v17 = vld [vmem:[#allocation54_spill] sm:$0xff] }
 0x1d7   :  { %6301 = vst [vmem:[#allocation114_spill] sm:$0xff] %v4988_v42  ;;  %v4993_v59 = vsub.f32 %v1490_v40, %v4988_v42  ;;  %v4995_v57 = vand.u32 4294901760, %v1491_v3  ;;  %2346 = vmatpush1.msra.mxu1 %v4326_v19  ;;  %v1698_v39 = vand.u32 4294901760, %v1697_v0  ;;  %v1705_v49 = vsub.f32 %v4982_v37, %v5834_v32  ;;  %v6316_v40 = vld [vmem:[#allocation36_spill] sm:$0xff]  ;;  %v6331_v32 = vld [vmem:[#allocation17_spill] sm:$0xff] }
 0x1d8   :  { %2348 = vmatprep.subr.mxu1 %v4332_v18 }
 0x1d9   :  { %6302 = vst [vmem:[#allocation115_spill] sm:$0xff] %v4995_v57  ;;  %v5003_v63 = vsub.f32 %v1491_v3, %v4995_v57  ;;  %2350 = vmatpush1.msra.mxu1 %v4338_v38  ;;  %2122 = vmatprep.mubr.f32.mxu1 %v4995_v57  ;;  %v1699_v13 = vsub.f32 %v1697_v0, %v1698_v39  ;;  %v5832_v8 = vand.u32 4294901760, %v4993_v59  ;;  %v1706_v34 = vand.u32 4294901760, %v1705_v49  ;;  %v6319_v3 = vld [vmem:[#allocation90_spill] sm:$0xff] }
 0x1da   :  { %2352 = vmatprep.subr.mxu1 %v4345_v9  ;;  %2124 = vmatmul.mubr.f32.gmra.mxu1 %v4988_v42  ;;  %v6321_v49 = vld [vmem:[#allocation94_spill] sm:$0xff]  ;;  %v6332_v42 = vld [vmem:[#allocation52_spill] sm:$0xff] }
 0x1db   :  { %2354 = vmatpush1.msra.mxu1 %v4353_v15  ;;  %2474 = vmatprep.mubr.f32.mxu1 %v1698_v39  ;;  %v1700_v44 = vand.u32 4294901760, %v1699_v13  ;;  %v5833_v21 = vand.u32 4294901760, %v5003_v63  ;;  %v1721_v5 = vsub.f32 %v4993_v59, %v5832_v8  ;;  %v6320_v39 = vld [vmem:[#allocation40_spill] sm:$0xff]  ;;  %v6322_v13 = vld [vmem:[#allocation42_spill] sm:$0xff] }
 0x1dc   :  { %2356 = vmatprep.subr.mxu1 %v4363_v53  ;;  %v6329_v8 = vld [vmem:[#allocation16_spill] sm:$0xff]  ;;  %v6333_v57 = vld [vmem:[#allocation18_spill] sm:$0xff] }
 0x1dd   :  { %2358 = vmatpush1.msra.mxu1 %v4373_v22  ;;  %1701 = vmatprep.mubr.f32.mxu0 %v1700_v44  ;;  %v1715_v20 = vsub.f32 %v5003_v63, %v5833_v21  ;;  %v1722_v31 = vand.u32 4294901760, %v1721_v5  ;;  %v6323_v44 = vld [vmem:[#allocation13_spill] sm:$0xff]  ;;  %v6326_v5 = vld [vmem:[#allocation46_spill] sm:$0xff]  ;;  %v6330_v21 = vld [vmem:[#allocation23_spill] sm:$0xff] }
 0x1de   :  { %2360 = vmatprep.subr.mxu1 %v4396_v56  ;;  %1707 = vmatmul.mubr.f32.vlgmr.msra.gmra.mxu0 %v1706_v34  ;;  %v6324_v34 = vld [vmem:[#allocation44_spill] sm:$0xff] }
 0x1df   :  { %2135 = vmatpush1.msra.mxu0 %v4336_v2  ;;  %2362 = vmatpush1.msra.mxu1 %v4402_v45  ;;  %v1716_v16 = vand.u32 4294901760, %v1715_v20  ;;  %v6325_v20 = vld [vmem:[#allocation14_spill] sm:$0xff] }
 0x1e0   :  { %2138 = vmatprep.subr.mxu0 %v4343_v52  ;;  %2364 = vmatprep.subr.mxu1 %v4410_v50 }
 0x1e1   :  { %2141 = vmatpush1.msra.mxu0 %v4351_v11  ;;  %2366 = vmatpush1.msra.mxu1 %v4419_v12 }
 0x1e2   :  { %1717 = vmatprep.mubr.f32.mxu0 %v1716_v16  ;;  %2144 = vmatprep.subr.mxu0 %v4361_v54  ;;  %v6327_v16 = vld [vmem:[#allocation34_spill] sm:$0xff] }
 0x1e3   :  { %2368 = vmatprep.subr.mxu1 %v4426_v1  ;;  %1723 = vmatmul.mubr.f32.gmra.mxu0 %v1722_v31  ;;  %v6328_v31 = vld [vmem:[#allocation48_spill] sm:$0xff] }
 0x1e4   :  { %2147 = vmatpush1.msra.mxu0 %v4371_v6  ;;  %2370 = vmatpush1.msra.mxu1 %v4433_v14 }
 0x1e5   :  { %2150 = vmatprep.subr.mxu0 %v4381_v24  ;;  %2324 = vmatprep.mubr.f32.mxu0 %v1697_v0  ;;  %v6318_v0 = vld [vmem:[#allocation38_spill] sm:$0xff] }
 0x1e6   :  { %2372 = vmatprep.subr.mxu1 %v4443_v48  ;;  %2153 = vmatpush1.msra.mxu0 %v4389_v33 }
 0x1e7   :  { %2374 = vmatpush1.msra.mxu1 %v4453_v55  ;;  %2156 = vmatprep.subr.mxu0 %v4408_v46 }
 0x1e8   :  { %2376 = vmatprep.subr.mxu1 %v4476_v7  ;;  %2159 = vmatpush1.msra.mxu0 %v4417_v30 }
 0x1e9   :  { %2378 = vmatpush1.msra.mxu1 %v4482_v26  ;;  %2162 = vmatprep.subr.mxu0 %v4424_v47 }
 0x1ea   :  { %2380 = vmatprep.subr.mxu1 %v4490_v27  ;;  %2165 = vmatpush1.msra.mxu0 %v6303_v43 }
 0x1eb   :  { %2382 = vmatpush1.msra.mxu1 %v6304_v61  ;;  %2168 = vmatprep.subr.mxu0 %v6305_v23 }
 0x1ec   :  { %2384 = vmatprep.subr.mxu1 %v6306_v35  ;;  %2171 = vmatpush1.msra.mxu0 %v6307_v28 }
 0x1ed   :  { %2386 = vmatpush1.msra.mxu1 %v6308_v41  ;;  %2174 = vmatprep.subr.mxu0 %v6309_v4 }
 0x1ee   :  { %2388 = vmatprep.subr.mxu1 %v6310_v62  ;;  %2177 = vmatpush1.msra.mxu0 %v6311_v10 }
 0x1ef   :  { %2390 = vmatpush1.msra.mxu1 %v6312_v36  ;;  %2180 = vmatprep.subr.mxu0 %v6313_v25 }
 0x1f0   :  { %2392 = vmatprep.subr.mxu1 %v6314_v58  ;;  %2183 = vmatpush1.msra.mxu0 %v6315_v29 }
 0x1f1   :  { %2394 = vmatpush1.msra.mxu1 %v6316_v40  ;;  %2186 = vmatprep.subr.mxu0 %v6317_v51 }
 0x1f2   :  { %2396 = vmatprep.subr.mxu1 %v6318_v0  ;;  %2189 = vmatpush1.msra.mxu0 %v6319_v3 }
 0x1f3   :  { %2398 = vmatpush1.msra.mxu1 %v6320_v39  ;;  %2192 = vmatprep.subr.mxu0 %v6321_v49 }
 0x1f4   :  { %2400 = vmatprep.subr.mxu1 %v6322_v13  ;;  %2195 = vmatpush1.msra.mxu0 %v6323_v44 }
 0x1f5   :  { %2402 = vmatpush1.msra.mxu1 %v6324_v34  ;;  %2198 = vmatprep.subr.mxu0 %v6325_v20  ;;  %v6335_v34 = vld [vmem:[#allocation19_spill] sm:$0xff]  ;;  %v6336_v20 = vld [vmem:[#allocation56_spill] sm:$0xff] }
 0x1f6   :  { %2404 = vmatprep.subr.mxu1 %v6326_v5  ;;  %2201 = vmatpush1.msra.mxu0 %v6327_v16  ;;  %v6337_v5 = vld [vmem:[#allocation20_spill] sm:$0xff]  ;;  %v6338_v16 = vld [vmem:[#allocation58_spill] sm:$0xff] }
 0x1f7   :  { %2406 = vmatpush1.msra.mxu1 %v6328_v31  ;;  %2204 = vmatprep.subr.mxu0 %v6329_v8  ;;  %v6339_v31 = vld [vmem:[#allocation21_spill] sm:$0xff]  ;;  %v6340_v8 = vld [vmem:[#allocation60_spill] sm:$0xff] }
 0x1f8   :  { %2408 = vmatprep.subr.mxu1 %v6330_v21  ;;  %2207 = vmatpush1.msra.mxu0 %v6331_v32  ;;  %v6341_v21 = vld [vmem:[#allocation22_spill] sm:$0xff] }
 0x1f9   :  { %2410 = vmatpush2.msra.mxu1 %v6332_v42  ;;  %2210 = vmatprep.subr.mxu0 %v6333_v57  ;;  %v6342_v32 = vld [vmem:[#allocation62_spill] sm:$0xff]  ;;  %v6344_v57 = vld [vmem:[#allocation64_spill] sm:$0xff] }
 0x1fa   :  { %2412 = vmatprep.subr.mxu1 %v6334_v17  ;;  %2213 = vmatpush1.msra.mxu0 %v6335_v34  ;;  %v6343_v42 = vld [vmem:[#allocation50_spill] sm:$0xff]  ;;  %v6345_v17 = vld [vmem:[#allocation24_spill] sm:$0xff]  ;;  %v6346_v34 = vld [vmem:[#allocation33_spill] sm:$0xff] }
 0x1fb   :  { %2414 = vmatpush2.msra.mxu1 %v6336_v20  ;;  %2216 = vmatprep.subr.mxu0 %v6337_v5  ;;  %v6347_v20 = vld [vmem:[#allocation25_spill] sm:$0xff]  ;;  %v6348_v5 = vld [vmem:[#allocation35_spill] sm:$0xff] }
 0x1fc   :  { %2416 = vmatprep.subr.mxu1 %v6338_v16  ;;  %2219 = vmatpush1.msra.mxu0 %v6339_v31  ;;  %v6349_v16 = vld [vmem:[#allocation26_spill] sm:$0xff] }
 0x1fd   :  { %2418 = vmatpush2.msra.mxu1 %v6340_v8  ;;  %2222 = vmatprep.subr.mxu0 %v6341_v21  ;;  %v6350_v31 = vld [vmem:[#allocation70_spill] sm:$0xff]  ;;  %v6351_v8 = vld [vmem:[#allocation27_spill] sm:$0xff]  ;;  %v6352_v21 = vld [vmem:[#allocation72_spill] sm:$0xff] }
 0x1fe   :  { %2420 = vmatprep.subr.mxu1 %v6342_v32  ;;  %2225 = vmatpush1.msra.mxu0 %v6343_v42  ;;  %v6353_v32 = vld [vmem:[#allocation28_spill] sm:$0xff]  ;;  %v6354_v42 = vld [vmem:[#allocation74_spill] sm:$0xff] }
 0x1ff   :  { %2422 = vmatpush2.msra.mxu1 %v6344_v57  ;;  %2228 = vmatprep.subr.mxu0 %v6345_v17  ;;  %v6355_v57 = vld [vmem:[#allocation29_spill] sm:$0xff] }
 0x200   :  { %2424 = vmatprep.subr.mxu1 %v6346_v34  ;;  %2231 = vmatpush2.msra.mxu0 %v6347_v20  ;;  %v6356_v17 = vld [vmem:[#allocation41_spill] sm:$0xff]  ;;  %v6357_v34 = vld [vmem:[#allocation31_spill] sm:$0xff] }
 0x201   :  { %2426 = vmatpush2.msra.mxu1 %v6348_v5  ;;  %2234 = vmatprep.subr.mxu0 %v6349_v16  ;;  %v6358_v20 = vld [vmem:[#allocation43_spill] sm:$0xff]  ;;  %v6359_v5 = vld [vmem:[#allocation66_spill] sm:$0xff]  ;;  %v6360_v16 = vld [vmem:[#allocation80_spill] sm:$0xff] }
 0x202   :  { %2428 = vmatprep.subr.mxu1 %v6350_v31  ;;  %2237 = vmatpush2.msra.mxu0 %v6351_v8  ;;  %v6361_v31 = vld [vmem:[#allocation68_spill] sm:$0xff]  ;;  %v6362_v8 = vld [vmem:[#allocation49_spill] sm:$0xff] }
 0x203   :  { %2430 = vmatpush2.msra.mxu1 %v6352_v21  ;;  %2240 = vmatprep.subr.mxu0 %v6353_v32  ;;  %v6363_v21 = vld [vmem:[#allocation37_spill] sm:$0xff]  ;;  %v6364_v32 = vld [vmem:[#allocation84_spill] sm:$0xff] }
 0x204   :  { %2432 = vmatprep.subr.mxu1 %v6354_v42  ;;  %2243 = vmatpush2.msra.mxu0 %v6355_v57  ;;  %v6365_v42 = vld [vmem:[#allocation39_spill] sm:$0xff]  ;;  %v6366_v57 = vld [vmem:[#allocation86_spill] sm:$0xff] }
 0x205   :  { %2434 = vmatpush2.msra.mxu1 %v6356_v17  ;;  %2246 = vmatprep.subr.mxu0 %v6357_v34  ;;  %v6367_v17 = vld [vmem:[#allocation76_spill] sm:$0xff] }
 0x206   :  { %2436 = vmatprep.subr.mxu1 %v6358_v20  ;;  %2249 = vmatpush2.msra.mxu0 %v6359_v5  ;;  %v6368_v34 = vld [vmem:[#allocation88_spill] sm:$0xff]  ;;  %v6369_v20 = vld [vmem:[#allocation78_spill] sm:$0xff]  ;;  %v6370_v5 = vld [vmem:[#allocation91_spill] sm:$0xff] }
 0x207   :  { %2438 = vmatpush2.msra.mxu1 %v6360_v16  ;;  %2252 = vmatprep.subr.mxu0 %v6361_v31  ;;  %v6371_v16 = vld [vmem:[#allocation45_spill] sm:$0xff] }
 0x208   :  { %2440 = vmatprep.subr.mxu1 %v6362_v8  ;;  %2255 = vmatpush2.msra.mxu0 %v6363_v21  ;;  %v6372_v31 = vld [vmem:[#allocation93_spill] sm:$0xff]  ;;  %v6373_v8 = vld [vmem:[#allocation47_spill] sm:$0xff] }
 0x209   :  { %2442 = vmatpush2.msra.mxu1 %v6364_v32  ;;  %2258 = vmatprep.subr.mxu0 %v6365_v42  ;;  %v6374_v21 = vld [vmem:[#allocation95_spill] sm:$0xff]  ;;  %v6375_v32 = vld [vmem:[#allocation82_spill] sm:$0xff]  ;;  %v6376_v42 = vld [vmem:[#allocation100_spill] sm:$0xff] }
 0x20a   :  { %2444 = vmatprep.subr.mxu1 %v6366_v57  ;;  %2261 = vmatpush2.msra.mxu0 %v6367_v17  ;;  %v6377_v57 = vld [vmem:[#allocation53_spill] sm:$0xff]  ;;  %v6378_v17 = vld [vmem:[#allocation83_spill] sm:$0xff] }
 0x20b   :  { %2446 = vmatpush2.msra.mxu1 %v6368_v34  ;;  %2264 = vmatprep.subr.mxu0 %v6369_v20  ;;  %v6379_v34 = vld [vmem:[#allocation55_spill] sm:$0xff]  ;;  %v6380_v20 = vld [vmem:[#allocation101_spill] sm:$0xff] }
 0x20c   :  { %2448 = vmatprep.subr.mxu1 %v6370_v5  ;;  %2267 = vmatpush2.msra.mxu0 %v6371_v16  ;;  %v6381_v5 = vld [vmem:[#allocation57_spill] sm:$0xff]  ;;  %v6382_v16 = vld [vmem:[#allocation98_spill] sm:$0xff] }
 0x20d   :  { %2450 = vmatpush2.msra.mxu1 %v6372_v31  ;;  %2270 = vmatprep.subr.mxu0 %v6373_v8  ;;  %v6383_v31 = vld [vmem:[#allocation61_spill] sm:$0xff]  ;;  %v6384_v8 = vld [vmem:[#allocation99_spill] sm:$0xff] }
 0x20e   :  { %2452 = vmatprep.subr.mxu1 %v6374_v21  ;;  %2273 = vmatpush2.msra.mxu0 %v6375_v32  ;;  %v6385_v21 = vld [vmem:[#allocation63_spill] sm:$0xff] }
 0x20f   :  { %2454 = vmatpush2.msra.mxu1 %v6376_v42  ;;  %2276 = vmatprep.subr.mxu0 %v6377_v57  ;;  %v6386_v32 = vld [vmem:[#allocation103_spill] sm:$0xff]  ;;  %v6387_v42 = vld [vmem:[#allocation96_spill] sm:$0xff] }
 0x210   :  { %2456 = vmatprep.subr.mxu1 %v6378_v17  ;;  %2279 = vmatpush2.msra.mxu0 %v6379_v34  ;;  %v6388_v57 = vld [vmem:[#allocation104_spill] sm:$0xff]  ;;  %v6389_v17 = vld [vmem:[#allocation97_spill] sm:$0xff]  ;;  %v6390_v34 = vld [vmem:[#allocation106_spill] sm:$0xff] }
 0x211   :  { %2458 = vmatpush2.msra.mxu1 %v6380_v20  ;;  %2282 = vmatprep.subr.mxu0 %v6381_v5  ;;  %v6391_v20 = vld [vmem:[#allocation81_spill] sm:$0xff]  ;;  %v6392_v5 = vld [vmem:[#allocation110_spill] sm:$0xff] }
 0x212   :  { %2460 = vmatprep.subr.mxu1 %v6382_v16  ;;  %2285 = vmatpush2.msra.mxu0 %v6383_v31  ;;  %v6393_v16 = vld [vmem:[#allocation85_spill] sm:$0xff] }
 0x213   :  { %2462 = vmatpush2.msra.mxu1 %v6384_v8  ;;  %2288 = vmatprep.subr.mxu0 %v6385_v21  ;;  %v6394_v8 = vand.u32 4294901760, %v4982_v37  ;;  %v6395_v21 = vld [vmem:[#allocation12_spill] sm:$0xff] }
 0x214   :  { %2464 = vmatprep.subr.mxu1 %v6386_v32  ;;  %2291 = vmatpush2.msra.mxu0 %v6387_v42  ;;  %v6396_v32 = vld [vmem:[#allocation87_spill] sm:$0xff]  ;;  %v6397_v42 = vand.u32 4294901760, %v5003_v63 }
 0x215   :  { %2466 = vmatpush2.msra.mxu1 %v6388_v57  ;;  %2294 = vmatprep.subr.mxu0 %v6389_v17  ;;  %v6398_v17 = vld [vmem:[#allocation102_spill] sm:$0xff] }
 0x216   :  { %2468 = vmatprep.subr.mxu1 %v6390_v34  ;;  %2297 = vmatpush2.msra.mxu0 %v6391_v20  ;;  %v6399_v20 = vld [vmem:[#allocation105_spill] sm:$0xff] }
 0x217   :  { %2470 = vmatpush2.msra.mxu1 %v6392_v5  ;;  %2300 = vmatprep.subr.mxu0 %v6393_v16  ;;  %v6400_v16 = vld [vmem:[#allocation107_spill] sm:$0xff] }
 0x218   :  { %2478 = vmatmul.mubr.f32.vlgmr.msra.gmra.mxu1 %v6394_v8  ;;  %2770 = vmatprep.subr.mxu1 %v6395_v21  ;;  %v6401_v8 = vand.u32 4294901760, %v4993_v59  ;;  %v6402_v21 = vld [vmem:[#allocation108_spill] sm:$0xff] }
 0x219   :  { %2303 = vmatpush2.msra.mxu0 %v6396_v32  ;;  %2486 = vmatprep.mubr.f32.mxu1 %v6397_v42 }
 0x21a   :  { %2772 = vmatpush1.msra.mxu1 %v4326_v19  ;;  %2306 = vmatprep.subr.mxu0 %v6398_v17  ;;  %v6403_v19 = vld [vmem:[#allocation109_spill] sm:$0xff] }
 0x21b   :  { %2774 = vmatprep.subr.mxu1 %v4332_v18  ;;  %2309 = vmatpush2.msra.mxu0 %v6399_v20  ;;  %v6404_v18 = vld [vmem:[#allocation111_spill] sm:$0xff] }
 0x21c   :  { %2776 = vmatpush1.msra.mxu1 %v4338_v38  ;;  %2312 = vmatprep.subr.mxu0 %v6400_v16  ;;  %v6405_v38 = vld [vmem:[#allocation51_spill] sm:$0xff] }
 0x21d   :  { %2490 = vmatmul.mubr.f32.gmra.mxu1 %v6401_v8  ;;  %2778 = vmatprep.subr.mxu1 %v4345_v9  ;;  %v6406_v42 = vand.u32 4294901760, %v6405_v38  ;;  %v6407_v9 = vand.u32 4294901760, %v4336_v2  ;;  %v6411_v2 = vand.u32 4294901760, %v4371_v6  ;;  %v6415_v6 = vand.u32 4294901760, %v4417_v30  ;;  %v6458_v38 = vld [vmem:[#allocation64_spill] sm:$0xff] }
 0x21e   :  { %2315 = vmatpush2.msra.mxu0 %v6402_v21  ;;  %2780 = vmatpush1.msra.mxu1 %v4353_v15  ;;  %v6408_v15 = vand.u32 4294901760, %v4343_v52  ;;  %v6412_v52 = vand.u32 4294901760, %v4381_v24  ;;  %v6416_v24 = vand.u32 4294901760, %v4424_v47  ;;  %v6422_v30 = vand.u32 4294901760, %v6313_v25  ;;  %v6446_v25 = vld [vmem:[#allocation56_spill] sm:$0xff] }
 0x21f   :  { %2898 = vmatprep.mubr.f32.mxu1 %v4984_v60  ;;  %2318 = vmatprep.subr.mxu0 %v6403_v19  ;;  %v6424_v47 = vand.u32 4294901760, %v6317_v51  ;;  %v6450_v51 = vld [vmem:[#allocation21_spill] sm:$0xff] }
 0x220   :  { %2782 = vmatprep.subr.mxu1 %v4363_v53  ;;  %2321 = vmatpush2.msra.mxu0 %v6404_v18  ;;  %v6409_v53 = vand.u32 4294901760, %v4351_v11  ;;  %v6413_v11 = vand.u32 4294901760, %v4389_v33  ;;  %v6417_v33 = vand.u32 4294901760, %v6303_v43 }
 0x221   :  { %2784 = vmatpush1.msra.mxu1 %v4373_v22  ;;  %2327 = vmatmul.mubr.f32.vlgmr.msra.gmra.mxu0 %v4982_v37  ;;  %v6410_v22 = vand.u32 4294901760, %v4361_v54  ;;  %v6414_v54 = vand.u32 4294901760, %v4408_v46  ;;  %v6420_v46 = vand.u32 4294901760, %v6309_v4  ;;  %v6432_v37 = vld [vmem:[#allocation34_spill] sm:$0xff] }
 0x222   :  { %2499 = vmatprep.subr.mxu0 %v6406_v42  ;;  %2786 = vmatprep.subr.mxu1 %v4396_v56  ;;  %v6418_v56 = vand.u32 4294901760, %v6305_v23  ;;  %v6438_v23 = vld [vmem:[#allocation17_spill] sm:$0xff]  ;;  %v6459_v42 = vld [vmem:[#allocation24_spill] sm:$0xff] }
 0x223   :  { %2334 = vmatprep.mubr.f32.mxu0 %v5003_v63  ;;  %2503 = vmatpush1.msra.mxu0 %v6407_v9  ;;  %v6435_v63 = vld [vmem:[#allocation16_spill] sm:$0xff]  ;;  %v6460_v9 = vand.u32 4294901760, %v6459_v42  ;;  %v6512_v42 = vld [vmem:[#allocation101_spill] sm:$0xff] }
 0x224   :  { %2788 = vmatpush1.msra.mxu1 %v4402_v45  ;;  %2507 = vmatprep.subr.mxu0 %v6408_v15  ;;  %v6419_v45 = vand.u32 4294901760, %v6307_v28  ;;  %v6436_v43 = vand.u32 4294901760, %v6435_v63  ;;  %v6440_v28 = vld [vmem:[#allocation52_spill] sm:$0xff]  ;;  %v6461_v15 = vld [vmem:[#allocation33_spill] sm:$0xff] }
 0x225   :  { %2790 = vmatprep.subr.mxu1 %v4410_v50  ;;  %2511 = vmatpush1.msra.mxu0 %v6409_v53  ;;  %v6421_v50 = vand.u32 4294901760, %v6311_v10  ;;  %v6444_v10 = vld [vmem:[#allocation19_spill] sm:$0xff]  ;;  %v6462_v53 = vld [vmem:[#allocation25_spill] sm:$0xff]  ;;  %v6488_v63 = vld [vmem:[#allocation84_spill] sm:$0xff] }
 0x226   :  { %2792 = vmatpush1.msra.mxu1 %v4419_v12  ;;  %2337 = vmatmul.mubr.f32.gmra.mxu0 %v4993_v59  ;;  %v6423_v12 = vand.u32 4294901760, %v6315_v29  ;;  %v6434_v59 = vld [vmem:[#allocation48_spill] sm:$0xff] }
 0x227   :  { %2515 = vmatprep.subr.mxu0 %v6410_v22  ;;  %2794 = vmatprep.subr.mxu1 %v4426_v1  ;;  %v6425_v1 = vand.u32 4294901760, %v6319_v3  ;;  %v6452_v3 = vld [vmem:[#allocation60_spill] sm:$0xff]  ;;  %v6463_v22 = vand.u32 4294901760, %v6462_v53  ;;  %v6515_v53 = vld [vmem:[#allocation98_spill] sm:$0xff] }
 0x228   :  { %2519 = vmatpush1.msra.mxu0 %v6411_v2  ;;  %2753 = vmatprep.mubr.f32.mxu0 %v4984_v60  ;;  %v6433_v60 = vand.u32 4294901760, %v6432_v37  ;;  %v6464_v2 = vld [vmem:[#allocation35_spill] sm:$0xff]  ;;  %v6485_v37 = vld [vmem:[#allocation49_spill] sm:$0xff] }
 0x229   :  { %2796 = vmatpush1.msra.mxu1 %v4433_v14  ;;  %2523 = vmatprep.subr.mxu0 %v6412_v52  ;;  %v6426_v14 = vand.u32 4294901760, %v6321_v49  ;;  %v6465_v52 = vld [vmem:[#allocation26_spill] sm:$0xff] }
 0x22a   :  { %2798 = vmatprep.subr.mxu1 %v4443_v48  ;;  %2527 = vmatpush1.msra.mxu0 %v6413_v11  ;;  %v6427_v48 = vand.u32 4294901760, %v6323_v44  ;;  %v6456_v44 = vld [vmem:[#allocation50_spill] sm:$0xff]  ;;  %v6466_v11 = vand.u32 4294901760, %v6465_v52  ;;  %v6518_v52 = vld [vmem:[#allocation63_spill] sm:$0xff] }
 0x22b   :  { %2800 = vmatpush1.msra.mxu1 %v4453_v55  ;;  %2531 = vmatprep.subr.mxu0 %v6414_v54  ;;  %v6428_v55 = vld [vmem:[#allocation44_spill] sm:$0xff]  ;;  %v6457_v8 = vand.u32 4294901760, %v6456_v44  ;;  %v6467_v54 = vld [vmem:[#allocation70_spill] sm:$0xff]  ;;  %v6509_v44 = vld [vmem:[#allocation83_spill] sm:$0xff] }
 0x22c   :  { %2802 = vmatprep.subr.mxu1 %v4476_v7  ;;  %2535 = vmatpush1.msra.mxu0 %v6415_v6  ;;  %v6429_v7 = vld [vmem:[#allocation14_spill] sm:$0xff]  ;;  %v6468_v6 = vld [vmem:[#allocation27_spill] sm:$0xff] }
 0x22d   :  { %2804 = vmatpush1.msra.mxu1 %v4482_v26  ;;  %2539 = vmatprep.subr.mxu0 %v6416_v24  ;;  %v6430_v26 = vand.u32 4294901760, %v6429_v7  ;;  %v6469_v24 = vand.u32 4294901760, %v6468_v6  ;;  %v6482_v7 = vld [vmem:[#allocation80_spill] sm:$0xff] }
 0x22e   :  { %2806 = vmatprep.subr.mxu1 %v4490_v27  ;;  %2543 = vmatpush1.msra.mxu0 %v6417_v33  ;;  %v6431_v27 = vld [vmem:[#allocation46_spill] sm:$0xff]  ;;  %v6470_v33 = vld [vmem:[#allocation72_spill] sm:$0xff] }
 0x22f   :  { %2808 = vmatpush1.msra.mxu1 %v6304_v61  ;;  %2547 = vmatprep.subr.mxu0 %v6418_v56  ;;  %v6437_v61 = vld [vmem:[#allocation23_spill] sm:$0xff]  ;;  %v6471_v56 = vld [vmem:[#allocation28_spill] sm:$0xff] }
 0x230   :  { %2810 = vmatprep.subr.mxu1 %v6306_v35  ;;  %2551 = vmatpush1.msra.mxu0 %v6419_v45  ;;  %v6439_v35 = vand.u32 4294901760, %v6438_v23  ;;  %v6472_v45 = vand.u32 4294901760, %v6471_v56  ;;  %v6491_v23 = vld [vmem:[#allocation86_spill] sm:$0xff]  ;;  %v6521_v6 = vld [vmem:[#allocation96_spill] sm:$0xff] }
 0x231   :  { %2812 = vmatpush1.msra.mxu1 %v6308_v41  ;;  %2555 = vmatprep.subr.mxu0 %v6420_v46  ;;  %v6441_v41 = vld [vmem:[#allocation18_spill] sm:$0xff] }
 0x232   :  { %2814 = vmatprep.subr.mxu1 %v6310_v62  ;;  %2559 = vmatpush1.msra.mxu0 %v6421_v50  ;;  %v6442_v4 = vand.u32 4294901760, %v6441_v41  ;;  %v6443_v62 = vld [vmem:[#allocation54_spill] sm:$0xff]  ;;  %v6474_v50 = vld [vmem:[#allocation29_spill] sm:$0xff]  ;;  %v6494_v41 = vld [vmem:[#allocation88_spill] sm:$0xff] }
 0x233   :  { %2816 = vmatpush1.msra.mxu1 %v6312_v36  ;;  %2563 = vmatprep.subr.mxu0 %v6422_v30  ;;  %v6445_v36 = vand.u32 4294901760, %v6444_v10  ;;  %v6473_v46 = vld [vmem:[#allocation74_spill] sm:$0xff]  ;;  %v6475_v30 = vand.u32 4294901760, %v6474_v50  ;;  %v6497_v10 = vld [vmem:[#allocation91_spill] sm:$0xff] }
 0x234   :  { %2818 = vmatprep.subr.mxu1 %v6314_v58  ;;  %2567 = vmatpush1.msra.mxu0 %v6423_v12  ;;  %v6447_v58 = vld [vmem:[#allocation20_spill] sm:$0xff]  ;;  %v6476_v12 = vld [vmem:[#allocation41_spill] sm:$0xff] }
 0x235   :  { %2820 = vmatpush1.msra.mxu1 %v6316_v40  ;;  %2571 = vmatprep.subr.mxu0 %v6424_v47  ;;  %v6448_v29 = vand.u32 4294901760, %v6447_v58  ;;  %v6449_v40 = vld [vmem:[#allocation58_spill] sm:$0xff]  ;;  %v6477_v47 = vld [vmem:[#allocation31_spill] sm:$0xff]  ;;  %v6500_v58 = vld [vmem:[#allocation93_spill] sm:$0xff] }
 0x236   :  { %2822 = vmatprep.subr.mxu1 %v6318_v0  ;;  %2575 = vmatpush1.msra.mxu0 %v6425_v1  ;;  %v6451_v0 = vand.u32 4294901760, %v6450_v51  ;;  %v6478_v1 = vand.u32 4294901760, %v6477_v47  ;;  %v6503_v51 = vld [vmem:[#allocation95_spill] sm:$0xff] }
 0x237   :  { %2824 = vmatpush1.msra.mxu1 %v6320_v39  ;;  %2579 = vmatprep.subr.mxu0 %v6426_v14  ;;  %v6453_v39 = vld [vmem:[#allocation22_spill] sm:$0xff]  ;;  %v6479_v14 = vld [vmem:[#allocation43_spill] sm:$0xff] }
 0x238   :  { %2826 = vmatprep.subr.mxu1 %v6322_v13  ;;  %2583 = vmatpush1.msra.mxu0 %v6427_v48  ;;  %v6454_v49 = vand.u32 4294901760, %v6453_v39  ;;  %v6455_v13 = vld [vmem:[#allocation62_spill] sm:$0xff]  ;;  %v6506_v39 = vld [vmem:[#allocation100_spill] sm:$0xff]  ;;  %v6531_v47 = vld [vmem:[#allocation115_spill] sm:$0xff] }
 0x239   :  { %2828 = vmatpush1.msra.mxu1 %v6428_v55  ;;  %2587 = vmatprep.subr.mxu0 %v6430_v26  ;;  %v6480_v48 = vld [vmem:[#allocation66_spill] sm:$0xff]  ;;  %v6483_v26 = vld [vmem:[#allocation68_spill] sm:$0xff] }
 0x23a   :  { %2830 = vmatprep.subr.mxu1 %v6431_v27  ;;  %2591 = vmatpush1.msra.mxu0 %v6433_v60  ;;  %v6481_v55 = vand.u32 4294901760, %v6480_v48  ;;  %v6484_v27 = vand.u32 4294901760, %v6483_v26  ;;  %v6486_v60 = vld [vmem:[#allocation37_spill] sm:$0xff]  ;;  %v6537_v48 = vand.u32 4294901760, %v6403_v19  ;;  %v1556_v19 = vld [vmem:[%s5365_s4] sm:$0x3] }
 0x23b   :  { %2832 = vmatpush1.msra.mxu1 %v6434_v59  ;;  %2595 = vmatprep.subr.mxu0 %v6436_v43  ;;  %v6487_v59 = vand.u32 4294901760, %v6486_v60  ;;  %v6489_v43 = vld [vmem:[#allocation39_spill] sm:$0xff]  ;;  %s3037_s4 = smov [#allocation8]  }
 0x23c   :  { %2834 = vmatprep.subr.mxu1 %v6437_v61  ;;  %2599 = vmatpush1.msra.mxu0 %v6439_v35  ;;  %v6490_v61 = vand.u32 4294901760, %v6489_v43  ;;  %v6492_v35 = vld [vmem:[#allocation76_spill] sm:$0xff]  ;;  %s2927_s10 = sshll.u32 %s3037_s4, 4  ;;  %s2928_s10 = int_to_ptr.vmem [resolvable:$true] %s2927_s10 }
 0x23d   :  { %2836 = vmatpush2.msra.mxu1 %v6440_v28  ;;  %2603 = vmatprep.subr.mxu0 %v6442_v4  ;;  %v6493_v28 = vand.u32 4294901760, %v6492_v35  ;;  %v6495_v4 = vld [vmem:[#allocation78_spill] sm:$0xff]  ;;  %s3006_s11 = scalar_lea.vmem %s2928_s10, 512  ;;  %p3011_p2 = scmp.lt.s32.totalorder %s2928_s10, %s2928_s10 }
 0x23e   :  { %2838 = vmatprep.subr.mxu1 %v6443_v62  ;;  %2607 = vmatpush1.msra.mxu0 %v6445_v36  ;;  %v6496_v62 = vand.u32 4294901760, %v6495_v4  ;;  %v6498_v36 = vld [vmem:[#allocation45_spill] sm:$0xff]  ;;  %p3007_p1 = scmp.ne.s32.totalorder %s2928_s10, %s3006_s11  ;;  %p3012_p3 = scmp.lt.s32.totalorder %s3006_s11, %s3006_s11 }
 0x23f   :  { %2840 = vmatpush2.msra.mxu1 %v6446_v25  ;;  %2611 = vmatprep.subr.mxu0 %v6448_v29  ;;  %v6499_v25 = vand.u32 4294901760, %v6498_v36  ;;  %v6501_v29 = vld [vmem:[#allocation47_spill] sm:$0xff] }
 0x240   :  { %2842 = vmatprep.subr.mxu1 %v6449_v40  ;;  %2615 = vmatpush1.msra.mxu0 %v6451_v0  ;;  %v6502_v40 = vand.u32 4294901760, %v6501_v29  ;;  %v6504_v0 = vld [vmem:[#allocation82_spill] sm:$0xff]  ;;  %p3013_p4 = por %p3012_p3, %p3011_p2 }
 0x241   :  { %2844 = vmatpush2.msra.mxu1 %v6452_v3  ;;  %2619 = vmatprep.subr.mxu0 %v6454_v49  ;;  %v6505_v3 = vand.u32 4294901760, %v6504_v0  ;;  %v6507_v49 = vld [vmem:[#allocation53_spill] sm:$0xff] }
 0x242   :  { %2846 = vmatprep.subr.mxu1 %v6455_v13  ;;  %2623 = vmatpush1.msra.mxu0 %v6457_v8  ;;  %v6508_v13 = vand.u32 4294901760, %v6507_v49  ;;  %v6510_v8 = vld [vmem:[#allocation55_spill] sm:$0xff]  ;;  %p3014_p5 = pnand %p3013_p4, %p3007_p1 }
 0x243   :  { %2848 = vmatpush2.msra.mxu1 %v6458_v38  ;;  %2627 = vmatprep.subr.mxu0 %v6460_v9  ;;  %v6511_v38 = vand.u32 4294901760, %v6510_v8  ;;  %v6513_v9 = vld [vmem:[#allocation57_spill] sm:$0xff] }
 0x244   :  { %2850 = vmatprep.subr.mxu1 %v6461_v15  ;;  %2631 = vmatpush2.msra.mxu0 %v6463_v22  ;;  %v6514_v15 = vand.u32 4294901760, %v6513_v9  ;;  %v6516_v22 = vand.u32 4294901760, %v6383_v31 }
 0x245   :  { %2852 = vmatpush2.msra.mxu1 %v6464_v2  ;;  %2635 = vmatprep.subr.mxu0 %v6466_v11  ;;  %v6517_v2 = vld [vmem:[#allocation99_spill] sm:$0xff]  ;;  %v6519_v11 = vand.u32 4294901760, %v6518_v52 }
 0x246   :  { %2854 = vmatprep.subr.mxu1 %v6467_v54  ;;  %2639 = vmatpush2.msra.mxu0 %v6469_v24  ;;  %v6520_v54 = vld [vmem:[#allocation103_spill] sm:$0xff]  ;;  %v6522_v24 = vand.u32 4294901760, %v6521_v6 }
 0x247   :  { %2856 = vmatpush2.msra.mxu1 %v6470_v33  ;;  %2643 = vmatprep.subr.mxu0 %v6472_v45  ;;  %v6523_v33 = vld [vmem:[#allocation97_spill] sm:$0xff] }
 0x248   :  { %2858 = vmatprep.subr.mxu1 %v6473_v46  ;;  %2647 = vmatpush2.msra.mxu0 %v6475_v30  ;;  %v6524_v56 = vand.u32 4294901760, %v6523_v33  ;;  %v6525_v45 = vld [vmem:[#allocation81_spill] sm:$0xff] }
 0x249   :  { %2860 = vmatpush2.msra.mxu1 %v6476_v12  ;;  %2651 = vmatprep.subr.mxu0 %v6478_v1  ;;  %v6526_v31 = vand.u32 4294901760, %v6525_v45  ;;  %v6527_v46 = vld [vmem:[#allocation85_spill] sm:$0xff]  ;;  %v6530_v12 = vand.u32 4294901760, %v6396_v32  ;;  %v6534_v1 = vand.u32 4294901760, %v6400_v16  ;;  %v6538_v32 = vand.u32 4294901760, %v6404_v18 }
 0x24a   :  { %2862 = vmatprep.subr.mxu1 %v6479_v14  ;;  %2655 = vmatpush2.msra.mxu0 %v6481_v55  ;;  %v6528_v50 = vand.u32 4294901760, %v6527_v46  ;;  %v6529_v30 = vld [vmem:[#allocation113_spill] sm:$0xff]  ;;  %v6536_v14 = vand.u32 4294901760, %v6402_v21 }
 0x24b   :  { %2864 = vmatpush2.msra.mxu1 %v6482_v7  ;;  %2659 = vmatprep.subr.mxu0 %v6484_v27 }
 0x24c   :  { %2866 = vmatprep.subr.mxu1 %v6485_v37  ;;  %2663 = vmatpush2.msra.mxu0 %v6487_v59  ;;  %v6539_v37 = vld [vmem:[#allocation112_spill] sm:$0xff] }
 0x24d   :  { %2868 = vmatpush2.msra.mxu1 %v6488_v63  ;;  %2667 = vmatprep.subr.mxu0 %v6490_v61  ;;  %v6540_v60 = vsub.s32 0, %v6539_v37  ;;  %v6541_v61 = vsub.s32 1, %v6539_v37 }
 0x24e   :  { %2870 = vmatprep.subr.mxu1 %v6491_v23  ;;  %2671 = vmatpush2.msra.mxu0 %v6493_v28 }
 0x24f   :  { %2872 = vmatpush2.msra.mxu1 %v6494_v41  ;;  %2675 = vmatprep.subr.mxu0 %v6496_v62  ;;  %v1561_v59 = vrot.slane %v1556_v19, %v6540_v60  ;;  %v1565_v23 = vrot.slane %v1556_v19, %v6541_v61 }
 0x250   :  { %2874 = vmatprep.subr.mxu1 %v6497_v10  ;;  %2679 = vmatpush2.msra.mxu0 %v6499_v25 }
 0x251   :  { %2876 = vmatpush2.msra.mxu1 %v6500_v58  ;;  %2683 = vmatprep.subr.mxu0 %v6502_v40 }
 0x252   :  { %2878 = vmatprep.subr.mxu1 %v6503_v51  ;;  %2687 = vmatpush2.msra.mxu0 %v6505_v3 }
 0x253   :  { %2880 = vmatpush2.msra.mxu1 %v6506_v39  ;;  %2691 = vmatprep.subr.mxu0 %v6508_v13 }
 0x254   :  { %2882 = vmatprep.subr.mxu1 %v6509_v44  ;;  %2695 = vmatpush2.msra.mxu0 %v6511_v38 }
 0x255   :  { %2884 = vmatpush2.msra.mxu1 %v6512_v42  ;;  %2699 = vmatprep.subr.mxu0 %v6514_v15 }
 0x256   :  { %2886 = vmatprep.subr.mxu1 %v6515_v53  ;;  %2703 = vmatpush2.msra.mxu0 %v6516_v22 }
 0x257   :  { %2888 = vmatpush2.msra.mxu1 %v6517_v2  ;;  %2707 = vmatprep.subr.mxu0 %v6519_v11 }
 0x258   :  { %2890 = vmatprep.subr.mxu1 %v6520_v54  ;;  %2711 = vmatpush2.msra.mxu0 %v6522_v24 }
 0x259   :  { %2892 = vmatpush2.msra.mxu1 %v6388_v57  ;;  %2715 = vmatprep.subr.mxu0 %v6524_v56  ;;  %v6532_v57 = vand.u32 4294901760, %v6398_v17 }
 0x25a   :  { %2894 = vmatprep.subr.mxu1 %v6390_v34  ;;  %2719 = vmatpush2.msra.mxu0 %v6526_v31  ;;  %v6533_v34 = vand.u32 4294901760, %v6399_v20 }
 0x25b   :  { %2896 = vmatpush2.msra.mxu1 %v6392_v5  ;;  %2723 = vmatprep.subr.mxu0 %v6528_v50  ;;  %v6535_v5 = vld [vmem:[#allocation114_spill] sm:$0xff] }
 0x25c   :  { %2900 = vmatmul.mubr.f32.vlgmr.msra.gmra.mxu1 %v6529_v30  ;;  %2727 = vmatpush2.msra.mxu0 %v6530_v12 }
 0x25d   :  { %2906 = vmatprep.mubr.f32.mxu1 %v6531_v47  ;;  %2731 = vmatprep.subr.mxu0 %v6532_v57 }
 0x25e   :  { %2735 = vmatpush2.msra.mxu0 %v6533_v34 }
 0x25f   :  { %2739 = vmatprep.subr.mxu0 %v6534_v1 }
 0x260   :  { %2908 = vmatmul.mubr.f32.gmra.mxu1 %v6535_v5  ;;  %2743 = vmatpush2.msra.mxu0 %v6536_v14 }
 0x261   :  { %2747 = vmatprep.subr.mxu0 %v6537_v48 }
 0x262   :  { %2751 = vmatpush2.msra.mxu0 %v6538_v32 }
 0x263   :  { %2755 = vmatmul.mubr.f32.vlgmr.msra.gmra.mxu0 %v6529_v30 }
 0x264   :  { %2761 = vmatprep.mubr.f32.mxu0 %v6531_v47 }
 0x267   :  { %2763 = vmatmul.mubr.f32.gmra.mxu0 %v6535_v5 }
 0x296   :  { %v2117_v17 = vpop.f32.mrf.mxu1 }
 0x298   :  { %v2119_v20 = vpop.f32.mrf.mxu1 }
 0x29a   :  { %v2125_v55 = vpop.f32.mrf.mxu1 }
 0x29c   :  { %v2127_v26 = vpop.f32.mrf.mxu1 }
 0x29e   :  { %v1708_v16 = vpop.f32.mrf.mxu0 }
 0x29f   :  { %v1709_v35 = vadd.f32 %v1708_v16, %v1561_v59 }
 0x2a0   :  { %v1710_v7 = vpop.f32.mrf.mxu0 }
 0x2a1   :  { %v1711_v4 = vadd.f32 %v1710_v7, %v1565_v23  ;;  %v2118_v10 = vadd.f32 %v2117_v17, %v1709_v35 }
 0x2a3   :  { %v1724_v21 = vpop.f32.mrf.mxu0  ;;  %v2120_v40 = vadd.f32 %v2119_v20, %v1711_v4 }
 0x2a4   :  { %v1725_v62 = vadd.f32 %v1724_v21, %v1561_v59 }
 0x2a5   :  { %v1726_v18 = vpop.f32.mrf.mxu0 }
 0x2a6   :  { %v1727_v58 = vadd.f32 %v1726_v18, %v1565_v23  ;;  %v2126_v3 = vadd.f32 %v2125_v55, %v1725_v62 }
 0x2a8   :  { %v2128_v13 = vadd.f32 %v2127_v26, %v1727_v58 }
 0x2d8   :  { %v2479_v27 = vpop.f32.mrf.mxu1 }
 0x2da   :  { %v2481_v63 = vpop.f32.mrf.mxu1 }
 0x2dd   :  { %v2491_v28 = vpop.f32.mrf.mxu1 }
 0x2df   :  { %v2493_v36 = vpop.f32.mrf.mxu1 }
 0x2e1   :  { %v2328_v43 = vpop.f32.mrf.mxu0 }
 0x2e2   :  { %v2329_v29 = vadd.f32 %v2328_v43, %v2118_v10 }
 0x2e3   :  { %v2330_v41 = vpop.f32.mrf.mxu0 }
 0x2e4   :  { %v2331_v0 = vadd.f32 %v2330_v41, %v2120_v40  ;;  %v2480_v44 = vadd.f32 %v2479_v27, %v2329_v29 }
 0x2e6   :  { %v2338_v25 = vpop.f32.mrf.mxu0  ;;  %v2482_v15 = vadd.f32 %v2481_v63, %v2331_v0 }
 0x2e7   :  { %v2339_v49 = vadd.f32 %v2338_v25, %v2126_v3 }
 0x2e8   :  { %v2340_v39 = vpop.f32.mrf.mxu0 }
 0x2e9   :  { %v2341_v42 = vadd.f32 %v2340_v39, %v2128_v13  ;;  %v2492_v52 = vadd.f32 %v2491_v28, %v2339_v49 }
 0x2eb   :  { %v2494_v56 = vadd.f32 %v2493_v36, %v2341_v42 }
 0x31c   :  { %v2901_v51 = vpop.f32.mrf.mxu1 }
 0x31e   :  { %v2903_v8 = vpop.f32.mrf.mxu1 }
 0x320   :  { %v2909_v11 = vpop.f32.mrf.mxu1 }
 0x322   :  { %v2911_v30 = vpop.f32.mrf.mxu1 }
 0x323   :  { %v2756_v38 = vpop.f32.mrf.mxu0 }
 0x324   :  { %v2757_v9 = vadd.f32 %v2756_v38, %v2480_v44 }
 0x325   :  { %v2758_v53 = vpop.f32.mrf.mxu0 }
 0x326   :  { %v2902_v22 = vadd.f32 %v2901_v51, %v2757_v9  ;;  %v2759_v2 = vadd.f32 %v2758_v53, %v2482_v15 }
 0x327   :  { %v2764_v54 = vpop.f32.mrf.mxu0 }
 0x328   :  { %v2914_v6 = vmax.f32 %v2902_v22, 0.0  ;;  %v2904_v24 = vadd.f32 %v2903_v8, %v2759_v2  ;;  %v2765_v33 = vadd.f32 %v2764_v54, %v2492_v52 }
 0x329   :  { %v2766_v45 = vpop.f32.mrf.mxu0 }
 0x32a   :  { %2918 = vst [vmem:[#allocation8] sm:$0xff] %v2914_v6  ;;  %v2915_v31 = vmax.f32 %v2904_v24, 0.0  ;;  %v2910_v46 = vadd.f32 %v2909_v11, %v2765_v33  ;;  %v2767_v50 = vadd.f32 %v2766_v45, %v2494_v56 }
 0x32c   :  { %2919 = vst [vmem:[#allocation8 + $0x8] sm:$0xff] %v2915_v31  ;;  %v2916_v12 = vmax.f32 %v2910_v46, 0.0  ;;  %v2912_v47 = vadd.f32 %v2911_v30, %v2767_v50 }
 0x32e   :  { %2920 = vst [vmem:[#allocation8 + $0x10] sm:$0xff] %v2916_v12  ;;  %v2917_v57 = vmax.f32 %v2912_v47, 0.0 }
 0x330   :  { %2921 = vst [vmem:[#allocation8 + $0x18] sm:$0xff] %v2917_v57 }
 0x331   :  { %3017 = shalt.err (!%p3014_p5)
}
 0x332   :  { %2933 = dma.vmem_to_hbm [thread:$0]  %s2928_s10, 512, %s5366_s5, [#allocation4], %s3034_s23, %s3034_s23, %s3035_s24  }
 0x333   :  { %3030 = dma.done.wait [#allocation4], 512  }
 0x334   :  { %3031 = vsyncadd [#allocation4], 4294966784 }
 0x335   :  { %2937 = vsyncpa [#allocation3], 1 }
 0x336   :  { %2938 = vsyncpa [#allocation6], 1 }
 0x337   :  { %2939 = vsyncpa [#allocation4], 1 }

</bundles_post_ra>
